<compile_context>
chip_gen: v5e
topology: v5e:2x2
jax: 0.10.0
libtpu: 0.0.40
codegen_flags: <defaults>
</compile_context>

<pallas_src>
import jax
import jax.numpy as jnp
from jax.experimental import pallas as pl
from jax.experimental.pallas import tpu as pltpu

K_RAW = 28 * 28   # 784
K_PAD = 896       # 7 * 128, lane-aligned padded feature dim
N_CLS = 10        # real number of classes
N_PAD = 128       # lane-padded class dim (one full vreg lane width)


def mlp_softmax_kernel(x_ref,
                       w1_ref, b1_ref,
                       w2_ref, b2_ref,
                       w3_ref, b3_ref,
                       w4_ref, b4_ref,
                       o_ref):
    # Linear(784->1024) + Tanh   (bf16 MXU matmul, f32 accumulate / elementwise)
    h1 = jnp.tanh(
        jnp.dot(x_ref[...], w1_ref[...], preferred_element_type=jnp.float32)
        + b1_ref[...])
    # Linear(1024->512) + ReLU
    h2 = jnp.maximum(
        jnp.dot(h1.astype(jnp.bfloat16), w2_ref[...],
                preferred_element_type=jnp.float32) + b2_ref[...], 0.0)
    # Linear(512->256) + Tanh
    h3 = jnp.tanh(
        jnp.dot(h2.astype(jnp.bfloat16), w3_ref[...],
                preferred_element_type=jnp.float32) + b3_ref[...])
    # Linear(256->10, padded to 128) + ReLU -> logits (ReLU before softmax
    # matches the reference module).
    logits = jnp.maximum(
        jnp.dot(h3.astype(jnp.bfloat16), w4_ref[...],
                preferred_element_type=jnp.float32) + b4_ref[...], 0.0)
    # Mask the padded class columns so they contribute nothing to the softmax.
    col = jax.lax.broadcasted_iota(jnp.int32, (1, N_PAD), 1)
    logits = jnp.where(col < N_CLS, logits, -jnp.inf)
    # Softmax over classes (dim=1), f32; divide via EUP approx reciprocal.
    m = jnp.max(logits, axis=1, keepdims=True)
    e = jnp.exp(logits - m)            # padded cols -> exp(-inf) == 0
    denom = jnp.sum(e, axis=1, keepdims=True)
    o_ref[...] = (e * pl.reciprocal(denom, approx=True)).astype(o_ref.dtype)


def _round_up(n, m):
    return (n + m - 1) // m * m


def neural_network_forward(x_nchw, params, *, tile_m=128):
    """x_nchw: (B, 1, 28, 28) float32. Returns (B, 10) softmax probabilities (f32)."""
    B = x_nchw.shape[0]
    x_flat = x_nchw.reshape(B, K_RAW)                     # nn.Flatten()

    (w1, b1), (w2, b2), (w3, b3), (w4, b4) = params

    # bf16 inputs/weights for the MXU; zero-pad K: 784 -> 896 (zeros add nothing).
    x_bf = jnp.pad(x_flat.astype(jnp.bfloat16), ((0, 0), (0, K_PAD - K_RAW)))
    w1p = jnp.pad(w1.astype(jnp.bfloat16), ((0, K_PAD - K_RAW), (0, 0)))
    w2b = w2.astype(jnp.bfloat16)
    w3b = w3.astype(jnp.bfloat16)
    # Pad the final layer's output dim 10 -> 128 so the kernel's output store
    # is a full 128-lane slab (unmasked vst).  Zero weights/bias + ReLU give
    # zero logits there; the kernel masks them out of the softmax.
    w4p = jnp.pad(w4.astype(jnp.bfloat16), ((0, 0), (0, N_PAD - N_CLS)))
    b4p = jnp.pad(b4, ((0, 0), (0, N_PAD - N_CLS)))

    # Batch tiling: pad B up to a multiple of the row tile (tile >= 8 for sublanes).
    tm = min(tile_m, _round_up(B, 8))
    b_pad = _round_up(B, tm)
    if b_pad != B:
        x_bf = jnp.pad(x_bf, ((0, b_pad - B), (0, 0)))

    def pinned(shape):
        # Same block every grid step -> stays VMEM-resident (loaded once).
        return pl.BlockSpec(shape, lambda i: (0, 0))

    out = pl.pallas_call(
        mlp_softmax_kernel,
        out_shape=jax.ShapeDtypeStruct((b_pad, N_PAD), jnp.float32),
        grid=(b_pad // tm,),
        in_specs=[
            pl.BlockSpec((tm, K_PAD), lambda i: (i, 0)),   # x tile marches over rows
            pinned(w1p.shape), pinned(b1.shape),
            pinned(w2b.shape), pinned(b2.shape),
            pinned(w3b.shape), pinned(b3.shape),
            pinned(w4p.shape), pinned(b4p.shape),
        ],
        out_specs=pl.BlockSpec((tm, N_PAD), lambda i: (i, 0)),
        compiler_params=pltpu.CompilerParams(
            dimension_semantics=("parallel",),   # megacore sharding on v7x, harmless elsewhere
            vmem_limit_bytes=32 << 20,           # ~8 MB real working set; fits every generation
        ),
    )(x_bf, w1p, b1, w2b, b2, w3b, b3, w4p, b4p)
    return out[:B, :N_CLS]


def init_params(key):
    """Weights (in, out) f32 (cast to bf16 at call time); biases (1, out) f32."""
    dims = [(K_RAW, 1024), (1024, 512), (512, 256), (256, N_CLS)]
    params = []
    for fan_in, fan_out in dims:
        kw, kb, key = jax.random.split(key, 3)
        bound = 1.0 / jnp.sqrt(fan_in)  # matches PyTorch nn.Linear default scale
        w = jax.random.uniform(kw, (fan_in, fan_out), jnp.float32, -bound, bound)
        b = jax.random.uniform(kb, (1, fan_out), jnp.float32, -bound, bound)
        params.append((w, b))
    return params


def _reference_forward(x_nchw, params):
    """Pure-JAX f32 reference (mirrors the PyTorch module)."""
    x = x_nchw.reshape(x_nchw.shape[0], K_RAW)
    (w1, b1), (w2, b2), (w3, b3), (w4, b4) = params
    h = jnp.tanh(x @ w1 + b1)
    h = jnp.maximum(h @ w2 + b2, 0.0)
    h = jnp.tanh(h @ w3 + b3)
    logits = jnp.maximum(h @ w4 + b4, 0.0)
    return jax.nn.softmax(logits, axis=1)


if __name__ == "__main__":
    key = jax.random.PRNGKey(0)
    k_x, k_p = jax.random.split(key)

    batch = 8
    x = jax.random.normal(k_x, (batch, 1, 28, 28), dtype=jnp.float32)
    params = init_params(k_p)

    probs = neural_network_forward(x, params)
    probs = jax.block_until_ready(probs)

    # sanity: shape, rows sum to ~1, and agreement with the f32 reference
    # (bf16 matmuls + approx reciprocal -> loose tolerances).
    assert probs.shape == (batch, N_CLS)
    assert jnp.allclose(jnp.sum(probs, axis=1), 1.0, atol=5e-3)
    ref = _reference_forward(x, params)
    assert jnp.allclose(probs, ref, atol=5e-2)

    print("KERNEL_OK")
</pallas_src>

<mosaic_0001>
module attributes {stable_mosaic.version = 11 : i64} {
  func.func @mlp_softmax_kernel(%arg0: i32, %arg1: memref<8x896xbf16, #tpu.memory_space<vmem>>, %arg2: memref<896x1024xbf16, #tpu.memory_space<vmem>>, %arg3: memref<1x1024xf32, #tpu.memory_space<vmem>>, %arg4: memref<1024x512xbf16, #tpu.memory_space<vmem>>, %arg5: memref<1x512xf32, #tpu.memory_space<vmem>>, %arg6: memref<512x256xbf16, #tpu.memory_space<vmem>>, %arg7: memref<1x256xf32, #tpu.memory_space<vmem>>, %arg8: memref<256x128xbf16, #tpu.memory_space<vmem>>, %arg9: memref<1x128xf32, #tpu.memory_space<vmem>>, %arg10: memref<8x128xf32, #tpu.memory_space<vmem>>) attributes {dimension_semantics = [#tpu.dimension_semantics<parallel>], iteration_bounds = array<i64: 1>, scalar_prefetch = 0 : i64, scratch_operands = 0 : i64, tpu.core_type = #tpu.core_type<tc>, window_params = [{transform_indices = @transform_0, window_bounds = array<i64: 8, 896>}, {pipeline_mode = #tpu.pipeline_mode<synchronous>, transform_indices = @transform_1, window_bounds = array<i64: 896, 1024>}, {pipeline_mode = #tpu.pipeline_mode<synchronous>, transform_indices = @transform_2, window_bounds = array<i64: 1, 1024>}, {pipeline_mode = #tpu.pipeline_mode<synchronous>, transform_indices = @transform_3, window_bounds = array<i64: 1024, 512>}, {pipeline_mode = #tpu.pipeline_mode<synchronous>, transform_indices = @transform_4, window_bounds = array<i64: 1, 512>}, {pipeline_mode = #tpu.pipeline_mode<synchronous>, transform_indices = @transform_5, window_bounds = array<i64: 512, 256>}, {pipeline_mode = #tpu.pipeline_mode<synchronous>, transform_indices = @transform_6, window_bounds = array<i64: 1, 256>}, {pipeline_mode = #tpu.pipeline_mode<synchronous>, transform_indices = @transform_7, window_bounds = array<i64: 256, 128>}, {pipeline_mode = #tpu.pipeline_mode<synchronous>, transform_indices = @transform_8, window_bounds = array<i64: 1, 128>}, {transform_indices = @transform_9, window_bounds = array<i64: 8, 128>}]} {
    %c0 = arith.constant 0 : index
    %c0_0 = arith.constant 0 : index
    %0 = vector.load %arg1[%c0, %c0_0] : memref<8x896xbf16, #tpu.memory_space<vmem>>, vector<8x896xbf16>
    %c0_1 = arith.constant 0 : index
    %c0_2 = arith.constant 0 : index
    %1 = vector.load %arg2[%c0_1, %c0_2] : memref<896x1024xbf16, #tpu.memory_space<vmem>>, vector<896x1024xbf16>
    %cst = arith.constant dense<0.000000e+00> : vector<8x1024xf32>
    %2 = tpu.matmul %0, %1, %cst {dimension_numbers = #tpu.dot_dimension_numbers<[1], [0], [0], [1], [0, 0, 1, 1], [], []>} : vector<8x896xbf16>, vector<896x1024xbf16>, vector<8x1024xf32> -> vector<8x1024xf32>
    %c0_3 = arith.constant 0 : index
    %c0_4 = arith.constant 0 : index
    %3 = vector.load %arg3[%c0_3, %c0_4] : memref<1x1024xf32, #tpu.memory_space<vmem>>, vector<1x1024xf32>
    %4 = vector.broadcast %3 : vector<1x1024xf32> to vector<8x1024xf32>
    %5 = arith.addf %2, %4 : vector<8x1024xf32>
    %6 = math.tanh %5 : vector<8x1024xf32>
    %7 = arith.truncf %6 : vector<8x1024xf32> to vector<8x1024xbf16>
    %c0_5 = arith.constant 0 : index
    %c0_6 = arith.constant 0 : index
    %8 = vector.load %arg4[%c0_5, %c0_6] : memref<1024x512xbf16, #tpu.memory_space<vmem>>, vector<1024x512xbf16>
    %cst_7 = arith.constant dense<0.000000e+00> : vector<8x512xf32>
    %9 = tpu.matmul %7, %8, %cst_7 {dimension_numbers = #tpu.dot_dimension_numbers<[1], [0], [0], [1], [0, 0, 1, 1], [], []>} : vector<8x1024xbf16>, vector<1024x512xbf16>, vector<8x512xf32> -> vector<8x512xf32>
    %c0_8 = arith.constant 0 : index
    %c0_9 = arith.constant 0 : index
    %10 = vector.load %arg5[%c0_8, %c0_9] : memref<1x512xf32, #tpu.memory_space<vmem>>, vector<1x512xf32>
    %11 = vector.broadcast %10 : vector<1x512xf32> to vector<8x512xf32>
    %12 = arith.addf %9, %11 : vector<8x512xf32>
    %cst_10 = arith.constant 0.000000e+00 : f32
    %13 = vector.broadcast %cst_10 : f32 to vector<8x512xf32>
    %14 = arith.maximumf %12, %13 : vector<8x512xf32>
    %15 = arith.truncf %14 : vector<8x512xf32> to vector<8x512xbf16>
    %c0_11 = arith.constant 0 : index
    %c0_12 = arith.constant 0 : index
    %16 = vector.load %arg6[%c0_11, %c0_12] : memref<512x256xbf16, #tpu.memory_space<vmem>>, vector<512x256xbf16>
    %cst_13 = arith.constant dense<0.000000e+00> : vector<8x256xf32>
    %17 = tpu.matmul %15, %16, %cst_13 {dimension_numbers = #tpu.dot_dimension_numbers<[1], [0], [0], [1], [0, 0, 1, 1], [], []>} : vector<8x512xbf16>, vector<512x256xbf16>, vector<8x256xf32> -> vector<8x256xf32>
    %c0_14 = arith.constant 0 : index
    %c0_15 = arith.constant 0 : index
    %18 = vector.load %arg7[%c0_14, %c0_15] : memref<1x256xf32, #tpu.memory_space<vmem>>, vector<1x256xf32>
    %19 = vector.broadcast %18 : vector<1x256xf32> to vector<8x256xf32>
    %20 = arith.addf %17, %19 : vector<8x256xf32>
    %21 = math.tanh %20 : vector<8x256xf32>
    %22 = arith.truncf %21 : vector<8x256xf32> to vector<8x256xbf16>
    %c0_16 = arith.constant 0 : index
    %c0_17 = arith.constant 0 : index
    %23 = vector.load %arg8[%c0_16, %c0_17] : memref<256x128xbf16, #tpu.memory_space<vmem>>, vector<256x128xbf16>
    %cst_18 = arith.constant dense<0.000000e+00> : vector<8x128xf32>
    %24 = tpu.matmul %22, %23, %cst_18 {dimension_numbers = #tpu.dot_dimension_numbers<[1], [0], [0], [1], [0, 0, 1, 1], [], []>} : vector<8x256xbf16>, vector<256x128xbf16>, vector<8x128xf32> -> vector<8x128xf32>
    %c0_19 = arith.constant 0 : index
    %c0_20 = arith.constant 0 : index
    %25 = vector.load %arg9[%c0_19, %c0_20] : memref<1x128xf32, #tpu.memory_space<vmem>>, vector<1x128xf32>
    %26 = vector.broadcast %25 : vector<1x128xf32> to vector<8x128xf32>
    %27 = arith.addf %24, %26 : vector<8x128xf32>
    %cst_21 = arith.constant 0.000000e+00 : f32
    %28 = vector.broadcast %cst_21 : f32 to vector<8x128xf32>
    %29 = arith.maximumf %27, %28 : vector<8x128xf32>
    %30 = tpu.iota {dimensions = array<i32: 1>} : vector<1x128xi32>
    %c10_i32 = arith.constant 10 : i32
    %31 = vector.broadcast %c10_i32 : i32 to vector<1x128xi32>
    %32 = arith.cmpi slt, %30, %31 : vector<1x128xi32>
    %cst_22 = arith.constant 0xFF800000 : f32
    %33 = vector.shape_cast %32 : vector<1x128xi1> to vector<1x128xi1>
    %34 = vector.broadcast %33 : vector<1x128xi1> to vector<8x128xi1>
    %35 = vector.broadcast %cst_22 : f32 to vector<8x128xf32>
    %36 = arith.select %34, %29, %35 : vector<8x128xi1>, vector<8x128xf32>
    %cst_23 = arith.constant dense<0xFF800000> : vector<8xf32>
    %37 = vector.multi_reduction <maximumf>, %36, %cst_23 [1] : vector<8x128xf32> to vector<8xf32>
    %38 = vector.shape_cast %37 : vector<8xf32> to vector<8x1xf32>
    %39 = vector.broadcast %38 : vector<8x1xf32> to vector<8x128xf32>
    %40 = arith.subf %36, %39 : vector<8x128xf32>
    %41 = math.exp %40 : vector<8x128xf32>
    %cst_24 = arith.constant dense<0.000000e+00> : vector<8xf32>
    %42 = vector.multi_reduction <add>, %41, %cst_24 [1] : vector<8x128xf32> to vector<8xf32>
    %43 = vector.shape_cast %42 : vector<8xf32> to vector<8x1xf32>
    %44 = tpu.reciprocal %43 {approx = true} : vector<8x1xf32> -> vector<8x1xf32>
    %45 = vector.broadcast %44 : vector<8x1xf32> to vector<8x128xf32>
    %46 = arith.mulf %41, %45 : vector<8x128xf32>
    %c0_25 = arith.constant 0 : index
    %c0_26 = arith.constant 0 : index
    %47 = vector.load %arg10[%c0_25, %c0_26] : memref<8x128xf32, #tpu.memory_space<vmem>>, vector<8x128xf32>
    tpu.vector_store %arg10[%c0_25, %c0_26], %46 {strides = array<i32>} : memref<8x128xf32, #tpu.memory_space<vmem>>, vector<8x128xf32>,
    return
  }
  func.func @transform_0(%arg0: i32) -> (i32, i32) {
    %c0_i32 = arith.constant 0 : i32
    %c0_i32_0 = arith.constant 0 : i32
    return %arg0, %c0_i32 : i32, i32
  }
  func.func @transform_1(%arg0: i32) -> (i32, i32) {
    %c0_i32 = arith.constant 0 : i32
    %c0_i32_0 = arith.constant 0 : i32
    %c0_i32_1 = arith.constant 0 : i32
    return %c0_i32, %c0_i32_0 : i32, i32
  }
  func.func @transform_2(%arg0: i32) -> (i32, i32) {
    %c0_i32 = arith.constant 0 : i32
    %c0_i32_0 = arith.constant 0 : i32
    %c0_i32_1 = arith.constant 0 : i32
    return %c0_i32, %c0_i32_0 : i32, i32
  }
  func.func @transform_3(%arg0: i32) -> (i32, i32) {
    %c0_i32 = arith.constant 0 : i32
    %c0_i32_0 = arith.constant 0 : i32
    %c0_i32_1 = arith.constant 0 : i32
    return %c0_i32, %c0_i32_0 : i32, i32
  }
  func.func @transform_4(%arg0: i32) -> (i32, i32) {
    %c0_i32 = arith.constant 0 : i32
    %c0_i32_0 = arith.constant 0 : i32
    %c0_i32_1 = arith.constant 0 : i32
    return %c0_i32, %c0_i32_0 : i32, i32
  }
  func.func @transform_5(%arg0: i32) -> (i32, i32) {
    %c0_i32 = arith.constant 0 : i32
    %c0_i32_0 = arith.constant 0 : i32
    %c0_i32_1 = arith.constant 0 : i32
    return %c0_i32, %c0_i32_0 : i32, i32
  }
  func.func @transform_6(%arg0: i32) -> (i32, i32) {
    %c0_i32 = arith.constant 0 : i32
    %c0_i32_0 = arith.constant 0 : i32
    %c0_i32_1 = arith.constant 0 : i32
    return %c0_i32, %c0_i32_0 : i32, i32
  }
  func.func @transform_7(%arg0: i32) -> (i32, i32) {
    %c0_i32 = arith.constant 0 : i32
    %c0_i32_0 = arith.constant 0 : i32
    %c0_i32_1 = arith.constant 0 : i32
    return %c0_i32, %c0_i32_0 : i32, i32
  }
  func.func @transform_8(%arg0: i32) -> (i32, i32) {
    %c0_i32 = arith.constant 0 : i32
    %c0_i32_0 = arith.constant 0 : i32
    %c0_i32_1 = arith.constant 0 : i32
    return %c0_i32, %c0_i32_0 : i32, i32
  }
  func.func @transform_9(%arg0: i32) -> (i32, i32) {
    %c0_i32 = arith.constant 0 : i32
    %c0_i32_0 = arith.constant 0 : i32
    return %arg0, %c0_i32 : i32, i32
  }
}

</mosaic_0001>

<bundles_post_ra>
// kernel: tpu_custom_call.1
= control target key start
LH: loop header
LB: loop body
LE: loop exit
PB: predicated region body
PF: predicated region fallthrough
CT: control target
= control target key end

     0   :  { %14 = vsyncpa [#allocation3], 0  ;;  %s10888_s0 = inlined_call_operand.hbm [shape: bf16[8,896], index: 0, kind: input, shape index: {}]   ;;  %s10889_s1 = inlined_call_operand.hbm [shape: bf16[896,1024], index: 1, kind: input, shape index: {}]   ;;  %s10890_s2 = inlined_call_operand.hbm [shape: f32[1,1024], index: 2, kind: input, shape index: {}]   ;;  %s10891_s3 = inlined_call_operand.hbm [shape: bf16[1024,512], index: 3, kind: input, shape index: {}]   ;;  %s10892_s4 = inlined_call_operand.hbm [shape: f32[1,512], index: 4, kind: input, shape index: {}]   ;;  %s10893_s5 = inlined_call_operand.hbm [shape: bf16[512,256], index: 5, kind: input, shape index: {}]   ;;  %s10894_s6 = inlined_call_operand.hbm [shape: f32[1,256], index: 6, kind: input, shape index: {}]   ;;  %s10895_s7 = inlined_call_operand.hbm [shape: bf16[256,128], index: 7, kind: input, shape index: {}]   ;;  %s10896_s8 = inlined_call_operand.hbm [shape: f32[1,128], index: 8, kind: input, shape index: {}]   ;;  %s10897_s9 = inlined_call_operand.hbm [shape: f32[8,128], index: 9, kind: output, shape index: {}]  }
   0x1   :  { %15 = vsyncpa [#allocation6], 0 }
   0x2   :  { %16 = vsyncpa [#allocation9], 0 }
   0x3   :  { %17 = vsyncpa [#allocation12], 0 }
   0x4   :  { %18 = vsyncpa [#allocation15], 0  ;;  %s35_s11 = sshll.u32 %s10889_s1, 4  ;;  %s36_s11 = int_to_ptr.hbm [resolvable:$true] %s35_s11 }
   0x5   :  { %19 = vsyncpa [#allocation4], 0  ;;  %s10524_s12 = smov [#allocation5]   ;;  %s59_s16 = sshll.u32 %s10891_s3, 4  ;;  %s60_s16 = int_to_ptr.hbm [resolvable:$true] %s59_s16 }
   0x6   :  { %s37_s13 = sshll.u32 %s10524_s12, 4  ;;  %s10525_s17 = smov 512   ;;  %s38_s13 = int_to_ptr.vmem [resolvable:$true] %s37_s13 }
   0x7   :  { %s10526_s18 = smov 32   ;;  %s10527_s19 = smov [#allocation8]  }
   0x8   :  { %43 = dma.hbm_to_vmem [thread:$0]  %s36_s11, 57344, %s38_s13, [#allocation6], %s10525_s17, %s10525_s17, %s10526_s18  }
   0x9   :  { %s61_s20 = sshll.u32 %s10527_s19, 4  ;;  %s10528_s21 = smov 256   ;;  %s62_s20 = int_to_ptr.vmem [resolvable:$true] %s61_s20 }
   0xa   :  { %s10529_s22 = smov 16   ;;  %s83_s24 = sshll.u32 %s10893_s5, 4  ;;  %s84_s24 = int_to_ptr.hbm [resolvable:$true] %s83_s24 }
   0xb   :  { %67 = dma.hbm_to_vmem [thread:$0]  %s60_s16, 32768, %s62_s20, [#allocation9], %s10528_s21, %s10528_s21, %s10529_s22  }
   0xc   :  { %s10530_s25 = smov [#allocation11]   ;;  %s107_s28 = sshll.u32 %s10895_s7, 4  ;;  %s108_s28 = int_to_ptr.hbm [resolvable:$true] %s107_s28 }
   0xd   :  { %s85_s26 = sshll.u32 %s10530_s25, 4  ;;  %s10531_s29 = smov 128   ;;  %s86_s26 = int_to_ptr.vmem [resolvable:$true] %s85_s26 }
   0xe   :  { %s10532_s30 = smov 8   ;;  %s10533_s10 = smov [#allocation14]  }
   0xf   :  { %91 = dma.hbm_to_vmem [thread:$0]  %s84_s24, 8192, %s86_s26, [#allocation12], %s10531_s29, %s10531_s29, %s10532_s30  }
  0x10   :  { %s109_s11 = sshll.u32 %s10533_s10, 4  ;;  %s10534_s12 = smov 64   ;;  %s110_s11 = int_to_ptr.vmem [resolvable:$true] %s109_s11 }
  0x11   :  { %s10535_s13 = smov 4   ;;  %s25_s15 = sshll.u32 %s10888_s0, 4  ;;  %s26_s15 = int_to_ptr.hbm [resolvable:$true] %s25_s15 }
  0x12   :  { %115 = dma.hbm_to_vmem [thread:$0]  %s108_s28, 2048, %s110_s11, [#allocation15], %s10534_s12, %s10534_s12, %s10535_s13  }
  0x13   :  { %s10536_s16 = smov [#allocation2]   ;;  %s49_s19 = sshll.u32 %s10890_s2, 4  ;;  %s50_s19 = int_to_ptr.hbm [resolvable:$true] %s49_s19 }
  0x14   :  { %s27_s17 = sshll.u32 %s10536_s16, 4  ;;  %s10537_s20 = smov [#allocation7]   ;;  %s28_s17 = int_to_ptr.vmem [resolvable:$true] %s27_s17 }
  0x15   :  { %30 = dma.hbm_to_vmem [thread:$0]  %s26_s15, 448, %s28_s17, [#allocation3]  }
  0x16   :  { %s51_s21 = sshll.u32 %s10537_s20, 4  ;;  %s73_s23 = sshll.u32 %s10892_s4, 4  ;;  %s52_s21 = int_to_ptr.vmem [resolvable:$true] %s51_s21  ;;  %s74_s23 = int_to_ptr.hbm [resolvable:$true] %s73_s23 }
  0x17   :  { %54 = dma.hbm_to_vmem [thread:$0]  %s50_s19, 128, %s52_s21, [#allocation6]  }
  0x18   :  { %s97_s25 = sshll.u32 %s10894_s6, 4  ;;  %s10538_s26 = smov [#allocation10]   ;;  %s98_s25 = int_to_ptr.hbm [resolvable:$true] %s97_s25 }
  0x19   :  { %s75_s27 = sshll.u32 %s10538_s26, 4  ;;  %s10539_s2 = smov [#allocation13]   ;;  %s76_s27 = int_to_ptr.vmem [resolvable:$true] %s75_s27 }
  0x1a   :  { %78 = dma.hbm_to_vmem [thread:$0]  %s74_s23, 64, %s76_s27, [#allocation9]  }
  0x1b   :  { %s99_s3 = sshll.u32 %s10539_s2, 4  ;;  %s121_s30 = sshll.u32 %s10896_s8, 4  ;;  %s100_s3 = int_to_ptr.vmem [resolvable:$true] %s99_s3  ;;  %s122_s30 = int_to_ptr.hbm [resolvable:$true] %s121_s30 }
  0x1c   :  { %102 = dma.hbm_to_vmem [thread:$0]  %s98_s25, 32, %s100_s3, [#allocation12]  }
  0x1d   :  { %s10540_s4 = smov [#allocation16]  }
  0x1e   :  { %s123_s10 = sshll.u32 %s10540_s4, 4  ;;  %s124_s10 = int_to_ptr.vmem [resolvable:$true] %s123_s10 }
  0x1f   :  { %126 = dma.hbm_to_vmem [thread:$0]  %s122_s30, 16, %s124_s10, [#allocation15]  }
  0x20   :  { %10512 = dma.done.wait [#allocation3], 448  }
  0x21   :  { %10513 = vsyncadd [#allocation3], 4294966848 }
  0x22   :  { %10514 = dma.done.wait [#allocation6], 57472  }
  0x23   :  { %10515 = vsyncadd [#allocation6], 4294909824 }
  0x24   :  { %10516 = dma.done.wait [#allocation9], 32832  }
  0x25   :  { %10517 = vsyncadd [#allocation9], 4294934464 }
  0x26   :  { %10518 = dma.done.wait [#allocation12], 8224  }
  0x27   :  { %10519 = vsyncadd [#allocation12], 4294959072 }
  0x28   :  { %10520 = dma.done.wait [#allocation15], 2064  }
  0x29   :  { %10521 = vsyncadd [#allocation15], 4294965232  ;;  %v6532_v0 = vld [vmem:[#allocation5 + $0x1c0] sm:$0xf]  ;;  %s10541_s6 = smov [#allocation17]   ;;  %s6292_s13 = sshll.u32 %s10897_s9, 4  ;;  %s6293_s13 = int_to_ptr.hbm [resolvable:$true] %s6292_s13 }
  0x2a   :  { %v9502_v1 = vld [vmem:[#allocation5 + $0x1dc] sm:$0xf0]  ;;  %s6290_s8 = sshll.u32 %s10541_s6, 4  ;;  %s6291_s8 = int_to_ptr.vmem [resolvable:$true] %s6290_s8 }
  0x2b   :  { %v6788_v2 = vld [vmem:[#allocation5 + $0x3c0] sm:$0xf]  ;;  %v6533_v3 = vor.u32 %v9502_v1, %v6532_v0 }
  0x2c   :  { %v9566_v4 = vld [vmem:[#allocation5 + $0x3dc] sm:$0xf0] }
  0x2d   :  { %v7044_v5 = vld [vmem:[#allocation5 + $0x5c0] sm:$0xf]  ;;  %v6789_v7 = vor.u32 %v9566_v4, %v6788_v2  ;;  %2898 = vmatpush.bf16.msra.mxu0 %v6533_v3 }
  0x2e   :  { %v9630_v6 = vld [vmem:[#allocation5 + $0x5dc] sm:$0xf0] }
  0x2f   :  { %v7045_v8 = vor.u32 %v9630_v6, %v7044_v5  ;;  %v7300_v9 = vld [vmem:[#allocation5 + $0x7c0] sm:$0xf]  ;;  %2911 = vmatpush.bf16.msra.mxu1 %v6789_v7 }
  0x30   :  { %v9694_v10 = vld [vmem:[#allocation5 + $0x7dc] sm:$0xf0] }
  0x31   :  { %v6500_v11 = vld [vmem:[#allocation5 + $0x180] sm:$0xf]  ;;  %v7301_v12 = vor.u32 %v9694_v10, %v7300_v9  ;;  %2924 = vmatpush.bf16.msra.mxu2 %v7045_v8 }
  0x32   :  { %v9494_v13 = vld [vmem:[#allocation5 + $0x19c] sm:$0xf0] }
  0x33   :  { %v6756_v14 = vld [vmem:[#allocation5 + $0x380] sm:$0xf]  ;;  %v6501_v16 = vor.u32 %v9494_v13, %v6500_v11  ;;  %2937 = vmatpush.bf16.msra.mxu3 %v7301_v12 }
  0x34   :  { %v9558_v15 = vld [vmem:[#allocation5 + $0x39c] sm:$0xf0] }
  0x35   :  { %v6757_v17 = vor.u32 %v9558_v15, %v6756_v14  ;;  %v7012_v18 = vld [vmem:[#allocation5 + $0x580] sm:$0xf]  ;;  %2899 = vmatpush.bf16.msra.mxu0 %v6501_v16 }
  0x36   :  { %v9622_v19 = vld [vmem:[#allocation5 + $0x59c] sm:$0xf0] }
  0x37   :  { %v7268_v20 = vld [vmem:[#allocation5 + $0x780] sm:$0xf]  ;;  %v7013_v21 = vor.u32 %v9622_v19, %v7012_v18  ;;  %2912 = vmatpush.bf16.msra.mxu1 %v6757_v17 }
  0x38   :  { %v9686_v22 = vld [vmem:[#allocation5 + $0x79c] sm:$0xf0] }
  0x39   :  { %v6468_v23 = vld [vmem:[#allocation5 + $0x140] sm:$0xf]  ;;  %v7269_v25 = vor.u32 %v9686_v22, %v7268_v20  ;;  %2925 = vmatpush.bf16.msra.mxu2 %v7013_v21 }
  0x3a   :  { %v9486_v24 = vld [vmem:[#allocation5 + $0x15c] sm:$0xf0] }
  0x3b   :  { %v6724_v26 = vld [vmem:[#allocation5 + $0x340] sm:$0xf]  ;;  %v6469_v29 = vor.u32 %v9486_v24, %v6468_v23  ;;  %2938 = vmatpush.bf16.msra.mxu3 %v7269_v25 }
  0x3c   :  { %v9550_v27 = vld [vmem:[#allocation5 + $0x35c] sm:$0xf0] }
  0x3d   :  { %v6980_v28 = vld [vmem:[#allocation5 + $0x540] sm:$0xf]  ;;  %v6725_v33 = vor.u32 %v9550_v27, %v6724_v26  ;;  %2900 = vmatpush.bf16.msra.mxu0 %v6469_v29 }
  0x3e   :  { %v9614_v30 = vld [vmem:[#allocation5 + $0x55c] sm:$0xf0] }
  0x3f   :  { %v7236_v31 = vld [vmem:[#allocation5 + $0x740] sm:$0xf]  ;;  %v6981_v34 = vor.u32 %v9614_v30, %v6980_v28  ;;  %2913 = vmatpush.bf16.msra.mxu1 %v6725_v33 }
  0x40   :  { %v9678_v32 = vld [vmem:[#allocation5 + $0x75c] sm:$0xf0] }
  0x41   :  { %v6436_v35 = vld [vmem:[#allocation5 + $0x100] sm:$0xf]  ;;  %v7237_v38 = vor.u32 %v9678_v32, %v7236_v31  ;;  %2926 = vmatpush.bf16.msra.mxu2 %v6981_v34 }
  0x42   :  { %v9478_v36 = vld [vmem:[#allocation5 + $0x11c] sm:$0xf0] }
  0x43   :  { %v6692_v37 = vld [vmem:[#allocation5 + $0x300] sm:$0xf]  ;;  %v6437_v44 = vor.u32 %v9478_v36, %v6436_v35  ;;  %2939 = vmatpush.bf16.msra.mxu3 %v7237_v38  ;;  %v6534_v38 = vld [vmem:[#allocation5 + $0x1e0] sm:$0xf0] }
  0x44   :  { %v9542_v39 = vld [vmem:[#allocation5 + $0x31c] sm:$0xf0] }
  0x45   :  { %v6948_v40 = vld [vmem:[#allocation5 + $0x500] sm:$0xf]  ;;  %v6693_v45 = vor.u32 %v9542_v39, %v6692_v37  ;;  %2901 = vmatpush.bf16.msra.mxu0 %v6437_v44  ;;  %v9498_v37 = vld [vmem:[#allocation5 + $0x1c4] sm:$0xf] }
  0x46   :  { %v9606_v41 = vld [vmem:[#allocation5 + $0x51c] sm:$0xf0] }
  0x47   :  { %v7204_v42 = vld [vmem:[#allocation5 + $0x700] sm:$0xf]  ;;  %v6949_v46 = vor.u32 %v9606_v41, %v6948_v40  ;;  %2914 = vmatpush.bf16.msra.mxu1 %v6693_v45 }
  0x48   :  { %v9670_v43 = vld [vmem:[#allocation5 + $0x71c] sm:$0xf0] }
  0x49   :  { %v6404_v47 = vld [vmem:[#allocation5 + $0xc0] sm:$0xf]  ;;  %v7205_v50 = vor.u32 %v9670_v43, %v7204_v42  ;;  %2927 = vmatpush.bf16.msra.mxu2 %v6949_v46  ;;  %v6537_v46 = vor.u32 %v9498_v37, %v6534_v38 }
  0x4a   :  { %v9470_v48 = vld [vmem:[#allocation5 + $0xdc] sm:$0xf0] }
  0x4b   :  { %v6660_v49 = vld [vmem:[#allocation5 + $0x2c0] sm:$0xf]  ;;  %v6405_v56 = vor.u32 %v9470_v48, %v6404_v47  ;;  %2940 = vmatpush.bf16.msra.mxu3 %v7205_v50  ;;  %v9490_v50 = vld [vmem:[#allocation5 + $0x184] sm:$0xf] }
  0x4c   :  { %v9534_v51 = vld [vmem:[#allocation5 + $0x2dc] sm:$0xf0] }
  0x4d   :  { %v6916_v52 = vld [vmem:[#allocation5 + $0x4c0] sm:$0xf]  ;;  %v6661_v57 = vor.u32 %v9534_v51, %v6660_v49  ;;  %2902 = vmatpush.bf16.msra.mxu0 %v6405_v56  ;;  %v6502_v51 = vld [vmem:[#allocation5 + $0x1a0] sm:$0xf0] }
  0x4e   :  { %v9598_v53 = vld [vmem:[#allocation5 + $0x4dc] sm:$0xf0] }
  0x4f   :  { %v7172_v54 = vld [vmem:[#allocation5 + $0x6c0] sm:$0xf]  ;;  %v6917_v58 = vor.u32 %v9598_v53, %v6916_v52  ;;  %2915 = vmatpush.bf16.msra.mxu1 %v6661_v57 }
  0x50   :  { %v9662_v55 = vld [vmem:[#allocation5 + $0x6dc] sm:$0xf0] }
  0x51   :  { %v6372_v59 = vld [vmem:[#allocation5 + $0x80] sm:$0xf]  ;;  %v7173_v62 = vor.u32 %v9662_v55, %v7172_v54  ;;  %2928 = vmatpush.bf16.msra.mxu2 %v6917_v58 }
  0x52   :  { %v9462_v60 = vld [vmem:[#allocation5 + $0x9c] sm:$0xf0] }
  0x53   :  { %v6628_v61 = vld [vmem:[#allocation5 + $0x280] sm:$0xf]  ;;  %v6373_v4 = vor.u32 %v9462_v60, %v6372_v59  ;;  %2941 = vmatpush.bf16.msra.mxu3 %v7173_v62  ;;  %v6505_v59 = vor.u32 %v9490_v50, %v6502_v51  ;;  %v9482_v62 = vld [vmem:[#allocation5 + $0x144] sm:$0xf] }
  0x54   :  { %v9526_v63 = vld [vmem:[#allocation5 + $0x29c] sm:$0xf0] }
  0x55   :  { %v6884_v0 = vld [vmem:[#allocation5 + $0x480] sm:$0xf]  ;;  %v6629_v5 = vor.u32 %v9526_v63, %v6628_v61  ;;  %2903 = vmatpush.bf16.msra.mxu0 %v6373_v4  ;;  %v6470_v63 = vld [vmem:[#allocation5 + $0x160] sm:$0xf0] }
  0x56   :  { %v9590_v1 = vld [vmem:[#allocation5 + $0x49c] sm:$0xf0] }
  0x57   :  { %v7140_v2 = vld [vmem:[#allocation5 + $0x680] sm:$0xf]  ;;  %v6885_v6 = vor.u32 %v9590_v1, %v6884_v0  ;;  %2916 = vmatpush.bf16.msra.mxu1 %v6629_v5 }
  0x58   :  { %v9654_v3 = vld [vmem:[#allocation5 + $0x69c] sm:$0xf0] }
  0x59   :  { %v6340_v7 = vld [vmem:[#allocation5 + $0x40] sm:$0xf]  ;;  %v7141_v10 = vor.u32 %v9654_v3, %v7140_v2  ;;  %2929 = vmatpush.bf16.msra.mxu2 %v6885_v6  ;;  %v164_v2 = vld [vmem:[#allocation2 + $0x8] sm:$0xff]  ;;  %v163_v3 = vld [vmem:[#allocation2] sm:$0xff] }
  0x5a   :  { %v9454_v8 = vld [vmem:[#allocation5 + $0x5c] sm:$0xf0] }
  0x5b   :  { %v6596_v9 = vld [vmem:[#allocation5 + $0x240] sm:$0xf]  ;;  %v6341_v16 = vor.u32 %v9454_v8, %v6340_v7  ;;  %2942 = vmatpush.bf16.msra.mxu3 %v7141_v10  ;;  %v639_v8 = vunpack.c.l.b16 %v164_v2  ;;  %v640_v10 = vunpack.c.h.b16 %v164_v2 }
  0x5c   :  { %v9518_v11 = vld [vmem:[#allocation5 + $0x25c] sm:$0xf0] }
  0x5d   :  { %v6852_v12 = vld [vmem:[#allocation5 + $0x440] sm:$0xf]  ;;  %v6597_v19 = vor.u32 %v9518_v11, %v6596_v9  ;;  %2904 = vmatpush.bf16.msra.mxu0 %v6341_v16  ;;  %v637_v9 = vunpack.c.l.b16 %v163_v3  ;;  %v6473_v11 = vor.u32 %v9482_v62, %v6470_v63  ;;  %v9474_v16 = vld [vmem:[#allocation5 + $0x104] sm:$0xf] }
  0x5e   :  { %v9582_v13 = vld [vmem:[#allocation5 + $0x45c] sm:$0xf0] }
  0x5f   :  { %v7108_v14 = vld [vmem:[#allocation5 + $0x640] sm:$0xf]  ;;  %v6853_v20 = vor.u32 %v9582_v13, %v6852_v12  ;;  %2917 = vmatpush.bf16.msra.mxu1 %v6597_v19  ;;  %v10621_v19 = vpack.c.b16 %v637_v9, %v637_v9  ;;  %v6790_v9 = vld [vmem:[#allocation5 + $0x3e0] sm:$0xf0] }
  0x60   :  { %v9646_v15 = vld [vmem:[#allocation5 + $0x65c] sm:$0xf0] }
  0x61   :  { %v6308_v17 = vld [vmem:[#allocation5] sm:$0xf]  ;;  %v7109_v24 = vor.u32 %v9646_v15, %v7108_v14  ;;  %2930 = vmatpush.bf16.msra.mxu2 %v6853_v20  ;;  %v638_v15 = vunpack.c.h.b16 %v163_v3  ;;  %v10623_v20 = vpack.c.b16 %v640_v10, %v640_v10  ;;  %v166_v3 = vld [vmem:[#allocation2 + $0x18] sm:$0xf]  ;;  %v9626_v10 = vld [vmem:[#allocation5 + $0x5c4] sm:$0xf] }
  0x62   :  { %v9446_v18 = vld [vmem:[#allocation5 + $0x1c] sm:$0xf0] }
  0x63   :  { %v6564_v21 = vld [vmem:[#allocation5 + $0x200] sm:$0xf]  ;;  %v6309_v31 = vor.u32 %v9446_v18, %v6308_v17  ;;  %2943 = vmatpush.bf16.msra.mxu3 %v7109_v24  ;;  %v6438_v17 = vld [vmem:[#allocation5 + $0x120] sm:$0xf0]  ;;  %v10619_v18 = vpack.c.b16 %v639_v8, %v639_v8 }
  0x64   :  { %v9510_v22 = vld [vmem:[#allocation5 + $0x21c] sm:$0xf0]  ;;  %v9562_v8 = vld [vmem:[#allocation5 + $0x3c4] sm:$0xf] }
  0x65   :  { %v6820_v23 = vld [vmem:[#allocation5 + $0x400] sm:$0xf]  ;;  %v6565_v35 = vor.u32 %v9510_v22, %v6564_v21  ;;  %2905 = vmatpush.bf16.msra.mxu0 %v6309_v31  ;;  %v10625_v22 = vpack.c.b16 %v638_v15, %v638_v15  ;;  %v643_v15 = vunpack.c.l.b16 %v166_v3 }
  0x66   :  { %v9574_v25 = vld [vmem:[#allocation5 + $0x41c] sm:$0xf0] }
  0x67   :  { %v7076_v26 = vld [vmem:[#allocation5 + $0x600] sm:$0xf]  ;;  %v6821_v36 = vor.u32 %v9574_v25, %v6820_v23  ;;  %2918 = vmatpush.bf16.msra.mxu1 %v6565_v35 }
  0x68   :  { %v9638_v27 = vld [vmem:[#allocation5 + $0x61c] sm:$0xf0]  ;;  %2906 = vmatmul.bf16.vlgmr.msra.gmra.mxu0 %v10621_v19 }
  0x69   :  { %v7556_v28 = vld [vmem:[#allocation5 + $0x9c0] sm:$0xf]  ;;  %v7077_v39 = vor.u32 %v9638_v27, %v7076_v26  ;;  %2931 = vmatpush.bf16.msra.mxu2 %v6821_v36 }
  0x6a   :  { %v9758_v29 = vld [vmem:[#allocation5 + $0x9dc] sm:$0xf0]  ;;  %2919 = vmatmul.bf16.vlgmr.msra.gmra.mxu1 %v10625_v22 }
  0x6b   :  { %v7812_v30 = vld [vmem:[#allocation5 + $0xbc0] sm:$0xf]  ;;  %v7557_v40 = vor.u32 %v9758_v29, %v7556_v28  ;;  %2944 = vmatpush.bf16.msra.mxu3 %v7077_v39  ;;  %v6441_v28 = vor.u32 %v9474_v16, %v6438_v17 }
  0x6c   :  { %v9822_v32 = vld [vmem:[#allocation5 + $0xbdc] sm:$0xf0]  ;;  %2932 = vmatmul.bf16.vlgmr.msra.gmra.mxu2 %v10619_v18 }
  0x6d   :  { %v8068_v33 = vld [vmem:[#allocation5 + $0xdc0] sm:$0xf]  ;;  %v7813_v41 = vor.u32 %v9822_v32, %v7812_v30  ;;  %2950 = vmatpush.bf16.msrb.mxu0 %v7557_v40  ;;  %v9466_v32 = vld [vmem:[#allocation5 + $0xc4] sm:$0xf] }
  0x6e   :  { %v9886_v34 = vld [vmem:[#allocation5 + $0xddc] sm:$0xf0]  ;;  %2945 = vmatmul.bf16.vlgmr.msra.gmra.mxu3 %v10623_v20 }
  0x6f   :  { %v8069_v42 = vor.u32 %v9886_v34, %v8068_v33  ;;  %v7524_v43 = vld [vmem:[#allocation5 + $0x980] sm:$0xf]  ;;  %2963 = vmatpush.bf16.msrb.mxu1 %v7813_v41  ;;  %2989 = vmatpush.bf16.msrb.mxu3 %v6537_v46  ;;  %v6406_v33 = vld [vmem:[#allocation5 + $0xe0] sm:$0xf0] }
  0x70   :  { %v9750_v44 = vld [vmem:[#allocation5 + $0x99c] sm:$0xf0]  ;;  %v6409_v40 = vor.u32 %v9466_v32, %v6406_v33  ;;  %v9618_v32 = vld [vmem:[#allocation5 + $0x584] sm:$0xf] }
  0x71   :  { %v7780_v45 = vld [vmem:[#allocation5 + $0xb80] sm:$0xf]  ;;  %v7525_v52 = vor.u32 %v9750_v44, %v7524_v43  ;;  %2976 = vmatpush.bf16.msrb.mxu2 %v8069_v42  ;;  %v9458_v44 = vld [vmem:[#allocation5 + $0x84] sm:$0xf] }
  0x72   :  { %v9814_v47 = vld [vmem:[#allocation5 + $0xb9c] sm:$0xf0] }
  0x73   :  { %v8036_v48 = vld [vmem:[#allocation5 + $0xd80] sm:$0xf]  ;;  %v7781_v54 = vor.u32 %v9814_v47, %v7780_v45  ;;  %2951 = vmatpush.bf16.msrb.mxu0 %v7525_v52  ;;  %2990 = vmatpush.bf16.msrb.mxu3 %v6505_v59  ;;  %v6374_v45 = vld [vmem:[#allocation5 + $0xa0] sm:$0xf0] }
  0x74   :  { %v9878_v49 = vld [vmem:[#allocation5 + $0xd9c] sm:$0xf0]  ;;  %v6377_v52 = vor.u32 %v9458_v44, %v6374_v45  ;;  %v9546_v45 = vld [vmem:[#allocation5 + $0x344] sm:$0xf] }
  0x75   :  { %v7492_v53 = vld [vmem:[#allocation5 + $0x940] sm:$0xf]  ;;  %v8037_v55 = vor.u32 %v9878_v49, %v8036_v48  ;;  %2964 = vmatpush.bf16.msrb.mxu1 %v7781_v54 }
  0x76   :  { %v9742_v56 = vld [vmem:[#allocation5 + $0x95c] sm:$0xf0] }
  0x77   :  { %v7748_v57 = vld [vmem:[#allocation5 + $0xb40] sm:$0xf]  ;;  %v7493_v0 = vor.u32 %v9742_v56, %v7492_v53  ;;  %2977 = vmatpush.bf16.msrb.mxu2 %v8037_v55  ;;  %2991 = vmatpush.bf16.msrb.mxu3 %v6473_v11  ;;  %v9450_v56 = vld [vmem:[#allocation5 + $0x44] sm:$0xf] }
  0x78   :  { %v9806_v58 = vld [vmem:[#allocation5 + $0xb5c] sm:$0xf0] }
  0x79   :  { %v8004_v60 = vld [vmem:[#allocation5 + $0xd40] sm:$0xf]  ;;  %v7749_v1 = vor.u32 %v9806_v58, %v7748_v57  ;;  %2952 = vmatpush.bf16.msrb.mxu0 %v7493_v0  ;;  %v6342_v57 = vld [vmem:[#allocation5 + $0x60] sm:$0xf0] }
  0x7a   :  { %v9870_v61 = vld [vmem:[#allocation5 + $0xd5c] sm:$0xf0] }
  0x7b   :  { %v8005_v4 = vor.u32 %v9870_v61, %v8004_v60  ;;  %v7460_v5 = vld [vmem:[#allocation5 + $0x900] sm:$0xf]  ;;  %2965 = vmatpush.bf16.msrb.mxu1 %v7749_v1  ;;  %2992 = vmatpush.bf16.msrb.mxu3 %v6441_v28 }
  0x7c   :  { %v9734_v6 = vld [vmem:[#allocation5 + $0x91c] sm:$0xf0] }
  0x7d   :  { %v7716_v7 = vld [vmem:[#allocation5 + $0xb00] sm:$0xf]  ;;  %v7461_v21 = vor.u32 %v9734_v6, %v7460_v5  ;;  %2978 = vmatpush.bf16.msrb.mxu2 %v8005_v4  ;;  %v6345_v4 = vor.u32 %v9450_v56, %v6342_v57  ;;  %v9442_v5 = vld [vmem:[#allocation5 + $0x4] sm:$0xf] }
  0x7e   :  { %v9798_v12 = vld [vmem:[#allocation5 + $0xb1c] sm:$0xf0]  ;;  %v6310_v6 = vld [vmem:[#allocation5 + $0x20] sm:$0xf0] }
  0x7f   :  { %v7972_v13 = vld [vmem:[#allocation5 + $0xd00] sm:$0xf]  ;;  %v7717_v23 = vor.u32 %v9798_v12, %v7716_v7  ;;  %2953 = vmatpush.bf16.msrb.mxu0 %v7461_v21  ;;  %2993 = vmatpush.bf16.msrb.mxu3 %v6409_v40  ;;  %v165_v7 = vld [vmem:[#allocation2 + $0x10] sm:$0xff]  ;;  %v7046_v12 = vld [vmem:[#allocation5 + $0x5e0] sm:$0xf0] }
  0x80   :  { %v9862_v14 = vld [vmem:[#allocation5 + $0xd1c] sm:$0xf0]  ;;  %v9754_v21 = vld [vmem:[#allocation5 + $0x9c4] sm:$0xf]  ;;  %v7049_v28 = vor.u32 %v9626_v10, %v7046_v12 }
  0x81   :  { %v7973_v24 = vor.u32 %v9862_v14, %v7972_v13  ;;  %v7428_v25 = vld [vmem:[#allocation5 + $0x8c0] sm:$0xf]  ;;  %2966 = vmatpush.bf16.msrb.mxu1 %v7717_v23  ;;  %v9690_v13 = vld [vmem:[#allocation5 + $0x7c4] sm:$0xf] }
  0x82   :  { %v9726_v26 = vld [vmem:[#allocation5 + $0x8dc] sm:$0xf0]  ;;  %v7302_v14 = vld [vmem:[#allocation5 + $0x7e0] sm:$0xf0] }
  0x83   :  { %v7684_v27 = vld [vmem:[#allocation5 + $0xac0] sm:$0xf]  ;;  %v7429_v34 = vor.u32 %v9726_v26, %v7428_v25  ;;  %2979 = vmatpush.bf16.msrb.mxu2 %v7973_v24  ;;  %2994 = vmatpush.bf16.msrb.mxu3 %v6377_v52  ;;  %v7558_v23 = vld [vmem:[#allocation5 + $0x9e0] sm:$0xf0]  ;;  %v641_v24 = vunpack.c.l.b16 %v165_v7  ;;  %v642_v25 = vunpack.c.h.b16 %v165_v7  ;;  %v6313_v26 = vor.u32 %v9442_v5, %v6310_v6 }
  0x84   :  { %v9790_v29 = vld [vmem:[#allocation5 + $0xadc] sm:$0xf0]  ;;  %v7561_v33 = vor.u32 %v9754_v21, %v7558_v23  ;;  %v9738_v52 = vld [vmem:[#allocation5 + $0x944] sm:$0xf] }
  0x85   :  { %v7940_v30 = vld [vmem:[#allocation5 + $0xcc0] sm:$0xf]  ;;  %v7685_v35 = vor.u32 %v9790_v29, %v7684_v27  ;;  %2954 = vmatpush.bf16.msrb.mxu0 %v7429_v34  ;;  %v6793_v27 = vor.u32 %v9562_v8, %v6790_v9  ;;  %v7305_v29 = vor.u32 %v9690_v13, %v7302_v14  ;;  %v7014_v34 = vld [vmem:[#allocation5 + $0x5a0] sm:$0xf0]  ;;  %v10633_v40 = vpack.c.b16 %v641_v24, %v641_v24 }
  0x86   :  { %v9854_v31 = vld [vmem:[#allocation5 + $0xcdc] sm:$0xf0]  ;;  %v9538_v57 = vld [vmem:[#allocation5 + $0x304] sm:$0xf] }
  0x87   :  { %v7941_v36 = vor.u32 %v9854_v31, %v7940_v30  ;;  %v7396_v37 = vld [vmem:[#allocation5 + $0x880] sm:$0xf]  ;;  %2967 = vmatpush.bf16.msrb.mxu1 %v7685_v35  ;;  %2995 = vmatpush.bf16.msrb.mxu3 %v6345_v4  ;;  %v9554_v30 = vld [vmem:[#allocation5 + $0x384] sm:$0xf] }
  0x88   :  { %v9718_v38 = vld [vmem:[#allocation5 + $0x89c] sm:$0xf0]  ;;  %v6758_v31 = vld [vmem:[#allocation5 + $0x3a0] sm:$0xf0] }
  0x89   :  { %v7652_v39 = vld [vmem:[#allocation5 + $0xa80] sm:$0xf]  ;;  %v7397_v46 = vor.u32 %v9718_v38, %v7396_v37  ;;  %2980 = vmatpush.bf16.msrb.mxu2 %v7941_v36  ;;  %v9682_v35 = vld [vmem:[#allocation5 + $0x784] sm:$0xf]  ;;  %v10631_v37 = vpack.c.b16 %v643_v15, %v643_v15 }
  0x8a   :  { %v9782_v41 = vld [vmem:[#allocation5 + $0xa9c] sm:$0xf0]  ;;  %v7270_v36 = vld [vmem:[#allocation5 + $0x7a0] sm:$0xf0] }
  0x8b   :  { %v7908_v42 = vld [vmem:[#allocation5 + $0xc80] sm:$0xf]  ;;  %v7653_v47 = vor.u32 %v9782_v41, %v7652_v39  ;;  %2955 = vmatpush.bf16.msrb.mxu0 %v7397_v46  ;;  %v9746_v38 = vld [vmem:[#allocation5 + $0x984] sm:$0xf]  ;;  %v10635_v41 = vpack.c.b16 %v642_v25, %v642_v25  ;;  %2996 = vmatpush.bf16.msrb.mxu3 %v6313_v26  ;;  %v7273_v44 = vor.u32 %v9682_v35, %v7270_v36 }
  0x8c   :  { %v9846_v43 = vld [vmem:[#allocation5 + $0xc9c] sm:$0xf0]  ;;  %v7526_v39 = vld [vmem:[#allocation5 + $0x9a0] sm:$0xf0] }
  0x8d   :  { %v7909_v48 = vor.u32 %v9846_v43, %v7908_v42  ;;  %v7364_v49 = vld [vmem:[#allocation5 + $0x840] sm:$0xf]  ;;  %2968 = vmatpush.bf16.msrb.mxu1 %v7653_v47  ;;  %v6761_v42 = vor.u32 %v9554_v30, %v6758_v31  ;;  %v7017_v43 = vor.u32 %v9618_v32, %v7014_v34  ;;  %v6726_v46 = vld [vmem:[#allocation5 + $0x360] sm:$0xf0] }
  0x8e   :  { %v9710_v50 = vld [vmem:[#allocation5 + $0x85c] sm:$0xf0]  ;;  %v9610_v47 = vld [vmem:[#allocation5 + $0x544] sm:$0xf]  ;;  %2997 = vmatmul.bf16.vlgmr.msrb.gmra.mxu3 %v10621_v19 }
  0x8f   :  { %v7620_v51 = vld [vmem:[#allocation5 + $0xa40] sm:$0xf]  ;;  %v7365_v59 = vor.u32 %v9710_v50, %v7364_v49  ;;  %2981 = vmatpush.bf16.msrb.mxu2 %v7909_v48  ;;  %3041 = vmatpush.bf16.msra.mxu3 %v7561_v33  ;;  %v7529_v48 = vor.u32 %v9746_v38, %v7526_v39  ;;  %v6982_v49 = vld [vmem:[#allocation5 + $0x560] sm:$0xf0] }
  0x90   :  { %v9774_v53 = vld [vmem:[#allocation5 + $0xa5c] sm:$0xf0]  ;;  %v9674_v50 = vld [vmem:[#allocation5 + $0x744] sm:$0xf] }
  0x91   :  { %v7876_v54 = vld [vmem:[#allocation5 + $0xc40] sm:$0xf]  ;;  %v7621_v63 = vor.u32 %v9774_v53, %v7620_v51  ;;  %2956 = vmatpush.bf16.msrb.mxu0 %v7365_v59  ;;  %v7238_v51 = vld [vmem:[#allocation5 + $0x760] sm:$0xf0] }
  0x92   :  { %v9838_v55 = vld [vmem:[#allocation5 + $0xc5c] sm:$0xf0]  ;;  %v7494_v53 = vld [vmem:[#allocation5 + $0x960] sm:$0xf0]  ;;  %v7241_v56 = vor.u32 %v9674_v50, %v7238_v51 }
  0x93   :  { %v7332_v58 = vld [vmem:[#allocation5 + $0x800] sm:$0xf]  ;;  %v7877_v0 = vor.u32 %v9838_v55, %v7876_v54  ;;  %2969 = vmatpush.bf16.msrb.mxu1 %v7621_v63  ;;  %v6729_v54 = vor.u32 %v9546_v45, %v6726_v46  ;;  %v6985_v55 = vor.u32 %v9610_v47, %v6982_v49  ;;  %v9602_v59 = vld [vmem:[#allocation5 + $0x504] sm:$0xf]  ;;  %3042 = vmatpush.bf16.msra.mxu3 %v7529_v48 }
  0x94   :  { %v9702_v60 = vld [vmem:[#allocation5 + $0x81c] sm:$0xf0]  ;;  %v7206_v63 = vld [vmem:[#allocation5 + $0x720] sm:$0xf0] }
  0x95   :  { %v7588_v61 = vld [vmem:[#allocation5 + $0xa00] sm:$0xf]  ;;  %v7333_v11 = vor.u32 %v9702_v60, %v7332_v58  ;;  %2982 = vmatpush.bf16.msrb.mxu2 %v7877_v0  ;;  %v6694_v58 = vld [vmem:[#allocation5 + $0x320] sm:$0xf0]  ;;  %v7497_v60 = vor.u32 %v9738_v52, %v7494_v53 }
  0x96   :  { %v9766_v62 = vld [vmem:[#allocation5 + $0xa1c] sm:$0xf0]  ;;  %v9730_v0 = vld [vmem:[#allocation5 + $0x904] sm:$0xf] }
  0x97   :  { %v7844_v1 = vld [vmem:[#allocation5 + $0xc00] sm:$0xf]  ;;  %v7589_v16 = vor.u32 %v9766_v62, %v7588_v61  ;;  %2957 = vmatpush.bf16.msrb.mxu0 %v7333_v11  ;;  %v6950_v61 = vld [vmem:[#allocation5 + $0x520] sm:$0xf0]  ;;  %3043 = vmatpush.bf16.msra.mxu3 %v7497_v60 }
  0x98   :  { %v9830_v2 = vld [vmem:[#allocation5 + $0xc1c] sm:$0xf0]  ;;  %v9666_v62 = vld [vmem:[#allocation5 + $0x704] sm:$0xf]  ;;  %v6953_v3 = vor.u32 %v9602_v59, %v6950_v61 }
  0x99   :  { %v7845_v17 = vor.u32 %v9830_v2, %v7844_v1  ;;  %2970 = vmatpush.bf16.msrb.mxu1 %v7589_v16  ;;  %v7462_v1 = vld [vmem:[#allocation5 + $0x920] sm:$0xf0]  ;;  %v6697_v2 = vor.u32 %v9538_v57, %v6694_v58  ;;  %v7209_v4 = vor.u32 %v9666_v62, %v7206_v63  ;;  %v6540_v62 = vld [vmem:[#allocation5 + $0x1c8] sm:$0xf] }
  0x9a   :  { %2958 = vmatmul.bf16.vlgmr.msrb.gmra.mxu0 %v10633_v40  ;;  %v9530_v5 = vld [vmem:[#allocation5 + $0x2c4] sm:$0xf]  ;;  %v7465_v8 = vor.u32 %v9730_v0, %v7462_v1  ;;  %v9503_v63 = vld [vmem:[#allocation5 + $0x1e4] sm:$0xf0] }
  0x9b   :  { %2983 = vmatpush.bf16.msrb.mxu2 %v7845_v17  ;;  %3002 = vmatpush.bf16.msra.mxu0 %v6793_v27  ;;  %v6662_v6 = vld [vmem:[#allocation5 + $0x2e0] sm:$0xf0] }
  0x9c   :  { %2971 = vmatmul.bf16.vlgmr.msrb.gmra.mxu1 %v10635_v41  ;;  %v9594_v7 = vld [vmem:[#allocation5 + $0x4c4] sm:$0xf]  ;;  %v6665_v14 = vor.u32 %v9530_v5, %v6662_v6  ;;  %3044 = vmatpush.bf16.msra.mxu3 %v7465_v8 }
  0x9d   :  { %3015 = vmatpush.bf16.msra.mxu1 %v7049_v28  ;;  %v6918_v9 = vld [vmem:[#allocation5 + $0x4e0] sm:$0xf0] }
  0x9e   :  { %2984 = vmatmul.bf16.vlgmr.msrb.gmra.mxu2 %v10631_v37  ;;  %v9658_v10 = vld [vmem:[#allocation5 + $0x6c4] sm:$0xf]  ;;  %v6921_v15 = vor.u32 %v9594_v7, %v6918_v9  ;;  %v6541_v7 = vor.u32 %v9503_v63, %v6540_v62 }
  0x9f   :  { %3028 = vmatpush.bf16.msra.mxu2 %v7305_v29  ;;  %3003 = vmatpush.bf16.msra.mxu0 %v6761_v42  ;;  %v7174_v11 = vld [vmem:[#allocation5 + $0x6e0] sm:$0xf0] }
  0xa0   :  { %v9722_v12 = vld [vmem:[#allocation5 + $0x8c4] sm:$0xf]  ;;  %v7177_v16 = vor.u32 %v9658_v10, %v7174_v11 }
  0xa1   :  { %3016 = vmatpush.bf16.msra.mxu1 %v7017_v43  ;;  %v7430_v13 = vld [vmem:[#allocation5 + $0x8e0] sm:$0xf0] }
  0xa2   :  { %v9522_v17 = vld [vmem:[#allocation5 + $0x284] sm:$0xf]  ;;  %v7433_v24 = vor.u32 %v9722_v12, %v7430_v13  ;;  %v6508_v13 = vld [vmem:[#allocation5 + $0x188] sm:$0xf] }
  0xa3   :  { %3029 = vmatpush.bf16.msra.mxu2 %v7273_v44  ;;  %3004 = vmatpush.bf16.msra.mxu0 %v6729_v54  ;;  %v6630_v21 = vld [vmem:[#allocation5 + $0x2a0] sm:$0xf0] }
  0xa4   :  { %v9586_v23 = vld [vmem:[#allocation5 + $0x484] sm:$0xf]  ;;  %v6633_v30 = vor.u32 %v9522_v17, %v6630_v21  ;;  %3045 = vmatpush.bf16.msra.mxu3 %v7433_v24 }
  0xa5   :  { %3017 = vmatpush.bf16.msra.mxu1 %v6985_v55  ;;  %v6886_v25 = vld [vmem:[#allocation5 + $0x4a0] sm:$0xf0] }
  0xa6   :  { %v9650_v26 = vld [vmem:[#allocation5 + $0x684] sm:$0xf]  ;;  %v6889_v31 = vor.u32 %v9586_v23, %v6886_v25 }
  0xa7   :  { %3030 = vmatpush.bf16.msra.mxu2 %v7241_v56  ;;  %3005 = vmatpush.bf16.msra.mxu0 %v6697_v2  ;;  %v7142_v27 = vld [vmem:[#allocation5 + $0x6a0] sm:$0xf0]  ;;  %v6796_v2 = vld [vmem:[#allocation5 + $0x3c8] sm:$0xf] }
  0xa8   :  { %v9714_v28 = vld [vmem:[#allocation5 + $0x884] sm:$0xf]  ;;  %v7145_v32 = vor.u32 %v9650_v26, %v7142_v27 }
  0xa9   :  { %3018 = vmatpush.bf16.msra.mxu1 %v6953_v3  ;;  %v7398_v29 = vld [vmem:[#allocation5 + $0x8a0] sm:$0xf0]  ;;  %v9567_v3 = vld [vmem:[#allocation5 + $0x3e4] sm:$0xf0] }
  0xaa   :  { %v9514_v33 = vld [vmem:[#allocation5 + $0x244] sm:$0xf]  ;;  %v7401_v36 = vor.u32 %v9714_v28, %v7398_v29  ;;  %v6797_v11 = vor.u32 %v9567_v3, %v6796_v2  ;;  %v6476_v29 = vld [vmem:[#allocation5 + $0x148] sm:$0xf] }
  0xab   :  { %3031 = vmatpush.bf16.msra.mxu2 %v7209_v4  ;;  %3006 = vmatpush.bf16.msra.mxu0 %v6665_v14  ;;  %v6598_v34 = vld [vmem:[#allocation5 + $0x260] sm:$0xf0]  ;;  %v9495_v14 = vld [vmem:[#allocation5 + $0x1a4] sm:$0xf0] }
  0xac   :  { %v9578_v35 = vld [vmem:[#allocation5 + $0x444] sm:$0xf]  ;;  %v6601_v45 = vor.u32 %v9514_v33, %v6598_v34  ;;  %3046 = vmatpush.bf16.msra.mxu3 %v7401_v36  ;;  %v6509_v23 = vor.u32 %v9495_v14, %v6508_v13 }
  0xad   :  { %3019 = vmatpush.bf16.msra.mxu1 %v6921_v15  ;;  %v6854_v38 = vld [vmem:[#allocation5 + $0x460] sm:$0xf0]  ;;  %v6764_v15 = vld [vmem:[#allocation5 + $0x388] sm:$0xf] }
  0xae   :  { %v9642_v39 = vld [vmem:[#allocation5 + $0x644] sm:$0xf]  ;;  %v6857_v48 = vor.u32 %v9578_v35, %v6854_v38 }
  0xaf   :  { %3032 = vmatpush.bf16.msra.mxu2 %v7177_v16  ;;  %v7110_v42 = vld [vmem:[#allocation5 + $0x660] sm:$0xf0]  ;;  %3007 = vmatpush.bf16.msra.mxu0 %v6633_v30  ;;  %v9559_v16 = vld [vmem:[#allocation5 + $0x3a4] sm:$0xf0] }
  0xb0   :  { %v9706_v43 = vld [vmem:[#allocation5 + $0x844] sm:$0xf]  ;;  %v7113_v49 = vor.u32 %v9642_v39, %v7110_v42  ;;  %v6765_v27 = vor.u32 %v9559_v16, %v6764_v15  ;;  %v9487_v30 = vld [vmem:[#allocation5 + $0x164] sm:$0xf0] }
  0xb1   :  { %v7366_v44 = vld [vmem:[#allocation5 + $0x860] sm:$0xf0]  ;;  %3020 = vmatpush.bf16.msra.mxu1 %v6889_v31  ;;  %v6732_v31 = vld [vmem:[#allocation5 + $0x348] sm:$0xf]  ;;  %v6477_v35 = vor.u32 %v9487_v30, %v6476_v29 }
  0xb2   :  { %v9506_v46 = vld [vmem:[#allocation5 + $0x204] sm:$0xf]  ;;  %v7369_v53 = vor.u32 %v9706_v43, %v7366_v44  ;;  %v6444_v44 = vld [vmem:[#allocation5 + $0x108] sm:$0xf] }
  0xb3   :  { %v6566_v47 = vld [vmem:[#allocation5 + $0x220] sm:$0xf0]  ;;  %3033 = vmatpush.bf16.msra.mxu2 %v7145_v32  ;;  %3008 = vmatpush.bf16.msra.mxu0 %v6601_v45  ;;  %v9551_v32 = vld [vmem:[#allocation5 + $0x364] sm:$0xf0] }
  0xb4   :  { %v9570_v50 = vld [vmem:[#allocation5 + $0x404] sm:$0xf]  ;;  %v6569_v60 = vor.u32 %v9506_v46, %v6566_v47  ;;  %3047 = vmatpush.bf16.msra.mxu3 %v7369_v53  ;;  %v6733_v42 = vor.u32 %v9551_v32, %v6732_v31  ;;  %v9479_v45 = vld [vmem:[#allocation5 + $0x124] sm:$0xf0] }
  0xb5   :  { %v6822_v51 = vld [vmem:[#allocation5 + $0x420] sm:$0xf0]  ;;  %3021 = vmatpush.bf16.msra.mxu1 %v6857_v48  ;;  %v6700_v46 = vld [vmem:[#allocation5 + $0x308] sm:$0xf] }
  0xb6   :  { %v9634_v52 = vld [vmem:[#allocation5 + $0x604] sm:$0xf]  ;;  %v6825_v0 = vor.u32 %v9570_v50, %v6822_v51  ;;  %v9543_v47 = vld [vmem:[#allocation5 + $0x324] sm:$0xf0]  ;;  %v6445_v50 = vor.u32 %v9479_v45, %v6444_v44 }
  0xb7   :  { %v7078_v54 = vld [vmem:[#allocation5 + $0x620] sm:$0xf0]  ;;  %3034 = vmatpush.bf16.msra.mxu2 %v7113_v49  ;;  %3009 = vmatpush.bf16.msra.mxu0 %v6569_v60  ;;  %v6348_v16 = vld [vmem:[#allocation5 + $0x48] sm:$0xf] }
  0xb8   :  { %v9698_v55 = vld [vmem:[#allocation5 + $0x804] sm:$0xf]  ;;  %v7081_v1 = vor.u32 %v9634_v52, %v7078_v54  ;;  %v6701_v54 = vor.u32 %v9543_v47, %v6700_v46  ;;  %v6316_v31 = vld [vmem:[#allocation5 + $0x8] sm:$0xf] }
  0xb9   :  { %v7334_v56 = vld [vmem:[#allocation5 + $0x820] sm:$0xf0]  ;;  %3022 = vmatpush.bf16.msra.mxu1 %v6825_v0  ;;  %v7564_v44 = vld [vmem:[#allocation5 + $0x9c8] sm:$0xf] }
  0xba   :  { %v9818_v57 = vld [vmem:[#allocation5 + $0xbc4] sm:$0xf]  ;;  %v7337_v4 = vor.u32 %v9698_v55, %v7334_v56  ;;  %3010 = vmatmul.bf16.vlgmr.msra.gmra.mxu0 %v10625_v22  ;;  %v6412_v56 = vld [vmem:[#allocation5 + $0xc8] sm:$0xf] }
  0xbb   :  { %v7814_v58 = vld [vmem:[#allocation5 + $0xbe0] sm:$0xf0]  ;;  %3035 = vmatpush.bf16.msra.mxu2 %v7081_v1  ;;  %v9759_v45 = vld [vmem:[#allocation5 + $0x9e4] sm:$0xf0] }
  0xbc   :  { %v9882_v59 = vld [vmem:[#allocation5 + $0xdc4] sm:$0xf]  ;;  %v7817_v5 = vor.u32 %v9818_v57, %v7814_v58  ;;  %3048 = vmatpush.bf16.msra.mxu3 %v7337_v4  ;;  %3023 = vmatmul.bf16.vlgmr.msra.gmra.mxu1 %v10619_v18  ;;  %v9471_v57 = vld [vmem:[#allocation5 + $0xe4] sm:$0xf0] }
  0xbd   :  { %v8070_v61 = vld [vmem:[#allocation5 + $0xde0] sm:$0xf0]  ;;  %v6668_v58 = vld [vmem:[#allocation5 + $0x2c8] sm:$0xf]  ;;  %v6413_v62 = vor.u32 %v9471_v57, %v6412_v56 }
  0xbe   :  { %v8073_v6 = vor.u32 %v9882_v59, %v8070_v61  ;;  %v9810_v8 = vld [vmem:[#allocation5 + $0xb84] sm:$0xf]  ;;  %3054 = vmatpush.bf16.msrb.mxu0 %v7817_v5  ;;  %3036 = vmatmul.bf16.vlgmr.msra.gmra.mxu2 %v10623_v20  ;;  %v9535_v59 = vld [vmem:[#allocation5 + $0x2e4] sm:$0xf0] }
  0xbf   :  { %v7782_v9 = vld [vmem:[#allocation5 + $0xba0] sm:$0xf0]  ;;  %3080 = vmatpush.bf16.msrb.mxu2 %v6541_v7  ;;  %3049 = vmatmul.bf16.vlgmr.msra.gmra.mxu3 %v10633_v40  ;;  %v6669_v2 = vor.u32 %v9535_v59, %v6668_v58  ;;  %v6380_v4 = vld [vmem:[#allocation5 + $0x88] sm:$0xf] }
  0xc0   :  { %v9874_v10 = vld [vmem:[#allocation5 + $0xd84] sm:$0xf]  ;;  %v7785_v17 = vor.u32 %v9810_v8, %v7782_v9  ;;  %3067 = vmatpush.bf16.msrb.mxu1 %v8073_v6  ;;  %3093 = vmatpush.bf16.msrb.mxu3 %v6797_v11  ;;  %v9463_v5 = vld [vmem:[#allocation5 + $0xa4] sm:$0xf0] }
  0xc1   :  { %v8038_v12 = vld [vmem:[#allocation5 + $0xda0] sm:$0xf0]  ;;  %v6636_v6 = vld [vmem:[#allocation5 + $0x288] sm:$0xf] }
  0xc2   :  { %v8041_v21 = vor.u32 %v9874_v10, %v8038_v12  ;;  %v9802_v24 = vld [vmem:[#allocation5 + $0xb44] sm:$0xf]  ;;  %3055 = vmatpush.bf16.msrb.mxu0 %v7785_v17  ;;  %v9527_v7 = vld [vmem:[#allocation5 + $0x2a4] sm:$0xf0]  ;;  %v6381_v10 = vor.u32 %v9463_v5, %v6380_v4 }
  0xc3   :  { %v7750_v25 = vld [vmem:[#allocation5 + $0xb60] sm:$0xf0]  ;;  %3081 = vmatpush.bf16.msrb.mxu2 %v6509_v23  ;;  %v6637_v14 = vor.u32 %v9527_v7, %v6636_v6  ;;  %v9455_v17 = vld [vmem:[#allocation5 + $0x64] sm:$0xf0] }
  0xc4   :  { %v9866_v26 = vld [vmem:[#allocation5 + $0xd44] sm:$0xf]  ;;  %v7753_v33 = vor.u32 %v9802_v24, %v7750_v25  ;;  %3068 = vmatpush.bf16.msrb.mxu1 %v8041_v21  ;;  %3094 = vmatpush.bf16.msrb.mxu3 %v6765_v27  ;;  %v6604_v21 = vld [vmem:[#allocation5 + $0x248] sm:$0xf] }
  0xc5   :  { %v8006_v28 = vld [vmem:[#allocation5 + $0xd60] sm:$0xf0]  ;;  %v9519_v23 = vld [vmem:[#allocation5 + $0x264] sm:$0xf0] }
  0xc6   :  { %v8009_v34 = vor.u32 %v9866_v26, %v8006_v28  ;;  %v9794_v36 = vld [vmem:[#allocation5 + $0xb04] sm:$0xf]  ;;  %3056 = vmatpush.bf16.msrb.mxu0 %v7753_v33  ;;  %v6349_v28 = vor.u32 %v9455_v17, %v6348_v16  ;;  %v6605_v32 = vor.u32 %v9519_v23, %v6604_v21  ;;  %v9447_v33 = vld [vmem:[#allocation5 + $0x24] sm:$0xf0] }
  0xc7   :  { %v7718_v38 = vld [vmem:[#allocation5 + $0xb20] sm:$0xf0]  ;;  %3082 = vmatpush.bf16.msrb.mxu2 %v6477_v35  ;;  %v9511_v35 = vld [vmem:[#allocation5 + $0x224] sm:$0xf0]  ;;  %v6317_v47 = vor.u32 %v9447_v33, %v6316_v31 }
  0xc8   :  { %v9858_v39 = vld [vmem:[#allocation5 + $0xd04] sm:$0xf]  ;;  %v7721_v48 = vor.u32 %v9794_v36, %v7718_v38  ;;  %3069 = vmatpush.bf16.msrb.mxu1 %v8009_v34  ;;  %3095 = vmatpush.bf16.msrb.mxu3 %v6733_v42  ;;  %v6572_v34 = vld [vmem:[#allocation5 + $0x208] sm:$0xf] }
  0xc9   :  { %v7974_v43 = vld [vmem:[#allocation5 + $0xd20] sm:$0xf0]  ;;  %v7052_v36 = vld [vmem:[#allocation5 + $0x5c8] sm:$0xf] }
  0xca   :  { %v7977_v49 = vor.u32 %v9858_v39, %v7974_v43  ;;  %v9786_v51 = vld [vmem:[#allocation5 + $0xac4] sm:$0xf]  ;;  %3057 = vmatpush.bf16.msrb.mxu0 %v7721_v48  ;;  %v9631_v38 = vld [vmem:[#allocation5 + $0x5e4] sm:$0xf0] }
  0xcb   :  { %v7686_v52 = vld [vmem:[#allocation5 + $0xae0] sm:$0xf0]  ;;  %3083 = vmatpush.bf16.msrb.mxu2 %v6445_v50  ;;  %v7308_v39 = vld [vmem:[#allocation5 + $0x7c8] sm:$0xf]  ;;  %v6573_v50 = vor.u32 %v9511_v35, %v6572_v34 }
  0xcc   :  { %v9850_v53 = vld [vmem:[#allocation5 + $0xcc4] sm:$0xf]  ;;  %v7689_v60 = vor.u32 %v9786_v51, %v7686_v52  ;;  %3070 = vmatpush.bf16.msrb.mxu1 %v7977_v49  ;;  %3096 = vmatpush.bf16.msrb.mxu3 %v6701_v54  ;;  %v9695_v43 = vld [vmem:[#allocation5 + $0x7e4] sm:$0xf0]  ;;  %v7053_v51 = vor.u32 %v9631_v38, %v7052_v36 }
  0xcd   :  { %v7942_v55 = vld [vmem:[#allocation5 + $0xce0] sm:$0xf0]  ;;  %v7820_v48 = vld [vmem:[#allocation5 + $0xbc8] sm:$0xf]  ;;  %v7309_v52 = vor.u32 %v9695_v43, %v7308_v39 }
  0xce   :  { %v7945_v61 = vor.u32 %v9850_v53, %v7942_v55  ;;  %v9778_v63 = vld [vmem:[#allocation5 + $0xa84] sm:$0xf]  ;;  %3058 = vmatpush.bf16.msrb.mxu0 %v7689_v60  ;;  %v9823_v49 = vld [vmem:[#allocation5 + $0xbe4] sm:$0xf0]  ;;  %v7565_v53 = vor.u32 %v9759_v45, %v7564_v44 }
  0xcf   :  { %v7654_v0 = vld [vmem:[#allocation5 + $0xaa0] sm:$0xf0]  ;;  %3084 = vmatpush.bf16.msrb.mxu2 %v6413_v62  ;;  %v7020_v54 = vld [vmem:[#allocation5 + $0x588] sm:$0xf]  ;;  %v7821_v57 = vor.u32 %v9823_v49, %v7820_v48 }
  0xd0   :  { %v9842_v1 = vld [vmem:[#allocation5 + $0xc84] sm:$0xf]  ;;  %v7657_v8 = vor.u32 %v9778_v63, %v7654_v0  ;;  %3071 = vmatpush.bf16.msrb.mxu1 %v7945_v61  ;;  %3097 = vmatpush.bf16.msrb.mxu3 %v6669_v2  ;;  %v9623_v55 = vld [vmem:[#allocation5 + $0x5a4] sm:$0xf0] }
  0xd1   :  { %v7910_v3 = vld [vmem:[#allocation5 + $0xca0] sm:$0xf0]  ;;  %v7276_v56 = vld [vmem:[#allocation5 + $0x788] sm:$0xf]  ;;  %v7021_v63 = vor.u32 %v9623_v55, %v7020_v54 }
  0xd2   :  { %v7913_v9 = vor.u32 %v9842_v1, %v7910_v3  ;;  %v9770_v11 = vld [vmem:[#allocation5 + $0xa44] sm:$0xf]  ;;  %3059 = vmatpush.bf16.msrb.mxu0 %v7657_v8  ;;  %v9687_v58 = vld [vmem:[#allocation5 + $0x7a4] sm:$0xf0] }
  0xd3   :  { %v7622_v12 = vld [vmem:[#allocation5 + $0xa60] sm:$0xf0]  ;;  %3085 = vmatpush.bf16.msrb.mxu2 %v6381_v10  ;;  %v7532_v59 = vld [vmem:[#allocation5 + $0x988] sm:$0xf]  ;;  %v7277_v0 = vor.u32 %v9687_v58, %v7276_v56 }
  0xd4   :  { %v9834_v13 = vld [vmem:[#allocation5 + $0xc44] sm:$0xf]  ;;  %v7625_v24 = vor.u32 %v9770_v11, %v7622_v12  ;;  %3072 = vmatpush.bf16.msrb.mxu1 %v7913_v9  ;;  %3098 = vmatpush.bf16.msrb.mxu3 %v6637_v14  ;;  %v9751_v60 = vld [vmem:[#allocation5 + $0x9a4] sm:$0xf0] }
  0xd5   :  { %v7878_v15 = vld [vmem:[#allocation5 + $0xc60] sm:$0xf0]  ;;  %v7788_v61 = vld [vmem:[#allocation5 + $0xb88] sm:$0xf]  ;;  %v7533_v1 = vor.u32 %v9751_v60, %v7532_v59 }
  0xd6   :  { %v9762_v25 = vld [vmem:[#allocation5 + $0xa04] sm:$0xf]  ;;  %v7881_v27 = vor.u32 %v9834_v13, %v7878_v15  ;;  %3060 = vmatpush.bf16.msrb.mxu0 %v7625_v24  ;;  %v9815_v62 = vld [vmem:[#allocation5 + $0xba4] sm:$0xf0] }
  0xd7   :  { %v7590_v26 = vld [vmem:[#allocation5 + $0xa20] sm:$0xf0]  ;;  %3086 = vmatpush.bf16.msrb.mxu2 %v6349_v28  ;;  %v6988_v2 = vld [vmem:[#allocation5 + $0x548] sm:$0xf]  ;;  %v7789_v5 = vor.u32 %v9815_v62, %v7788_v61 }
  0xd8   :  { %v9826_v29 = vld [vmem:[#allocation5 + $0xc04] sm:$0xf]  ;;  %v7593_v42 = vor.u32 %v9762_v25, %v7590_v26  ;;  %3073 = vmatpush.bf16.msrb.mxu1 %v7881_v27  ;;  %3099 = vmatpush.bf16.msrb.mxu3 %v6605_v32  ;;  %v9615_v3 = vld [vmem:[#allocation5 + $0x564] sm:$0xf0] }
  0xd9   :  { %v7846_v30 = vld [vmem:[#allocation5 + $0xc20] sm:$0xf0]  ;;  %v7244_v4 = vld [vmem:[#allocation5 + $0x748] sm:$0xf]  ;;  %v6989_v11 = vor.u32 %v9615_v3, %v6988_v2 }
  0xda   :  { %v7849_v46 = vor.u32 %v9826_v29, %v7846_v30  ;;  %3061 = vmatpush.bf16.msrb.mxu0 %v7593_v42  ;;  %v9679_v6 = vld [vmem:[#allocation5 + $0x764] sm:$0xf0] }
  0xdb   :  { %3087 = vmatpush.bf16.msrb.mxu2 %v6317_v47  ;;  %v7500_v7 = vld [vmem:[#allocation5 + $0x948] sm:$0xf]  ;;  %v7245_v12 = vor.u32 %v9679_v6, %v7244_v4 }
  0xdc   :  { %3074 = vmatpush.bf16.msrb.mxu1 %v7849_v46  ;;  %3100 = vmatpush.bf16.msrb.mxu3 %v6573_v50  ;;  %v9743_v8 = vld [vmem:[#allocation5 + $0x964] sm:$0xf0] }
  0xdd   :  { %3062 = vmatmul.bf16.vlgmr.msrb.gmra.mxu0 %v10635_v41  ;;  %v7756_v9 = vld [vmem:[#allocation5 + $0xb48] sm:$0xf]  ;;  %v7501_v13 = vor.u32 %v9743_v8, %v7500_v7 }
  0xde   :  { %3106 = vmatpush.bf16.msra.mxu0 %v7053_v51  ;;  %v9807_v10 = vld [vmem:[#allocation5 + $0xb64] sm:$0xf0]  ;;  %3088 = vmatmul.bf16.vlgmr.msrb.gmra.mxu2 %v10621_v19 }
  0xdf   :  { %3132 = vmatpush.bf16.msra.mxu2 %v7565_v53  ;;  %3075 = vmatmul.bf16.vlgmr.msrb.gmra.mxu1 %v10631_v37  ;;  %v6956_v14 = vld [vmem:[#allocation5 + $0x508] sm:$0xf]  ;;  %v7757_v17 = vor.u32 %v9807_v10, %v7756_v9 }
  0xe0   :  { %3119 = vmatpush.bf16.msra.mxu1 %v7309_v52  ;;  %3145 = vmatpush.bf16.msra.mxu3 %v7821_v57  ;;  %v9607_v15 = vld [vmem:[#allocation5 + $0x524] sm:$0xf0] }
  0xe1   :  { %3101 = vmatmul.bf16.vlgmr.msrb.gmra.mxu3 %v10625_v22  ;;  %v7212_v16 = vld [vmem:[#allocation5 + $0x708] sm:$0xf]  ;;  %v6957_v27 = vor.u32 %v9607_v15, %v6956_v14 }
  0xe2   :  { %3107 = vmatpush.bf16.msra.mxu0 %v7021_v63  ;;  %v9671_v21 = vld [vmem:[#allocation5 + $0x724] sm:$0xf0] }
  0xe3   :  { %3133 = vmatpush.bf16.msra.mxu2 %v7533_v1  ;;  %v7468_v23 = vld [vmem:[#allocation5 + $0x908] sm:$0xf]  ;;  %v7213_v28 = vor.u32 %v9671_v21, %v7212_v16  ;;  %v9499_v16 = vld [vmem:[#allocation5 + $0x1cc] sm:$0xf] }
  0xe4   :  { %3120 = vmatpush.bf16.msra.mxu1 %v7277_v0  ;;  %3146 = vmatpush.bf16.msra.mxu3 %v7789_v5  ;;  %v9735_v24 = vld [vmem:[#allocation5 + $0x924] sm:$0xf0]  ;;  %v6542_v21 = vld [vmem:[#allocation5 + $0x1e8] sm:$0xf0] }
  0xe5   :  { %v7724_v25 = vld [vmem:[#allocation5 + $0xb08] sm:$0xf]  ;;  %v7469_v29 = vor.u32 %v9735_v24, %v7468_v23  ;;  %v9563_v23 = vld [vmem:[#allocation5 + $0x3cc] sm:$0xf] }
  0xe6   :  { %v9799_v26 = vld [vmem:[#allocation5 + $0xb24] sm:$0xf0]  ;;  %3108 = vmatpush.bf16.msra.mxu0 %v6989_v11  ;;  %v6798_v24 = vld [vmem:[#allocation5 + $0x3e8] sm:$0xf0] }
  0xe7   :  { %3134 = vmatpush.bf16.msra.mxu2 %v7501_v13  ;;  %v6924_v30 = vld [vmem:[#allocation5 + $0x4c8] sm:$0xf]  ;;  %v7725_v33 = vor.u32 %v9799_v26, %v7724_v25 }
  0xe8   :  { %3121 = vmatpush.bf16.msra.mxu1 %v7245_v12  ;;  %v9599_v31 = vld [vmem:[#allocation5 + $0x4e4] sm:$0xf0]  ;;  %3147 = vmatpush.bf16.msra.mxu3 %v7757_v17 }
  0xe9   :  { %v7180_v32 = vld [vmem:[#allocation5 + $0x6c8] sm:$0xf]  ;;  %v6925_v42 = vor.u32 %v9599_v31, %v6924_v30  ;;  %v6545_v31 = vor.u32 %v9499_v16, %v6542_v21  ;;  %v9595_v16 = vld [vmem:[#allocation5 + $0x4cc] sm:$0xf] }
  0xea   :  { %v9663_v34 = vld [vmem:[#allocation5 + $0x6e4] sm:$0xf0]  ;;  %3109 = vmatpush.bf16.msra.mxu0 %v6957_v27  ;;  %v9627_v27 = vld [vmem:[#allocation5 + $0x5cc] sm:$0xf] }
  0xeb   :  { %v7436_v35 = vld [vmem:[#allocation5 + $0x8c8] sm:$0xf]  ;;  %3135 = vmatpush.bf16.msra.mxu2 %v7469_v29  ;;  %v7181_v43 = vor.u32 %v9663_v34, %v7180_v32  ;;  %v6801_v32 = vor.u32 %v9563_v23, %v6798_v24 }
  0xec   :  { %v9727_v36 = vld [vmem:[#allocation5 + $0x8e4] sm:$0xf0]  ;;  %3122 = vmatpush.bf16.msra.mxu1 %v7213_v28  ;;  %3148 = vmatpush.bf16.msra.mxu3 %v7725_v33  ;;  %v7054_v28 = vld [vmem:[#allocation5 + $0x5e8] sm:$0xf0] }
  0xed   :  { %v7692_v38 = vld [vmem:[#allocation5 + $0xac8] sm:$0xf]  ;;  %v7437_v44 = vor.u32 %v9727_v36, %v7436_v35  ;;  %v9491_v35 = vld [vmem:[#allocation5 + $0x18c] sm:$0xf]  ;;  %v7057_v36 = vor.u32 %v9627_v27, %v7054_v28 }
  0xee   :  { %v9791_v39 = vld [vmem:[#allocation5 + $0xae4] sm:$0xf0]  ;;  %3110 = vmatpush.bf16.msra.mxu0 %v6925_v42  ;;  %v6766_v42 = vld [vmem:[#allocation5 + $0x3a8] sm:$0xf0] }
  0xef   :  { %v6892_v45 = vld [vmem:[#allocation5 + $0x488] sm:$0xf]  ;;  %v7693_v48 = vor.u32 %v9791_v39, %v7692_v38  ;;  %3136 = vmatpush.bf16.msra.mxu2 %v7437_v44  ;;  %v6510_v38 = vld [vmem:[#allocation5 + $0x1a8] sm:$0xf0] }
  0xf0   :  { %v9591_v46 = vld [vmem:[#allocation5 + $0x4a4] sm:$0xf0]  ;;  %3123 = vmatpush.bf16.msra.mxu1 %v7181_v43  ;;  %v9555_v39 = vld [vmem:[#allocation5 + $0x38c] sm:$0xf] }
  0xf1   :  { %v7148_v47 = vld [vmem:[#allocation5 + $0x688] sm:$0xf]  ;;  %v6893_v54 = vor.u32 %v9591_v46, %v6892_v45  ;;  %3149 = vmatpush.bf16.msra.mxu3 %v7693_v48  ;;  %v9619_v43 = vld [vmem:[#allocation5 + $0x58c] sm:$0xf]  ;;  %v6513_v46 = vor.u32 %v9491_v35, %v6510_v38 }
  0xf2   :  { %v9655_v49 = vld [vmem:[#allocation5 + $0x6a4] sm:$0xf0]  ;;  %v7022_v44 = vld [vmem:[#allocation5 + $0x5a8] sm:$0xf0] }
  0xf3   :  { %v7404_v50 = vld [vmem:[#allocation5 + $0x888] sm:$0xf]  ;;  %v7149_v55 = vor.u32 %v9655_v49, %v7148_v47  ;;  %3111 = vmatpush.bf16.msra.mxu0 %v6893_v54  ;;  %v6769_v47 = vor.u32 %v9555_v39, %v6766_v42  ;;  %v6734_v54 = vld [vmem:[#allocation5 + $0x368] sm:$0xf0] }
  0xf4   :  { %v9719_v51 = vld [vmem:[#allocation5 + $0x8a4] sm:$0xf0]  ;;  %v9459_v27 = vld [vmem:[#allocation5 + $0x8c] sm:$0xf] }
  0xf5   :  { %v7660_v52 = vld [vmem:[#allocation5 + $0xa88] sm:$0xf]  ;;  %v7405_v56 = vor.u32 %v9719_v51, %v7404_v50  ;;  %3124 = vmatpush.bf16.msra.mxu1 %v7149_v55  ;;  %v9483_v50 = vld [vmem:[#allocation5 + $0x14c] sm:$0xf]  ;;  %v7025_v51 = vor.u32 %v9619_v43, %v7022_v44 }
  0xf6   :  { %v9783_v53 = vld [vmem:[#allocation5 + $0xaa4] sm:$0xf0]  ;;  %v9611_v55 = vld [vmem:[#allocation5 + $0x54c] sm:$0xf] }
  0xf7   :  { %v6860_v57 = vld [vmem:[#allocation5 + $0x448] sm:$0xf]  ;;  %v7661_v60 = vor.u32 %v9783_v53, %v7660_v52  ;;  %3137 = vmatpush.bf16.msra.mxu2 %v7405_v56  ;;  %v6478_v52 = vld [vmem:[#allocation5 + $0x168] sm:$0xf0] }
  0xf8   :  { %v9583_v58 = vld [vmem:[#allocation5 + $0x464] sm:$0xf0]  ;;  %v9547_v53 = vld [vmem:[#allocation5 + $0x34c] sm:$0xf] }
  0xf9   :  { %v7116_v59 = vld [vmem:[#allocation5 + $0x648] sm:$0xf]  ;;  %v6861_v2 = vor.u32 %v9583_v58, %v6860_v57  ;;  %3150 = vmatpush.bf16.msra.mxu3 %v7661_v60  ;;  %v6990_v56 = vld [vmem:[#allocation5 + $0x568] sm:$0xf0]  ;;  %v6481_v58 = vor.u32 %v9483_v50, %v6478_v52 }
  0xfa   :  { %v9647_v61 = vld [vmem:[#allocation5 + $0x664] sm:$0xf0]  ;;  %v9451_v44 = vld [vmem:[#allocation5 + $0x4c] sm:$0xf] }
  0xfb   :  { %v7372_v62 = vld [vmem:[#allocation5 + $0x848] sm:$0xf]  ;;  %v7117_v5 = vor.u32 %v9647_v61, %v7116_v59  ;;  %3112 = vmatpush.bf16.msra.mxu0 %v6861_v2  ;;  %v6737_v59 = vor.u32 %v9547_v53, %v6734_v54  ;;  %v6702_v2 = vld [vmem:[#allocation5 + $0x328] sm:$0xf0] }
  0xfc   :  { %v9711_v63 = vld [vmem:[#allocation5 + $0x864] sm:$0xf0]  ;;  %v6606_v50 = vld [vmem:[#allocation5 + $0x268] sm:$0xf0] }
  0xfd   :  { %v7628_v0 = vld [vmem:[#allocation5 + $0xa48] sm:$0xf]  ;;  %v7373_v6 = vor.u32 %v9711_v63, %v7372_v62  ;;  %3125 = vmatpush.bf16.msra.mxu1 %v7117_v5  ;;  %v9475_v62 = vld [vmem:[#allocation5 + $0x10c] sm:$0xf]  ;;  %v6993_v63 = vor.u32 %v9611_v55, %v6990_v56 }
  0xfe   :  { %v9775_v1 = vld [vmem:[#allocation5 + $0xa64] sm:$0xf0]  ;;  %v6862_v52 = vld [vmem:[#allocation5 + $0x468] sm:$0xf0] }
  0xff   :  { %v6828_v3 = vld [vmem:[#allocation5 + $0x408] sm:$0xf]  ;;  %v7629_v10 = vor.u32 %v9775_v1, %v7628_v0  ;;  %3138 = vmatpush.bf16.msra.mxu2 %v7373_v6  ;;  %v6446_v0 = vld [vmem:[#allocation5 + $0x128] sm:$0xf0] }
 0x100   :  { %v9575_v4 = vld [vmem:[#allocation5 + $0x424] sm:$0xf0]  ;;  %v9539_v1 = vld [vmem:[#allocation5 + $0x30c] sm:$0xf] }
 0x101   :  { %v7084_v7 = vld [vmem:[#allocation5 + $0x608] sm:$0xf]  ;;  %v6829_v17 = vor.u32 %v9575_v4, %v6828_v3  ;;  %3151 = vmatpush.bf16.msra.mxu3 %v7629_v10  ;;  %v9603_v3 = vld [vmem:[#allocation5 + $0x50c] sm:$0xf] }
 0x102   :  { %v9639_v8 = vld [vmem:[#allocation5 + $0x624] sm:$0xf0]  ;;  %v6958_v4 = vld [vmem:[#allocation5 + $0x528] sm:$0xf0] }
 0x103   :  { %v7340_v9 = vld [vmem:[#allocation5 + $0x808] sm:$0xf]  ;;  %v7085_v25 = vor.u32 %v9639_v8, %v7084_v7  ;;  %3113 = vmatpush.bf16.msra.mxu0 %v6829_v17  ;;  %v6449_v7 = vor.u32 %v9475_v62, %v6446_v0  ;;  %v6705_v8 = vor.u32 %v9539_v1, %v6702_v2  ;;  %v9467_v10 = vld [vmem:[#allocation5 + $0xcc] sm:$0xf]  ;;  %v2933_v62 = vpop.f32.mrf.mxu2 }
 0x104   :  { %v9703_v11 = vld [vmem:[#allocation5 + $0x824] sm:$0xf0]  ;;  %v6926_v17 = vld [vmem:[#allocation5 + $0x4e8] sm:$0xf0] }
 0x105   :  { %v7596_v12 = vld [vmem:[#allocation5 + $0xa08] sm:$0xf]  ;;  %v7341_v26 = vor.u32 %v9703_v11, %v7340_v9  ;;  %3126 = vmatpush.bf16.msra.mxu1 %v7085_v25  ;;  %v6414_v11 = vld [vmem:[#allocation5 + $0xe8] sm:$0xf0] }
 0x106   :  { %v9767_v13 = vld [vmem:[#allocation5 + $0xa24] sm:$0xf0]  ;;  %3114 = vmatmul.bf16.vlgmr.msra.gmra.mxu0 %v10619_v18  ;;  %v6417_v24 = vor.u32 %v9467_v10, %v6414_v11  ;;  %v6574_v0 = vld [vmem:[#allocation5 + $0x228] sm:$0xf0] }
 0x107   :  { %v8076_v14 = vld [vmem:[#allocation5 + $0xdc8] sm:$0xf]  ;;  %v7597_v29 = vor.u32 %v9767_v13, %v7596_v12  ;;  %3139 = vmatpush.bf16.msra.mxu2 %v7341_v26  ;;  %v6961_v12 = vor.u32 %v9603_v3, %v6958_v4  ;;  %v9531_v13 = vld [vmem:[#allocation5 + $0x2cc] sm:$0xf]  ;;  %v2946_v4 = vpop.f32.mrf.mxu3 }
 0x108   :  { %v9887_v15 = vld [vmem:[#allocation5 + $0xde4] sm:$0xf0]  ;;  %3127 = vmatmul.bf16.vlgmr.msra.gmra.mxu1 %v10623_v20  ;;  %v9571_v1 = vld [vmem:[#allocation5 + $0x40c] sm:$0xf] }
 0x109   :  { %v8077_v30 = vor.u32 %v9887_v15, %v8076_v14  ;;  %v8044_v33 = vld [vmem:[#allocation5 + $0xd88] sm:$0xf]  ;;  %3152 = vmatpush.bf16.msra.mxu3 %v7597_v29  ;;  %3171 = vmatpush.bf16.msrb.mxu1 %v6545_v31  ;;  %v6670_v14 = vld [vmem:[#allocation5 + $0x2e8] sm:$0xf0]  ;;  %v10653_v15 = vld [vmem:[#allocation7] sm:$0xff]  ;;  %v6929_v29 = vor.u32 %v9595_v16, %v6926_v17 }
 0x10a   :  { %v9879_v34 = vld [vmem:[#allocation5 + $0xda4] sm:$0xf0]  ;;  %3140 = vmatmul.bf16.vlgmr.msra.gmra.mxu2 %v10633_v40  ;;  %v6673_v25 = vor.u32 %v9531_v13, %v6670_v14  ;;  %v617_v28 = vperm.slane %v10653_v15, 0  ;;  %v9523_v31 = vld [vmem:[#allocation5 + $0x28c] sm:$0xf] }
 0x10b   :  { %3158 = vmatpush.bf16.msrb.mxu0 %v8077_v30  ;;  %v8045_v45 = vor.u32 %v9879_v34, %v8044_v33  ;;  %3184 = vmatpush.bf16.msrb.mxu2 %v6801_v32  ;;  %v8012_v48 = vld [vmem:[#allocation5 + $0xd48] sm:$0xf]  ;;  %v6382_v30 = vld [vmem:[#allocation5 + $0xa8] sm:$0xf0] }
 0x10c   :  { %v9871_v49 = vld [vmem:[#allocation5 + $0xd64] sm:$0xf0]  ;;  %3153 = vmatmul.bf16.vlgmr.msra.gmra.mxu3 %v10635_v41  ;;  %v6638_v32 = vld [vmem:[#allocation5 + $0x2a8] sm:$0xf0]  ;;  %v6385_v38 = vor.u32 %v9459_v27, %v6382_v30 }
 0x10d   :  { %3197 = vmatpush.bf16.msrb.mxu3 %v7057_v36  ;;  %v8013_v57 = vor.u32 %v9871_v49, %v8012_v48  ;;  %3172 = vmatpush.bf16.msrb.mxu1 %v6513_v46  ;;  %v7980_v60 = vld [vmem:[#allocation5 + $0xd08] sm:$0xf]  ;;  %v9587_v33 = vld [vmem:[#allocation5 + $0x48c] sm:$0xf]  ;;  %v2907_v36 = vpop.f32.mrf.mxu0  ;;  %v6641_v39 = vor.u32 %v9523_v31, %v6638_v32  ;;  %v2920_v46 = vpop.f32.mrf.mxu1 }
 0x10e   :  { %v9863_v61 = vld [vmem:[#allocation5 + $0xd24] sm:$0xf0]  ;;  %v6894_v34 = vld [vmem:[#allocation5 + $0x4a8] sm:$0xf0] }
 0x10f   :  { %3159 = vmatpush.bf16.msrb.mxu0 %v8045_v45  ;;  %3185 = vmatpush.bf16.msrb.mxu2 %v6769_v47  ;;  %v7981_v5 = vor.u32 %v9863_v61, %v7980_v60  ;;  %v7948_v6 = vld [vmem:[#allocation5 + $0xcc8] sm:$0xf]  ;;  %v2908_v45 = vadd.f32 %v2907_v36, %v617_v28  ;;  %v6897_v47 = vor.u32 %v9587_v33, %v6894_v34  ;;  %v6350_v48 = vld [vmem:[#allocation5 + $0x68] sm:$0xf0] }
 0x110   :  { %v9855_v9 = vld [vmem:[#allocation5 + $0xce4] sm:$0xf0]  ;;  %v9515_v49 = vld [vmem:[#allocation5 + $0x24c] sm:$0xf] }
 0x111   :  { %3198 = vmatpush.bf16.msrb.mxu3 %v7025_v51  ;;  %3173 = vmatpush.bf16.msrb.mxu1 %v6481_v58  ;;  %v7949_v21 = vor.u32 %v9855_v9, %v7948_v6  ;;  %v7916_v23 = vld [vmem:[#allocation5 + $0xc88] sm:$0xf]  ;;  %v9579_v51 = vld [vmem:[#allocation5 + $0x44c] sm:$0xf]  ;;  %v2921_v53 = vadd.f32 %v2920_v46, %v2908_v45  ;;  %v6609_v58 = vor.u32 %v9515_v49, %v6606_v50 }
 0x112   :  { %v9847_v26 = vld [vmem:[#allocation5 + $0xca4] sm:$0xf0]  ;;  %v6318_v60 = vld [vmem:[#allocation5 + $0x28] sm:$0xf0] }
 0x113   :  { %3160 = vmatpush.bf16.msrb.mxu0 %v8013_v57  ;;  %3186 = vmatpush.bf16.msrb.mxu2 %v6737_v59  ;;  %v7917_v35 = vor.u32 %v9847_v26, %v7916_v23  ;;  %v7884_v42 = vld [vmem:[#allocation5 + $0xc48] sm:$0xf]  ;;  %v6353_v57 = vor.u32 %v9451_v44, %v6350_v48  ;;  %v9443_v59 = vld [vmem:[#allocation5 + $0xc] sm:$0xf]  ;;  %v2934_v3 = vadd.f32 %v2933_v62, %v2921_v53 }
 0x114   :  { %v9839_v43 = vld [vmem:[#allocation5 + $0xc64] sm:$0xf0]  ;;  %v9507_v61 = vld [vmem:[#allocation5 + $0x20c] sm:$0xf]  ;;  %v6321_v14 = vor.u32 %v9443_v59, %v6318_v60 }
 0x115   :  { %3199 = vmatpush.bf16.msrb.mxu3 %v6993_v63  ;;  %3174 = vmatpush.bf16.msrb.mxu1 %v6449_v7  ;;  %v7885_v54 = vor.u32 %v9839_v43, %v7884_v42  ;;  %v7852_v55 = vld [vmem:[#allocation5 + $0xc08] sm:$0xf]  ;;  %v6865_v63 = vor.u32 %v9579_v51, %v6862_v52  ;;  %v6830_v2 = vld [vmem:[#allocation5 + $0x428] sm:$0xf0]  ;;  %v2909_v13 = vpop.f32.mrf.mxu0  ;;  %v6577_v16 = vor.u32 %v9507_v61, %v6574_v0  ;;  %v2922_v23 = vpop.f32.mrf.mxu1 }
 0x116   :  { %v9831_v56 = vld [vmem:[#allocation5 + $0xc24] sm:$0xf0]  ;;  %v7310_v6 = vld [vmem:[#allocation5 + $0x7e8] sm:$0xf0]  ;;  %v2948_v42 = vpop.f32.mrf.mxu3 }
 0x117   :  { %3161 = vmatpush.bf16.msrb.mxu0 %v7981_v5  ;;  %3187 = vmatpush.bf16.msrb.mxu2 %v6705_v8  ;;  %v9691_v5 = vld [vmem:[#allocation5 + $0x7cc] sm:$0xf]  ;;  %v7853_v8 = vor.u32 %v9831_v56, %v7852_v55 }
 0x118   :  { %v9755_v7 = vld [vmem:[#allocation5 + $0x9cc] sm:$0xf] }
 0x119   :  { %3200 = vmatpush.bf16.msrb.mxu3 %v6961_v12  ;;  %3175 = vmatpush.bf16.msrb.mxu1 %v6417_v24  ;;  %v7566_v9 = vld [vmem:[#allocation5 + $0x9e8] sm:$0xf0]  ;;  %v10656_v12 = vadd.f32 %v2946_v4, %v2934_v3  ;;  %v6833_v24 = vor.u32 %v9571_v1, %v6830_v2 }
 0x11a   :  { %v9819_v10 = vld [vmem:[#allocation5 + $0xbcc] sm:$0xf]  ;;  %v7569_v26 = vor.u32 %v9755_v7, %v7566_v9 }
 0x11b   :  { %3162 = vmatpush.bf16.msrb.mxu0 %v7949_v21  ;;  %3188 = vmatpush.bf16.msrb.mxu2 %v6673_v25  ;;  %v7822_v11 = vld [vmem:[#allocation5 + $0xbe8] sm:$0xf0]  ;;  %v7313_v25 = vor.u32 %v9691_v5, %v7310_v6 }
 0x11c   :  { %v9883_v17 = vld [vmem:[#allocation5 + $0xdcc] sm:$0xf]  ;;  %v7825_v27 = vor.u32 %v9819_v10, %v7822_v11 }
 0x11d   :  { %3201 = vmatpush.bf16.msrb.mxu3 %v6929_v29  ;;  %3176 = vmatpush.bf16.msrb.mxu1 %v6385_v38  ;;  %v8078_v21 = vld [vmem:[#allocation5 + $0xde8] sm:$0xf0]  ;;  %v2935_v38 = vpop.f32.mrf.mxu2  ;;  %v2959_v3 = vpop.f32.mrf.mxu0 }
 0x11e   :  { %v9683_v28 = vld [vmem:[#allocation5 + $0x78c] sm:$0xf]  ;;  %v8081_v31 = vor.u32 %v9883_v17, %v8078_v21  ;;  %v2972_v4 = vpop.f32.mrf.mxu1  ;;  %v2960_v10 = vadd.f32 %v2959_v3, %v10656_v12  ;;  %v10665_v38 = vpop.f32.mrf.mxu3 }
 0x11f   :  { %3163 = vmatpush.bf16.msrb.mxu0 %v7917_v35  ;;  %3189 = vmatpush.bf16.msrb.mxu2 %v6641_v39  ;;  %v7278_v29 = vld [vmem:[#allocation5 + $0x7a8] sm:$0xf0] }
 0x120   :  { %v9747_v30 = vld [vmem:[#allocation5 + $0x98c] sm:$0xf]  ;;  %v7281_v39 = vor.u32 %v9683_v28, %v7278_v29  ;;  %v2973_v23 = vadd.f32 %v2972_v4, %v2960_v10  ;;  %v6548_v4 = vld [vmem:[#allocation5 + $0x1d0] sm:$0xf] }
 0x121   :  { %3202 = vmatpush.bf16.msrb.mxu3 %v6897_v47  ;;  %3177 = vmatpush.bf16.msrb.mxu1 %v6353_v57  ;;  %v7534_v32 = vld [vmem:[#allocation5 + $0x9a8] sm:$0xf0]  ;;  %v7060_v10 = vld [vmem:[#allocation5 + $0x5d0] sm:$0xf] }
 0x122   :  { %v9811_v33 = vld [vmem:[#allocation5 + $0xb8c] sm:$0xf]  ;;  %v7537_v43 = vor.u32 %v9747_v30, %v7534_v32 }
 0x123   :  { %3164 = vmatpush.bf16.msrb.mxu0 %v7885_v54  ;;  %3190 = vmatpush.bf16.msrb.mxu2 %v6609_v58  ;;  %v7790_v34 = vld [vmem:[#allocation5 + $0xba8] sm:$0xf0] }
 0x124   :  { %v9875_v35 = vld [vmem:[#allocation5 + $0xd8c] sm:$0xf]  ;;  %v7793_v44 = vor.u32 %v9811_v33, %v7790_v34 }
 0x125   :  { %3203 = vmatpush.bf16.msrb.mxu3 %v6865_v63  ;;  %3178 = vmatpush.bf16.msrb.mxu1 %v6321_v14  ;;  %v8046_v36 = vld [vmem:[#allocation5 + $0xda8] sm:$0xf0]  ;;  %v2985_v30 = vpop.f32.mrf.mxu2  ;;  %v2961_v42 = vpop.f32.mrf.mxu0 }
 0x126   :  { %v9675_v45 = vld [vmem:[#allocation5 + $0x74c] sm:$0xf]  ;;  %v8049_v48 = vor.u32 %v9875_v35, %v8046_v36  ;;  %v10663_v34 = vadd.f32 %v2985_v30, %v2973_v23  ;;  %v9560_v30 = vld [vmem:[#allocation5 + $0x3ac] sm:$0xf0] }
 0x127   :  { %3165 = vmatpush.bf16.msrb.mxu0 %v7853_v8  ;;  %3191 = vmatpush.bf16.msrb.mxu2 %v6577_v16  ;;  %v7246_v46 = vld [vmem:[#allocation5 + $0x768] sm:$0xf0] }
 0x128   :  { %v9739_v47 = vld [vmem:[#allocation5 + $0x94c] sm:$0xf]  ;;  %v7249_v54 = vor.u32 %v9675_v45, %v7246_v46  ;;  %3179 = vmatmul.bf16.vlgmr.msrb.gmra.mxu1 %v10621_v19  ;;  %10245 = vtanh.f32 %v10663_v34  ;;  %v9924_v34 = vld [vmem:[#allocation8 + $0x10c] sm:$0xf0] }
 0x129   :  { %3204 = vmatpush.bf16.msrb.mxu3 %v6833_v24  ;;  %3223 = vmatpush.bf16.msra.mxu1 %v7569_v26  ;;  %v7502_v49 = vld [vmem:[#allocation5 + $0x968] sm:$0xf0] }
 0x12a   :  { %3166 = vmatmul.bf16.vlgmr.msrb.gmra.mxu0 %v10631_v37  ;;  %v9803_v50 = vld [vmem:[#allocation5 + $0xb4c] sm:$0xf]  ;;  %3192 = vmatmul.bf16.vlgmr.msrb.gmra.mxu2 %v10625_v22  ;;  %v7505_v55 = vor.u32 %v9739_v47, %v7502_v49 }
 0x12b   :  { %3210 = vmatpush.bf16.msra.mxu0 %v7313_v25  ;;  %3236 = vmatpush.bf16.msra.mxu2 %v7825_v27  ;;  %v7758_v51 = vld [vmem:[#allocation5 + $0xb68] sm:$0xf0] }
 0x12c   :  { %v9867_v52 = vld [vmem:[#allocation5 + $0xd4c] sm:$0xf]  ;;  %3205 = vmatmul.bf16.vlgmr.msrb.gmra.mxu3 %v10619_v18  ;;  %v7761_v56 = vor.u32 %v9803_v50, %v7758_v51 }
 0x12d   :  { %3249 = vmatpush.bf16.msra.mxu3 %v8081_v31  ;;  %v8014_v53 = vld [vmem:[#allocation5 + $0xd68] sm:$0xf0]  ;;  %3224 = vmatpush.bf16.msra.mxu1 %v7537_v43  ;;  %v2974_v43 = vpop.f32.mrf.mxu1 }
 0x12e   :  { %v9667_v57 = vld [vmem:[#allocation5 + $0x70c] sm:$0xf]  ;;  %v8017_v60 = vor.u32 %v9867_v52, %v8014_v53  ;;  %v9488_v43 = vld [vmem:[#allocation5 + $0x16c] sm:$0xf0] }
 0x12f   :  { %3211 = vmatpush.bf16.msra.mxu0 %v7281_v39  ;;  %3237 = vmatpush.bf16.msra.mxu2 %v7793_v44  ;;  %v7214_v58 = vld [vmem:[#allocation5 + $0x728] sm:$0xf0] }
 0x130   :  { %v9731_v59 = vld [vmem:[#allocation5 + $0x90c] sm:$0xf]  ;;  %v7217_v2 = vor.u32 %v9667_v57, %v7214_v58 }
 0x131   :  { %3250 = vmatpush.bf16.msra.mxu3 %v8049_v48  ;;  %v7470_v61 = vld [vmem:[#allocation5 + $0x928] sm:$0xf0]  ;;  %3225 = vmatpush.bf16.msra.mxu1 %v7505_v55 }
 0x132   :  { %v9795_v62 = vld [vmem:[#allocation5 + $0xb0c] sm:$0xf]  ;;  %v7473_v5 = vor.u32 %v9731_v59, %v7470_v61 }
 0x133   :  { %v7726_v63 = vld [vmem:[#allocation5 + $0xb28] sm:$0xf0]  ;;  %3212 = vmatpush.bf16.msra.mxu0 %v7249_v54  ;;  %3238 = vmatpush.bf16.msra.mxu2 %v7761_v56 }
 0x134   :  { %v9859_v0 = vld [vmem:[#allocation5 + $0xd0c] sm:$0xf]  ;;  %v7729_v6 = vor.u32 %v9795_v62, %v7726_v63  ;;  %v2987_v63 = vpop.f32.mrf.mxu2 }
 0x135   :  { %v7982_v1 = vld [vmem:[#allocation5 + $0xd28] sm:$0xf0]  ;;  %3251 = vmatpush.bf16.msra.mxu3 %v8017_v60  ;;  %3226 = vmatpush.bf16.msra.mxu1 %v7473_v5  ;;  %v9504_v5 = vld [vmem:[#allocation5 + $0x1ec] sm:$0xf0] }
 0x136   :  { %v9659_v7 = vld [vmem:[#allocation5 + $0x6cc] sm:$0xf]  ;;  %v7985_v11 = vor.u32 %v9859_v0, %v7982_v1  ;;  %v6549_v23 = vor.u32 %v9504_v5, %v6548_v4  ;;  %v7220_v63 = vld [vmem:[#allocation5 + $0x710] sm:$0xf] }
 0x137   :  { %v7182_v8 = vld [vmem:[#allocation5 + $0x6e8] sm:$0xf0]  ;;  %3213 = vmatpush.bf16.msra.mxu0 %v7217_v2  ;;  %3239 = vmatpush.bf16.msra.mxu2 %v7729_v6  ;;  %v6804_v6 = vld [vmem:[#allocation5 + $0x3d0] sm:$0xf] }
 0x138   :  { %v9723_v9 = vld [vmem:[#allocation5 + $0x8cc] sm:$0xf]  ;;  %v7185_v24 = vor.u32 %v9659_v7, %v7182_v8  ;;  %v3000_v7 = vpop.f32.mrf.mxu3  ;;  %v6420_v5 = vld [vmem:[#allocation5 + $0xd0] sm:$0xf] }
 0x139   :  { %v7438_v13 = vld [vmem:[#allocation5 + $0x8e8] sm:$0xf0]  ;;  %3252 = vmatpush.bf16.msra.mxu3 %v7985_v11  ;;  %v9632_v11 = vld [vmem:[#allocation5 + $0x5ec] sm:$0xf0] }
 0x13a   :  { %v9787_v14 = vld [vmem:[#allocation5 + $0xacc] sm:$0xf]  ;;  %v7441_v25 = vor.u32 %v9723_v9, %v7438_v13  ;;  %v9568_v9 = vld [vmem:[#allocation5 + $0x3ec] sm:$0xf0] }
 0x13b   :  { %v7694_v16 = vld [vmem:[#allocation5 + $0xae8] sm:$0xf0]  ;;  %3214 = vmatpush.bf16.msra.mxu0 %v7185_v24  ;;  %v6805_v24 = vor.u32 %v9568_v9, %v6804_v6  ;;  %v9472_v6 = vld [vmem:[#allocation5 + $0xec] sm:$0xf0] }
 0x13c   :  { %v9851_v17 = vld [vmem:[#allocation5 + $0xccc] sm:$0xf]  ;;  %v7697_v26 = vor.u32 %v9787_v14, %v7694_v16  ;;  %3227 = vmatpush.bf16.msra.mxu1 %v7441_v25  ;;  %v7316_v16 = vld [vmem:[#allocation5 + $0x7d0] sm:$0xf]  ;;  %v7061_v25 = vor.u32 %v9632_v11, %v7060_v10 }
 0x13d   :  { %v7950_v21 = vld [vmem:[#allocation5 + $0xce8] sm:$0xf0]  ;;  %v9536_v10 = vld [vmem:[#allocation5 + $0x2ec] sm:$0xf0] }
 0x13e   :  { %v9651_v27 = vld [vmem:[#allocation5 + $0x68c] sm:$0xf]  ;;  %v7953_v12 = vor.u32 %v9851_v17, %v7950_v21  ;;  %3240 = vmatpush.bf16.msra.mxu2 %v7697_v26  ;;  %v9696_v17 = vld [vmem:[#allocation5 + $0x7ec] sm:$0xf0] }
 0x13f   :  { %v7150_v28 = vld [vmem:[#allocation5 + $0x6a8] sm:$0xf0]  ;;  %v6516_v26 = vld [vmem:[#allocation5 + $0x190] sm:$0xf] }
 0x140   :  { %v9715_v29 = vld [vmem:[#allocation5 + $0x88c] sm:$0xf]  ;;  %v7153_v39 = vor.u32 %v9651_v27, %v7150_v28  ;;  %3253 = vmatpush.bf16.msra.mxu3 %v7953_v12  ;;  %v9496_v27 = vld [vmem:[#allocation5 + $0x1ac] sm:$0xf0] }
 0x141   :  { %v7406_v31 = vld [vmem:[#allocation5 + $0x8a8] sm:$0xf0]  ;;  %v6772_v28 = vld [vmem:[#allocation5 + $0x390] sm:$0xf] }
 0x142   :  { %v9779_v32 = vld [vmem:[#allocation5 + $0xa8c] sm:$0xf]  ;;  %v7409_v44 = vor.u32 %v9715_v29, %v7406_v31  ;;  %3215 = vmatpush.bf16.msra.mxu0 %v7153_v39  ;;  %v7317_v29 = vor.u32 %v9696_v17, %v7316_v16  ;;  %v7028_v12 = vld [vmem:[#allocation5 + $0x590] sm:$0xf]  ;;  %v6773_v39 = vor.u32 %v9560_v30, %v6772_v28  ;;  %v3037_v28 = vpop.f32.mrf.mxu2 }
 0x143   :  { %v7662_v33 = vld [vmem:[#allocation5 + $0xaa8] sm:$0xf0]  ;;  %v9624_v31 = vld [vmem:[#allocation5 + $0x5ac] sm:$0xf0] }
 0x144   :  { %v9843_v35 = vld [vmem:[#allocation5 + $0xc8c] sm:$0xf]  ;;  %v7665_v45 = vor.u32 %v9779_v32, %v7662_v33  ;;  %3228 = vmatpush.bf16.msra.mxu1 %v7409_v44  ;;  %v7284_v32 = vld [vmem:[#allocation5 + $0x790] sm:$0xf]  ;;  %v7029_v42 = vor.u32 %v9624_v31, %v7028_v12 }
 0x145   :  { %v7918_v36 = vld [vmem:[#allocation5 + $0xca8] sm:$0xf0]  ;;  %v9688_v33 = vld [vmem:[#allocation5 + $0x7ac] sm:$0xf0] }
 0x146   :  { %v9643_v46 = vld [vmem:[#allocation5 + $0x64c] sm:$0xf]  ;;  %v7921_v49 = vor.u32 %v9843_v35, %v7918_v36  ;;  %3241 = vmatpush.bf16.msra.mxu2 %v7665_v45  ;;  %v6517_v35 = vor.u32 %v9496_v27, %v6516_v26  ;;  %v6484_v36 = vld [vmem:[#allocation5 + $0x150] sm:$0xf]  ;;  %v618_v45 = vperm.slane %v10653_v15, 1 }
 0x147   :  { %v7118_v47 = vld [vmem:[#allocation5 + $0x668] sm:$0xf0]  ;;  %v6740_v44 = vld [vmem:[#allocation5 + $0x350] sm:$0xf] }
 0x148   :  { %v9707_v48 = vld [vmem:[#allocation5 + $0x84c] sm:$0xf]  ;;  %v7121_v55 = vor.u32 %v9643_v46, %v7118_v47  ;;  %3254 = vmatpush.bf16.msra.mxu3 %v7921_v49  ;;  %v7285_v46 = vor.u32 %v9688_v33, %v7284_v32  ;;  %v9552_v47 = vld [vmem:[#allocation5 + $0x36c] sm:$0xf0]  ;;  %v3050_v33 = vpop.f32.mrf.mxu3 }
 0x149   :  { %v7374_v50 = vld [vmem:[#allocation5 + $0x868] sm:$0xf0]  ;;  %v9616_v49 = vld [vmem:[#allocation5 + $0x56c] sm:$0xf0] }
 0x14a   :  { %v9771_v51 = vld [vmem:[#allocation5 + $0xa4c] sm:$0xf]  ;;  %v7377_v58 = vor.u32 %v9707_v48, %v7374_v50  ;;  %3216 = vmatpush.bf16.msra.mxu0 %v7121_v55  ;;  %v6996_v48 = vld [vmem:[#allocation5 + $0x550] sm:$0xf]  ;;  %v2999_v55 = vadd.f32 %v10665_v38, %v618_v45 }
 0x14b   :  { %v7630_v52 = vld [vmem:[#allocation5 + $0xa68] sm:$0xf0]  ;;  %v7252_v50 = vld [vmem:[#allocation5 + $0x750] sm:$0xf] }
 0x14c   :  { %v9835_v53 = vld [vmem:[#allocation5 + $0xc4c] sm:$0xf]  ;;  %v7633_v59 = vor.u32 %v9771_v51, %v7630_v52  ;;  %3229 = vmatpush.bf16.msra.mxu1 %v7377_v58  ;;  %v9680_v51 = vld [vmem:[#allocation5 + $0x76c] sm:$0xf0]  ;;  %v6485_v52 = vor.u32 %v9488_v43, %v6484_v36 }
 0x14d   :  { %v7886_v54 = vld [vmem:[#allocation5 + $0xc68] sm:$0xf0]  ;;  %v6708_v58 = vld [vmem:[#allocation5 + $0x310] sm:$0xf] }
 0x14e   :  { %v9635_v56 = vld [vmem:[#allocation5 + $0x60c] sm:$0xf]  ;;  %v7889_v0 = vor.u32 %v9835_v53, %v7886_v54  ;;  %3242 = vmatpush.bf16.msra.mxu2 %v7633_v59  ;;  %v6741_v53 = vor.u32 %v9552_v47, %v6740_v44  ;;  %v6997_v54 = vor.u32 %v9616_v49, %v6996_v48  ;;  %v7253_v59 = vor.u32 %v9680_v51, %v7252_v50  ;;  %v6676_v38 = vld [vmem:[#allocation5 + $0x2d0] sm:$0xf] }
 0x14f   :  { %v7086_v57 = vld [vmem:[#allocation5 + $0x628] sm:$0xf0]  ;;  %v6932_v11 = vld [vmem:[#allocation5 + $0x4d0] sm:$0xf] }
 0x150   :  { %v9699_v60 = vld [vmem:[#allocation5 + $0x80c] sm:$0xf]  ;;  %v7089_v8 = vor.u32 %v9635_v56, %v7086_v57  ;;  %3255 = vmatpush.bf16.msra.mxu3 %v7889_v0  ;;  %v6452_v56 = vld [vmem:[#allocation5 + $0x110] sm:$0xf] }
 0x151   :  { %v7342_v61 = vld [vmem:[#allocation5 + $0x828] sm:$0xf0]  ;;  %v9480_v57 = vld [vmem:[#allocation5 + $0x12c] sm:$0xf0] }
 0x152   :  { %v9763_v62 = vld [vmem:[#allocation5 + $0xa0c] sm:$0xf]  ;;  %v7345_v13 = vor.u32 %v9699_v60, %v7342_v61  ;;  %3217 = vmatpush.bf16.msra.mxu0 %v7089_v8  ;;  %v9544_v60 = vld [vmem:[#allocation5 + $0x32c] sm:$0xf0]  ;;  %v3024_v8 = vpop.f32.mrf.mxu1 }
 0x153   :  { %v7598_v1 = vld [vmem:[#allocation5 + $0xa28] sm:$0xf0]  ;;  %v6964_v61 = vld [vmem:[#allocation5 + $0x510] sm:$0xf] }
 0x154   :  { %v9827_v2 = vld [vmem:[#allocation5 + $0xc0c] sm:$0xf]  ;;  %v7601_v14 = vor.u32 %v9763_v62, %v7598_v1  ;;  %3230 = vmatpush.bf16.msra.mxu1 %v7345_v13  ;;  %v9608_v62 = vld [vmem:[#allocation5 + $0x52c] sm:$0xf0]  ;;  %v6453_v1 = vor.u32 %v9480_v57, %v6452_v56 }
 0x155   :  { %v7854_v3 = vld [vmem:[#allocation5 + $0xc28] sm:$0xf0]  ;;  %3218 = vmatmul.bf16.vlgmr.msra.gmra.mxu0 %v10623_v20  ;;  %v9672_v0 = vld [vmem:[#allocation5 + $0x72c] sm:$0xf0]  ;;  %v6965_v4 = vor.u32 %v9608_v62, %v6964_v61 }
 0x156   :  { %v7857_v21 = vor.u32 %v9827_v2, %v7854_v3  ;;  %3243 = vmatpush.bf16.msra.mxu2 %v7601_v14  ;;  %3262 = vmatpush.bf16.msrb.mxu0 %v6549_v23  ;;  %v3011_v2 = vpop.f32.mrf.mxu0  ;;  %v6709_v3 = vor.u32 %v9544_v60, %v6708_v58  ;;  %v7221_v9 = vor.u32 %v9672_v0, %v7220_v63  ;;  %v9600_v13 = vld [vmem:[#allocation5 + $0x4ec] sm:$0xf0]  ;;  %v3039_v0 = vpop.f32.mrf.mxu2 }
 0x157   :  { %3231 = vmatmul.bf16.vlgmr.msra.gmra.mxu1 %v10633_v40  ;;  %v3012_v7 = vadd.f32 %v3011_v2, %v2999_v55  ;;  %v7188_v14 = vld [vmem:[#allocation5 + $0x6d0] sm:$0xf]  ;;  %v6677_v23 = vor.u32 %v9536_v10, %v6676_v38  ;;  %v6454_v0 = vld [vmem:[#allocation5 + $0x130] sm:$0xf0] }
 0x158   :  { %3256 = vmatpush.bf16.msra.mxu3 %v7857_v21  ;;  %3275 = vmatpush.bf16.msrb.mxu1 %v6805_v24  ;;  %v9664_v16 = vld [vmem:[#allocation5 + $0x6ec] sm:$0xf0]  ;;  %v6421_v21 = vor.u32 %v9472_v6, %v6420_v5  ;;  %v6933_v24 = vor.u32 %v9600_v13, %v6932_v11  ;;  %v3052_v5 = vpop.f32.mrf.mxu3 }
 0x159   :  { %3244 = vmatmul.bf16.vlgmr.msra.gmra.mxu2 %v10635_v41  ;;  %v3025_v17 = vadd.f32 %v3024_v8, %v3012_v7  ;;  %v9464_v26 = vld [vmem:[#allocation5 + $0xac] sm:$0xf0] }
 0x15a   :  { %3288 = vmatpush.bf16.msrb.mxu2 %v7061_v25  ;;  %3263 = vmatpush.bf16.msrb.mxu0 %v6517_v35  ;;  %v6388_v25 = vld [vmem:[#allocation5 + $0x90] sm:$0xf]  ;;  %v3026_v49 = vpop.f32.mrf.mxu1 }
 0x15b   :  { %3257 = vmatmul.bf16.vlgmr.msra.gmra.mxu3 %v10631_v37  ;;  %v6644_v27 = vld [vmem:[#allocation5 + $0x290] sm:$0xf]  ;;  %v3038_v32 = vadd.f32 %v3037_v28, %v3025_v17  ;;  %v6550_v17 = vld [vmem:[#allocation5 + $0x1f0] sm:$0xf0] }
 0x15c   :  { %3301 = vmatpush.bf16.msrb.mxu3 %v7317_v29  ;;  %3276 = vmatpush.bf16.msrb.mxu1 %v6773_v39  ;;  %v7189_v29 = vor.u32 %v9664_v16, %v7188_v14  ;;  %v9528_v30 = vld [vmem:[#allocation5 + $0x2ac] sm:$0xf0]  ;;  %v6389_v39 = vor.u32 %v9464_v26, %v6388_v25  ;;  %v9500_v16 = vld [vmem:[#allocation5 + $0x1d4] sm:$0xf] }
 0x15d   :  { %v6900_v12 = vld [vmem:[#allocation5 + $0x490] sm:$0xf]  ;;  %v6645_v44 = vor.u32 %v9528_v30, %v6644_v27 }
 0x15e   :  { %3289 = vmatpush.bf16.msrb.mxu2 %v7029_v42  ;;  %3264 = vmatpush.bf16.msrb.mxu0 %v6485_v52  ;;  %v9592_v31 = vld [vmem:[#allocation5 + $0x4ac] sm:$0xf0]  ;;  %v10673_v42 = vadd.f32 %v3050_v33, %v3038_v32  ;;  %v3013_v43 = vpop.f32.mrf.mxu0  ;;  %v9492_v32 = vld [vmem:[#allocation5 + $0x194] sm:$0xf] }
 0x15f   :  { %v7156_v35 = vld [vmem:[#allocation5 + $0x690] sm:$0xf]  ;;  %v6901_v45 = vor.u32 %v9592_v31, %v6900_v12  ;;  %v6518_v33 = vld [vmem:[#allocation5 + $0x1b0] sm:$0xf0] }
 0x160   :  { %3302 = vmatpush.bf16.msrb.mxu3 %v7285_v46  ;;  %3277 = vmatpush.bf16.msrb.mxu1 %v6741_v53  ;;  %v9656_v36 = vld [vmem:[#allocation5 + $0x6ac] sm:$0xf0] }
 0x161   :  { %v6356_v46 = vld [vmem:[#allocation5 + $0x50] sm:$0xf]  ;;  %v7157_v50 = vor.u32 %v9656_v36, %v7156_v35 }
 0x162   :  { %3290 = vmatpush.bf16.msrb.mxu2 %v6997_v54  ;;  %3265 = vmatpush.bf16.msrb.mxu0 %v6453_v1  ;;  %v9456_v47 = vld [vmem:[#allocation5 + $0x6c] sm:$0xf0] }
 0x163   :  { %v6612_v48 = vld [vmem:[#allocation5 + $0x250] sm:$0xf]  ;;  %v6357_v56 = vor.u32 %v9456_v47, %v6356_v46  ;;  %v6521_v46 = vor.u32 %v9492_v32, %v6518_v33  ;;  %v6390_v32 = vld [vmem:[#allocation5 + $0xb0] sm:$0xf0] }
 0x164   :  { %3303 = vmatpush.bf16.msrb.mxu3 %v7253_v59  ;;  %3278 = vmatpush.bf16.msrb.mxu1 %v6709_v3  ;;  %v9520_v51 = vld [vmem:[#allocation5 + $0x26c] sm:$0xf0] }
 0x165   :  { %v6868_v52 = vld [vmem:[#allocation5 + $0x450] sm:$0xf]  ;;  %v6613_v59 = vor.u32 %v9520_v51, %v6612_v48  ;;  %v6486_v51 = vld [vmem:[#allocation5 + $0x170] sm:$0xf0] }
 0x166   :  { %3291 = vmatpush.bf16.msrb.mxu2 %v6965_v4  ;;  %3266 = vmatpush.bf16.msrb.mxu0 %v6421_v21  ;;  %v9584_v53 = vld [vmem:[#allocation5 + $0x46c] sm:$0xf0] }
 0x167   :  { %v7124_v54 = vld [vmem:[#allocation5 + $0x650] sm:$0xf]  ;;  %v6869_v60 = vor.u32 %v9584_v53, %v6868_v52 }
 0x168   :  { %3304 = vmatpush.bf16.msrb.mxu3 %v7221_v9  ;;  %3279 = vmatpush.bf16.msrb.mxu1 %v6677_v23  ;;  %v9648_v55 = vld [vmem:[#allocation5 + $0x66c] sm:$0xf0] }
 0x169   :  { %v6324_v57 = vld [vmem:[#allocation5 + $0x10] sm:$0xf]  ;;  %v7125_v1 = vor.u32 %v9648_v55, %v7124_v54 }
 0x16a   :  { %3292 = vmatpush.bf16.msrb.mxu2 %v6933_v24  ;;  %3267 = vmatpush.bf16.msrb.mxu0 %v6389_v39  ;;  %v9448_v58 = vld [vmem:[#allocation5 + $0x2c] sm:$0xf0] }
 0x16b   :  { %v6580_v61 = vld [vmem:[#allocation5 + $0x210] sm:$0xf]  ;;  %v6325_v8 = vor.u32 %v9448_v58, %v6324_v57 }
 0x16c   :  { %3305 = vmatpush.bf16.msrb.mxu3 %v7189_v29  ;;  %3280 = vmatpush.bf16.msrb.mxu1 %v6645_v44  ;;  %v9512_v62 = vld [vmem:[#allocation5 + $0x22c] sm:$0xf0]  ;;  %v6553_v29 = vor.u32 %v9500_v16, %v6550_v17  ;;  %v6422_v16 = vld [vmem:[#allocation5 + $0xf0] sm:$0xf0] }
 0x16d   :  { %v6836_v63 = vld [vmem:[#allocation5 + $0x410] sm:$0xf]  ;;  %v6581_v13 = vor.u32 %v9512_v62, %v6580_v61  ;;  %v3063_v62 = vpop.f32.mrf.mxu0 }
 0x16e   :  { %3293 = vmatpush.bf16.msrb.mxu2 %v6901_v45  ;;  %v9576_v2 = vld [vmem:[#allocation5 + $0x42c] sm:$0xf0]  ;;  %3268 = vmatpush.bf16.msrb.mxu0 %v6357_v56 }
 0x16f   :  { %v7092_v3 = vld [vmem:[#allocation5 + $0x610] sm:$0xf]  ;;  %v6837_v14 = vor.u32 %v9576_v2, %v6836_v63  ;;  %v9476_v63 = vld [vmem:[#allocation5 + $0x114] sm:$0xf] }
 0x170   :  { %3306 = vmatpush.bf16.msrb.mxu3 %v7157_v50  ;;  %v9640_v4 = vld [vmem:[#allocation5 + $0x62c] sm:$0xf0]  ;;  %3281 = vmatpush.bf16.msrb.mxu1 %v6613_v59  ;;  %v9484_v50 = vld [vmem:[#allocation5 + $0x154] sm:$0xf] }
 0x171   :  { %v7572_v6 = vld [vmem:[#allocation5 + $0x9d0] sm:$0xf]  ;;  %v7093_v21 = vor.u32 %v9640_v4, %v7092_v3  ;;  %v6489_v58 = vor.u32 %v9484_v50, %v6486_v51  ;;  %v3076_v3 = vpop.f32.mrf.mxu1 }
 0x172   :  { %v9760_v38 = vld [vmem:[#allocation5 + $0x9ec] sm:$0xf0]  ;;  %3294 = vmatpush.bf16.msrb.mxu2 %v6869_v60  ;;  %3269 = vmatpush.bf16.msrb.mxu0 %v6325_v8  ;;  %v6457_v8 = vor.u32 %v9476_v63, %v6454_v0 }
 0x173   :  { %v7828_v7 = vld [vmem:[#allocation5 + $0xbd0] sm:$0xf]  ;;  %v7573_v23 = vor.u32 %v9760_v38, %v7572_v6 }
 0x174   :  { %v9824_v9 = vld [vmem:[#allocation5 + $0xbec] sm:$0xf0]  ;;  %3307 = vmatpush.bf16.msrb.mxu3 %v7125_v1  ;;  %3282 = vmatpush.bf16.msrb.mxu1 %v6581_v13  ;;  %v3064_v1 = vadd.f32 %v3063_v62, %v10673_v42  ;;  %v619_v42 = vperm.slane %v10653_v15, 2 }
 0x175   :  { %v8084_v10 = vld [vmem:[#allocation5 + $0xdd0] sm:$0xf]  ;;  %v7829_v24 = vor.u32 %v9824_v9, %v7828_v7  ;;  %3270 = vmatmul.bf16.vlgmr.msrb.gmra.mxu0 %v10621_v19  ;;  %v3065_v15 = vpop.f32.mrf.mxu0 }
 0x176   :  { %v9888_v11 = vld [vmem:[#allocation5 + $0xdec] sm:$0xf0]  ;;  %3295 = vmatpush.bf16.msrb.mxu2 %v6837_v14  ;;  %3314 = vmatpush.bf16.msra.mxu0 %v7573_v23  ;;  %v10680_v9 = vadd.f32 %v3076_v3, %v3064_v1  ;;  %v9468_v14 = vld [vmem:[#allocation5 + $0xd4] sm:$0xf] }
 0x177   :  { %v8085_v25 = vor.u32 %v9888_v11, %v8084_v10  ;;  %v7540_v26 = vld [vmem:[#allocation5 + $0x990] sm:$0xf]  ;;  %3283 = vmatmul.bf16.vlgmr.msrb.gmra.mxu1 %v10625_v22  ;;  %v9444_v1 = vld [vmem:[#allocation5 + $0x14] sm:$0xf] }
 0x178   :  { %v9752_v27 = vld [vmem:[#allocation5 + $0x9ac] sm:$0xf0]  ;;  %3308 = vmatpush.bf16.msrb.mxu3 %v7093_v21  ;;  %3327 = vmatpush.bf16.msra.mxu1 %v7829_v24  ;;  %10247 = vtanh.f32 %v10680_v9 }
 0x179   :  { %v7796_v28 = vld [vmem:[#allocation5 + $0xb90] sm:$0xf]  ;;  %v7541_v35 = vor.u32 %v9752_v27, %v7540_v26  ;;  %3296 = vmatmul.bf16.vlgmr.msrb.gmra.mxu2 %v10619_v18  ;;  %v6425_v27 = vor.u32 %v9468_v14, %v6422_v16  ;;  %v9756_v16 = vld [vmem:[#allocation5 + $0x9d4] sm:$0xf] }
 0x17a   :  { %v9816_v30 = vld [vmem:[#allocation5 + $0xbac] sm:$0xf0]  ;;  %3340 = vmatpush.bf16.msra.mxu2 %v8085_v25 }
 0x17b   :  { %v8052_v12 = vld [vmem:[#allocation5 + $0xd90] sm:$0xf]  ;;  %v7797_v36 = vor.u32 %v9816_v30, %v7796_v28  ;;  %3309 = vmatmul.bf16.vlgmr.msrb.gmra.mxu3 %v10623_v20  ;;  %3315 = vmatpush.bf16.msra.mxu0 %v7541_v35  ;;  %v3102_v35 = vpop.f32.mrf.mxu3 }
 0x17c   :  { %v9880_v31 = vld [vmem:[#allocation5 + $0xdac] sm:$0xf0]  ;;  %3353 = vmatpush.bf16.msra.mxu3 %v6553_v29 }
 0x17d   :  { %v8053_v39 = vor.u32 %v9880_v31, %v8052_v12  ;;  %v7508_v43 = vld [vmem:[#allocation5 + $0x950] sm:$0xf]  ;;  %3328 = vmatpush.bf16.msra.mxu1 %v7797_v36  ;;  %v3089_v12 = vpop.f32.mrf.mxu2  ;;  %v9460_v31 = vld [vmem:[#allocation5 + $0x94] sm:$0xf] }
 0x17e   :  { %v9744_v44 = vld [vmem:[#allocation5 + $0x96c] sm:$0xf0]  ;;  %v3090_v33 = vadd.f32 %v3089_v12, %v619_v42  ;;  %v7574_v42 = vld [vmem:[#allocation5 + $0x9f0] sm:$0xf0] }
 0x17f   :  { %v7764_v45 = vld [vmem:[#allocation5 + $0xb50] sm:$0xf]  ;;  %v7509_v52 = vor.u32 %v9744_v44, %v7508_v43  ;;  %3341 = vmatpush.bf16.msra.mxu2 %v8053_v39  ;;  %v3078_v39 = vpop.f32.mrf.mxu1  ;;  %v7286_v12 = vld [vmem:[#allocation5 + $0x7b0] sm:$0xf0] }
 0x180   :  { %v9808_v47 = vld [vmem:[#allocation5 + $0xb6c] sm:$0xf0]  ;;  %3354 = vmatpush.bf16.msra.mxu3 %v6521_v46  ;;  %v6742_v39 = vld [vmem:[#allocation5 + $0x370] sm:$0xf0] }
 0x181   :  { %v8020_v48 = vld [vmem:[#allocation5 + $0xd50] sm:$0xf]  ;;  %v7765_v53 = vor.u32 %v9808_v47, %v7764_v45  ;;  %3316 = vmatpush.bf16.msra.mxu0 %v7509_v52 }
 0x182   :  { %v9872_v49 = vld [vmem:[#allocation5 + $0xd6c] sm:$0xf0] }
 0x183   :  { %v8021_v54 = vor.u32 %v9872_v49, %v8020_v48  ;;  %v7476_v55 = vld [vmem:[#allocation5 + $0x910] sm:$0xf]  ;;  %3329 = vmatpush.bf16.msra.mxu1 %v7765_v53  ;;  %v10683_v48 = vadd.f32 %v3102_v35, %v3090_v33  ;;  %v6393_v49 = vor.u32 %v9460_v31, %v6390_v32  ;;  %v9452_v53 = vld [vmem:[#allocation5 + $0x54] sm:$0xf] }
 0x184   :  { %v9736_v56 = vld [vmem:[#allocation5 + $0x92c] sm:$0xf0]  ;;  %3355 = vmatpush.bf16.msra.mxu3 %v6489_v58  ;;  %v9748_v31 = vld [vmem:[#allocation5 + $0x994] sm:$0xf] }
 0x185   :  { %v7732_v57 = vld [vmem:[#allocation5 + $0xb10] sm:$0xf]  ;;  %v7477_v2 = vor.u32 %v9736_v56, %v7476_v55  ;;  %3342 = vmatpush.bf16.msra.mxu2 %v8021_v54  ;;  %v6358_v54 = vld [vmem:[#allocation5 + $0x70] sm:$0xf0]  ;;  %v3091_v3 = vpop.f32.mrf.mxu2 }
 0x186   :  { %v9800_v59 = vld [vmem:[#allocation5 + $0xb2c] sm:$0xf0]  ;;  %v6361_v63 = vor.u32 %v9452_v53, %v6358_v54  ;;  %v7542_v32 = vld [vmem:[#allocation5 + $0x9b0] sm:$0xf0] }
 0x187   :  { %v7988_v60 = vld [vmem:[#allocation5 + $0xd10] sm:$0xf]  ;;  %v7733_v4 = vor.u32 %v9800_v59, %v7732_v57  ;;  %3317 = vmatpush.bf16.msra.mxu0 %v7477_v2  ;;  %v6326_v2 = vld [vmem:[#allocation5 + $0x30] sm:$0xf0] }
 0x188   :  { %v9864_v61 = vld [vmem:[#allocation5 + $0xd2c] sm:$0xf0]  ;;  %3356 = vmatpush.bf16.msra.mxu3 %v6457_v8  ;;  %v7062_v8 = vld [vmem:[#allocation5 + $0x5f0] sm:$0xf0] }
 0x189   :  { %v7989_v5 = vor.u32 %v9864_v61, %v7988_v60  ;;  %v7444_v6 = vld [vmem:[#allocation5 + $0x8d0] sm:$0xf]  ;;  %3330 = vmatpush.bf16.msra.mxu1 %v7733_v4  ;;  %v9564_v4 = vld [vmem:[#allocation5 + $0x3d4] sm:$0xf] }
 0x18a   :  { %v9728_v38 = vld [vmem:[#allocation5 + $0x8ec] sm:$0xf0]  ;;  %v9540_v54 = vld [vmem:[#allocation5 + $0x314] sm:$0xf] }
 0x18b   :  { %v7700_v7 = vld [vmem:[#allocation5 + $0xad0] sm:$0xf]  ;;  %v7445_v17 = vor.u32 %v9728_v38, %v7444_v6  ;;  %3343 = vmatpush.bf16.msra.mxu2 %v7989_v5  ;;  %v6806_v5 = vld [vmem:[#allocation5 + $0x3f0] sm:$0xf0]  ;;  %v3104_v38 = vpop.f32.mrf.mxu3 }
 0x18c   :  { %v9792_v10 = vld [vmem:[#allocation5 + $0xaec] sm:$0xf0]  ;;  %3357 = vmatpush.bf16.msra.mxu3 %v6425_v27  ;;  %v9628_v6 = vld [vmem:[#allocation5 + $0x5d4] sm:$0xf]  ;;  %v3128_v38 = vpop.f32.mrf.mxu1 }
 0x18d   :  { %v7956_v11 = vld [vmem:[#allocation5 + $0xcd0] sm:$0xf]  ;;  %v7701_v21 = vor.u32 %v9792_v10, %v7700_v7  ;;  %3318 = vmatpush.bf16.msra.mxu0 %v7445_v17  ;;  %v9692_v10 = vld [vmem:[#allocation5 + $0x7d4] sm:$0xf]  ;;  %v6329_v17 = vor.u32 %v9444_v1, %v6326_v2 }
 0x18e   :  { %v9856_v13 = vld [vmem:[#allocation5 + $0xcec] sm:$0xf0]  ;;  %v9620_v27 = vld [vmem:[#allocation5 + $0x594] sm:$0xf] }
 0x18f   :  { %v7957_v23 = vor.u32 %v9856_v13, %v7956_v11  ;;  %v7412_v24 = vld [vmem:[#allocation5 + $0x890] sm:$0xf]  ;;  %3331 = vmatpush.bf16.msra.mxu1 %v7701_v21  ;;  %v7318_v11 = vld [vmem:[#allocation5 + $0x7f0] sm:$0xf0]  ;;  %v6809_v21 = vor.u32 %v9564_v4, %v6806_v5 }
 0x190   :  { %v9720_v25 = vld [vmem:[#allocation5 + $0x8ac] sm:$0xf0]  ;;  %3358 = vmatpush.bf16.msra.mxu3 %v6393_v49  ;;  %v9740_v49 = vld [vmem:[#allocation5 + $0x954] sm:$0xf] }
 0x191   :  { %v7668_v26 = vld [vmem:[#allocation5 + $0xa90] sm:$0xf]  ;;  %v7413_v36 = vor.u32 %v9720_v25, %v7412_v24  ;;  %3344 = vmatpush.bf16.msra.mxu2 %v7957_v23  ;;  %v7065_v23 = vor.u32 %v9628_v6, %v7062_v8  ;;  %v7321_v24 = vor.u32 %v9692_v10, %v7318_v11  ;;  %v9556_v25 = vld [vmem:[#allocation5 + $0x394] sm:$0xf] }
 0x192   :  { %v9784_v28 = vld [vmem:[#allocation5 + $0xaac] sm:$0xf0]  ;;  %v9532_v3 = vld [vmem:[#allocation5 + $0x2d4] sm:$0xf] }
 0x193   :  { %v7924_v29 = vld [vmem:[#allocation5 + $0xc90] sm:$0xf]  ;;  %v7669_v43 = vor.u32 %v9784_v28, %v7668_v26  ;;  %3319 = vmatpush.bf16.msra.mxu0 %v7413_v36  ;;  %v6774_v26 = vld [vmem:[#allocation5 + $0x3b0] sm:$0xf0]  ;;  %v7577_v28 = vor.u32 %v9756_v16, %v7574_v42 }
 0x194   :  { %v9848_v30 = vld [vmem:[#allocation5 + $0xcac] sm:$0xf0]  ;;  %3359 = vmatpush.bf16.msra.mxu3 %v6361_v63  ;;  %v6777_v33 = vor.u32 %v9556_v25, %v6774_v26  ;;  %v9548_v36 = vld [vmem:[#allocation5 + $0x354] sm:$0xf]  ;;  %v3141_v26 = vpop.f32.mrf.mxu2 }
 0x195   :  { %v7925_v44 = vor.u32 %v9848_v30, %v7924_v29  ;;  %v7380_v45 = vld [vmem:[#allocation5 + $0x850] sm:$0xf]  ;;  %3332 = vmatpush.bf16.msra.mxu1 %v7669_v43  ;;  %v7030_v29 = vld [vmem:[#allocation5 + $0x5b0] sm:$0xf0] }
 0x196   :  { %v9712_v46 = vld [vmem:[#allocation5 + $0x86c] sm:$0xf0]  ;;  %v9684_v30 = vld [vmem:[#allocation5 + $0x794] sm:$0xf]  ;;  %v7033_v35 = vor.u32 %v9620_v27, %v7030_v29 }
 0x197   :  { %v7636_v47 = vld [vmem:[#allocation5 + $0xa50] sm:$0xf]  ;;  %v7381_v55 = vor.u32 %v9712_v46, %v7380_v45  ;;  %3345 = vmatpush.bf16.msra.mxu2 %v7925_v44  ;;  %v7289_v15 = vor.u32 %v9684_v30, %v7286_v12  ;;  %v9612_v43 = vld [vmem:[#allocation5 + $0x554] sm:$0xf]  ;;  %v7545_v44 = vor.u32 %v9748_v31, %v7542_v32  ;;  %v3154_v12 = vpop.f32.mrf.mxu3 }
 0x198   :  { %v9776_v50 = vld [vmem:[#allocation5 + $0xa6c] sm:$0xf0]  ;;  %3360 = vmatpush.bf16.msra.mxu3 %v6329_v17  ;;  %v6998_v45 = vld [vmem:[#allocation5 + $0x570] sm:$0xf0] }
 0x199   :  { %v7892_v51 = vld [vmem:[#allocation5 + $0xc50] sm:$0xf]  ;;  %v7637_v58 = vor.u32 %v9776_v50, %v7636_v47  ;;  %3320 = vmatpush.bf16.msra.mxu0 %v7381_v55  ;;  %v9676_v46 = vld [vmem:[#allocation5 + $0x754] sm:$0xf] }
 0x19a   :  { %v9840_v52 = vld [vmem:[#allocation5 + $0xc6c] sm:$0xf0]  ;;  %v7254_v47 = vld [vmem:[#allocation5 + $0x770] sm:$0xf0] }
 0x19b   :  { %v7348_v56 = vld [vmem:[#allocation5 + $0x810] sm:$0xf]  ;;  %v7893_v59 = vor.u32 %v9840_v52, %v7892_v51  ;;  %3333 = vmatpush.bf16.msra.mxu1 %v7637_v58  ;;  %v7510_v50 = vld [vmem:[#allocation5 + $0x970] sm:$0xf0]  ;;  %v6745_v51 = vor.u32 %v9548_v36, %v6742_v39  ;;  %3361 = vmatmul.bf16.vlgmr.msra.gmra.mxu3 %v10621_v19  ;;  %v7001_v52 = vor.u32 %v9612_v43, %v6998_v45 }
 0x19c   :  { %v9704_v57 = vld [vmem:[#allocation5 + $0x82c] sm:$0xf0]  ;;  %3405 = vmatpush.bf16.msrb.mxu3 %v7577_v28  ;;  %v7257_v53 = vor.u32 %v9676_v46, %v7254_v47  ;;  %v6710_v55 = vld [vmem:[#allocation5 + $0x330] sm:$0xf0]  ;;  %v3130_v46 = vpop.f32.mrf.mxu1 }
 0x19d   :  { %v7604_v60 = vld [vmem:[#allocation5 + $0xa10] sm:$0xf]  ;;  %v7349_v7 = vor.u32 %v9704_v57, %v7348_v56  ;;  %3346 = vmatpush.bf16.msra.mxu2 %v7893_v59  ;;  %v9604_v56 = vld [vmem:[#allocation5 + $0x514] sm:$0xf]  ;;  %v7513_v57 = vor.u32 %v9740_v49, %v7510_v50  ;;  %v6713_v63 = vor.u32 %v9540_v54, %v6710_v55  ;;  %v9489_v46 = vld [vmem:[#allocation5 + $0x174] sm:$0xf0] }
 0x19e   :  { %v9768_v61 = vld [vmem:[#allocation5 + $0xa2c] sm:$0xf0]  ;;  %v6966_v58 = vld [vmem:[#allocation5 + $0x530] sm:$0xf0] }
 0x19f   :  { %v7860_v62 = vld [vmem:[#allocation5 + $0xc10] sm:$0xf]  ;;  %v7605_v13 = vor.u32 %v9768_v61, %v7604_v60  ;;  %3321 = vmatpush.bf16.msra.mxu0 %v7349_v7  ;;  %v9668_v59 = vld [vmem:[#allocation5 + $0x714] sm:$0xf]  ;;  %v6969_v1 = vor.u32 %v9604_v56, %v6966_v58 }
 0x1a0   :  { %v9832_v0 = vld [vmem:[#allocation5 + $0xc2c] sm:$0xf0]  ;;  %3406 = vmatpush.bf16.msrb.mxu3 %v7545_v44  ;;  %v7222_v60 = vld [vmem:[#allocation5 + $0x730] sm:$0xf0] }
 0x1a1   :  { %v7861_v14 = vor.u32 %v9832_v0, %v7860_v62  ;;  %3334 = vmatpush.bf16.msra.mxu1 %v7605_v13  ;;  %v9732_v61 = vld [vmem:[#allocation5 + $0x914] sm:$0xf]  ;;  %v3115_v0 = vpop.f32.mrf.mxu0  ;;  %v7225_v2 = vor.u32 %v9668_v59, %v7222_v60 }
 0x1a2   :  { %3322 = vmatmul.bf16.vlgmr.msra.gmra.mxu0 %v10633_v40  ;;  %v7478_v62 = vld [vmem:[#allocation5 + $0x930] sm:$0xf0]  ;;  %v3116_v6 = vadd.f32 %v3115_v0, %v10683_v48 }
 0x1a3   :  { %3347 = vmatpush.bf16.msra.mxu2 %v7861_v14  ;;  %3366 = vmatpush.bf16.msrb.mxu0 %v6809_v21  ;;  %v6678_v4 = vld [vmem:[#allocation5 + $0x2f0] sm:$0xf0]  ;;  %v7481_v7 = vor.u32 %v9732_v61, %v7478_v62  ;;  %v3143_v62 = vpop.f32.mrf.mxu2 }
 0x1a4   :  { %3335 = vmatmul.bf16.vlgmr.msra.gmra.mxu1 %v10635_v41  ;;  %v9596_v5 = vld [vmem:[#allocation5 + $0x4d4] sm:$0xf]  ;;  %3407 = vmatpush.bf16.msrb.mxu3 %v7513_v57  ;;  %v3129_v16 = vadd.f32 %v3128_v38, %v3116_v6  ;;  %v6681_v42 = vor.u32 %v9532_v3, %v6678_v4  ;;  %v3156_v3 = vpop.f32.mrf.mxu3  ;;  %v9545_v62 = vld [vmem:[#allocation5 + $0x334] sm:$0xf0] }
 0x1a5   :  { %3379 = vmatpush.bf16.msrb.mxu1 %v7065_v23  ;;  %v6934_v8 = vld [vmem:[#allocation5 + $0x4f0] sm:$0xf0] }
 0x1a6   :  { %3348 = vmatmul.bf16.vlgmr.msra.gmra.mxu2 %v10631_v37  ;;  %v9660_v10 = vld [vmem:[#allocation5 + $0x6d4] sm:$0xf]  ;;  %v6937_v17 = vor.u32 %v9596_v5, %v6934_v8  ;;  %v3142_v30 = vadd.f32 %v3141_v26, %v3129_v16  ;;  %v6556_v8 = vld [vmem:[#allocation5 + $0x1d8] sm:$0xf] }
 0x1a7   :  { %3392 = vmatpush.bf16.msrb.mxu2 %v7321_v24  ;;  %3367 = vmatpush.bf16.msrb.mxu0 %v6777_v33  ;;  %v7190_v11 = vld [vmem:[#allocation5 + $0x6f0] sm:$0xf0]  ;;  %v9569_v16 = vld [vmem:[#allocation5 + $0x3f4] sm:$0xf0] }
 0x1a8   :  { %v9724_v13 = vld [vmem:[#allocation5 + $0x8d4] sm:$0xf]  ;;  %v7193_v21 = vor.u32 %v9660_v10, %v7190_v11  ;;  %3408 = vmatpush.bf16.msrb.mxu3 %v7481_v7  ;;  %v9505_v10 = vld [vmem:[#allocation5 + $0x1f4] sm:$0xf0] }
 0x1a9   :  { %3380 = vmatpush.bf16.msrb.mxu1 %v7033_v35  ;;  %v7446_v14 = vld [vmem:[#allocation5 + $0x8f0] sm:$0xf0]  ;;  %v10690_v35 = vadd.f32 %v3154_v12, %v3142_v30  ;;  %v6780_v30 = vld [vmem:[#allocation5 + $0x398] sm:$0xf] }
 0x1aa   :  { %v9524_v23 = vld [vmem:[#allocation5 + $0x294] sm:$0xf]  ;;  %v7449_v48 = vor.u32 %v9724_v13, %v7446_v14  ;;  %v6812_v14 = vld [vmem:[#allocation5 + $0x3d8] sm:$0xf] }
 0x1ab   :  { %3393 = vmatpush.bf16.msrb.mxu2 %v7289_v15  ;;  %3368 = vmatpush.bf16.msrb.mxu0 %v6745_v51  ;;  %v6646_v24 = vld [vmem:[#allocation5 + $0x2b0] sm:$0xf0]  ;;  %v3117_v15 = vpop.f32.mrf.mxu0  ;;  %v9561_v12 = vld [vmem:[#allocation5 + $0x3b4] sm:$0xf0] }
 0x1ac   :  { %v9588_v25 = vld [vmem:[#allocation5 + $0x494] sm:$0xf]  ;;  %v6649_v33 = vor.u32 %v9524_v23, %v6646_v24  ;;  %3409 = vmatpush.bf16.msrb.mxu3 %v7449_v48  ;;  %v6557_v23 = vor.u32 %v9505_v10, %v6556_v8  ;;  %v6813_v48 = vor.u32 %v9569_v16, %v6812_v14  ;;  %v6684_v14 = vld [vmem:[#allocation5 + $0x2d8] sm:$0xf] }
 0x1ad   :  { %3381 = vmatpush.bf16.msrb.mxu1 %v7001_v52  ;;  %v6902_v27 = vld [vmem:[#allocation5 + $0x4b0] sm:$0xf0]  ;;  %v9537_v16 = vld [vmem:[#allocation5 + $0x2f4] sm:$0xf0] }
 0x1ae   :  { %v9652_v28 = vld [vmem:[#allocation5 + $0x694] sm:$0xf]  ;;  %v6905_v36 = vor.u32 %v9588_v25, %v6902_v27 }
 0x1af   :  { %3394 = vmatpush.bf16.msrb.mxu2 %v7257_v53  ;;  %3369 = vmatpush.bf16.msrb.mxu0 %v6713_v63  ;;  %v7158_v29 = vld [vmem:[#allocation5 + $0x6b0] sm:$0xf0] }
 0x1b0   :  { %v9716_v31 = vld [vmem:[#allocation5 + $0x894] sm:$0xf]  ;;  %v7161_v39 = vor.u32 %v9652_v28, %v7158_v29  ;;  %v6524_v28 = vld [vmem:[#allocation5 + $0x198] sm:$0xf] }
 0x1b1   :  { %3382 = vmatpush.bf16.msrb.mxu1 %v6969_v1  ;;  %v7414_v32 = vld [vmem:[#allocation5 + $0x8b0] sm:$0xf0]  ;;  %v9497_v29 = vld [vmem:[#allocation5 + $0x1b4] sm:$0xf0] }
 0x1b2   :  { %v9516_v43 = vld [vmem:[#allocation5 + $0x254] sm:$0xf]  ;;  %v7417_v47 = vor.u32 %v9716_v31, %v7414_v32 }
 0x1b3   :  { %3395 = vmatpush.bf16.msrb.mxu2 %v7225_v2  ;;  %3370 = vmatpush.bf16.msrb.mxu0 %v6681_v42  ;;  %v6614_v44 = vld [vmem:[#allocation5 + $0x270] sm:$0xf0] }
 0x1b4   :  { %v9580_v45 = vld [vmem:[#allocation5 + $0x454] sm:$0xf]  ;;  %v6617_v54 = vor.u32 %v9516_v43, %v6614_v44  ;;  %3410 = vmatpush.bf16.msrb.mxu3 %v7417_v47  ;;  %v6781_v43 = vor.u32 %v9561_v12, %v6780_v30  ;;  %v6748_v47 = vld [vmem:[#allocation5 + $0x358] sm:$0xf]  ;;  %v3206_v30 = vpop.f32.mrf.mxu3 }
 0x1b5   :  { %3383 = vmatpush.bf16.msrb.mxu1 %v6937_v17  ;;  %v6870_v49 = vld [vmem:[#allocation5 + $0x470] sm:$0xf0]  ;;  %v6652_v12 = vld [vmem:[#allocation5 + $0x298] sm:$0xf] }
 0x1b6   :  { %v9644_v50 = vld [vmem:[#allocation5 + $0x654] sm:$0xf]  ;;  %v6873_v57 = vor.u32 %v9580_v45, %v6870_v49  ;;  %v6492_v45 = vld [vmem:[#allocation5 + $0x158] sm:$0xf] }
 0x1b7   :  { %3396 = vmatpush.bf16.msrb.mxu2 %v7193_v21  ;;  %v7126_v51 = vld [vmem:[#allocation5 + $0x670] sm:$0xf0]  ;;  %3371 = vmatpush.bf16.msrb.mxu0 %v6649_v33  ;;  %v6525_v33 = vor.u32 %v9497_v29, %v6524_v28  ;;  %v9553_v49 = vld [vmem:[#allocation5 + $0x374] sm:$0xf0]  ;;  %v3193_v29 = vpop.f32.mrf.mxu2 }
 0x1b8   :  { %v9708_v52 = vld [vmem:[#allocation5 + $0x854] sm:$0xf]  ;;  %v7129_v58 = vor.u32 %v9644_v50, %v7126_v51  ;;  %v9465_v28 = vld [vmem:[#allocation5 + $0xb4] sm:$0xf0] }
 0x1b9   :  { %v7382_v53 = vld [vmem:[#allocation5 + $0x870] sm:$0xf0]  ;;  %3384 = vmatpush.bf16.msrb.mxu1 %v6905_v36 }
 0x1ba   :  { %v9508_v55 = vld [vmem:[#allocation5 + $0x214] sm:$0xf]  ;;  %v7385_v63 = vor.u32 %v9708_v52, %v7382_v53  ;;  %v6493_v52 = vor.u32 %v9489_v46, %v6492_v45 }
 0x1bb   :  { %v6582_v56 = vld [vmem:[#allocation5 + $0x230] sm:$0xf0]  ;;  %3397 = vmatpush.bf16.msrb.mxu2 %v7161_v39  ;;  %3372 = vmatpush.bf16.msrb.mxu0 %v6617_v54 }
 0x1bc   :  { %v9572_v59 = vld [vmem:[#allocation5 + $0x414] sm:$0xf]  ;;  %v6585_v38 = vor.u32 %v9508_v55, %v6582_v56  ;;  %3411 = vmatpush.bf16.msrb.mxu3 %v7385_v63  ;;  %v6749_v56 = vor.u32 %v9553_v49, %v6748_v47  ;;  %v10696_v63 = vld [vmem:[#allocation7] sm:$0xff] }
 0x1bd   :  { %v6838_v60 = vld [vmem:[#allocation5 + $0x430] sm:$0xf0]  ;;  %3385 = vmatpush.bf16.msrb.mxu1 %v6873_v57 }
 0x1be   :  { %v9636_v61 = vld [vmem:[#allocation5 + $0x614] sm:$0xf]  ;;  %v6841_v11 = vor.u32 %v9572_v59, %v6838_v60  ;;  %v9481_v59 = vld [vmem:[#allocation5 + $0x134] sm:$0xf0]  ;;  %v3167_v60 = vpop.f32.mrf.mxu0 }
 0x1bf   :  { %v7094_v0 = vld [vmem:[#allocation5 + $0x630] sm:$0xf0]  ;;  %3398 = vmatpush.bf16.msrb.mxu2 %v7129_v58  ;;  %3373 = vmatpush.bf16.msrb.mxu0 %v6585_v38  ;;  %v6460_v58 = vld [vmem:[#allocation5 + $0x118] sm:$0xf] }
 0x1c0   :  { %v9700_v1 = vld [vmem:[#allocation5 + $0x814] sm:$0xf]  ;;  %v7097_v13 = vor.u32 %v9636_v61, %v7094_v0  ;;  %v6716_v61 = vld [vmem:[#allocation5 + $0x318] sm:$0xf]  ;;  %v620_v0 = vperm.slane %v10696_v63, 3 }
 0x1c1   :  { %v7350_v2 = vld [vmem:[#allocation5 + $0x830] sm:$0xf0]  ;;  %3386 = vmatpush.bf16.msrb.mxu1 %v6841_v11  ;;  %v6717_v8 = vor.u32 %v9545_v62, %v6716_v61  ;;  %v6428_v11 = vld [vmem:[#allocation5 + $0xd8] sm:$0xf] }
 0x1c2   :  { %v9820_v4 = vld [vmem:[#allocation5 + $0xbd4] sm:$0xf]  ;;  %v7353_v42 = vor.u32 %v9700_v1, %v7350_v2  ;;  %3374 = vmatmul.bf16.vlgmr.msrb.gmra.mxu0 %v10625_v22  ;;  %v10700_v1 = vadd.f32 %v3167_v60, %v10690_v35  ;;  %v6332_v62 = vld [vmem:[#allocation5 + $0x18] sm:$0xf] }
 0x1c3   :  { %v7830_v5 = vld [vmem:[#allocation5 + $0xbf0] sm:$0xf0]  ;;  %3399 = vmatpush.bf16.msrb.mxu2 %v7097_v13  ;;  %v9473_v13 = vld [vmem:[#allocation5 + $0xf4] sm:$0xf0] }
 0x1c4   :  { %v9884_v6 = vld [vmem:[#allocation5 + $0xdd4] sm:$0xf]  ;;  %v7833_v17 = vor.u32 %v9820_v4, %v7830_v5  ;;  %3412 = vmatpush.bf16.msrb.mxu3 %v7353_v42  ;;  %3387 = vmatmul.bf16.vlgmr.msrb.gmra.mxu1 %v10619_v18  ;;  %v6461_v4 = vor.u32 %v9481_v59, %v6460_v58  ;;  %10249 = vtanh.f32 %v10700_v1 }
 0x1c5   :  { %v8086_v7 = vld [vmem:[#allocation5 + $0xdf0] sm:$0xf0] }
 0x1c6   :  { %v8089_v21 = vor.u32 %v9884_v6, %v8086_v7  ;;  %v9812_v24 = vld [vmem:[#allocation5 + $0xb94] sm:$0xf]  ;;  %3418 = vmatpush.bf16.msra.mxu0 %v7833_v17  ;;  %3400 = vmatmul.bf16.vlgmr.msrb.gmra.mxu2 %v10623_v20  ;;  %v3180_v7 = vpop.f32.mrf.mxu1 }
 0x1c7   :  { %v7798_v25 = vld [vmem:[#allocation5 + $0xbb0] sm:$0xf0]  ;;  %3444 = vmatpush.bf16.msra.mxu2 %v6557_v23  ;;  %3413 = vmatmul.bf16.vlgmr.msrb.gmra.mxu3 %v10633_v40  ;;  %v3181_v42 = vadd.f32 %v3180_v7, %v620_v0  ;;  %v9633_v7 = vld [vmem:[#allocation5 + $0x5f4] sm:$0xf0] }
 0x1c8   :  { %v9876_v26 = vld [vmem:[#allocation5 + $0xd94] sm:$0xf]  ;;  %v7801_v31 = vor.u32 %v9812_v24, %v7798_v25  ;;  %3431 = vmatpush.bf16.msra.mxu1 %v8089_v21  ;;  %3457 = vmatpush.bf16.msra.mxu3 %v6813_v48  ;;  %v6429_v21 = vor.u32 %v9473_v13, %v6428_v11  ;;  %v9697_v11 = vld [vmem:[#allocation5 + $0x7f4] sm:$0xf0] }
 0x1c9   :  { %v8054_v27 = vld [vmem:[#allocation5 + $0xdb0] sm:$0xf0]  ;;  %v7580_v13 = vld [vmem:[#allocation5 + $0x9d8] sm:$0xf] }
 0x1ca   :  { %v8057_v32 = vor.u32 %v9876_v26, %v8054_v27  ;;  %v9804_v15 = vld [vmem:[#allocation5 + $0xb54] sm:$0xf]  ;;  %3419 = vmatpush.bf16.msra.mxu0 %v7801_v31  ;;  %v6685_v26 = vor.u32 %v9537_v16, %v6684_v14  ;;  %v6396_v27 = vld [vmem:[#allocation5 + $0x98] sm:$0xf] }
 0x1cb   :  { %v7766_v36 = vld [vmem:[#allocation5 + $0xb70] sm:$0xf0]  ;;  %3445 = vmatpush.bf16.msra.mxu2 %v6525_v33  ;;  %v9529_v31 = vld [vmem:[#allocation5 + $0x2b4] sm:$0xf0]  ;;  %v3169_v33 = vpop.f32.mrf.mxu0 }
 0x1cc   :  { %v9868_v39 = vld [vmem:[#allocation5 + $0xd54] sm:$0xf]  ;;  %v7769_v50 = vor.u32 %v9804_v15, %v7766_v36  ;;  %3432 = vmatpush.bf16.msra.mxu1 %v8057_v32  ;;  %3458 = vmatpush.bf16.msra.mxu3 %v6781_v43  ;;  %v3194_v32 = vadd.f32 %v3193_v29, %v3181_v42  ;;  %v6653_v49 = vor.u32 %v9529_v31, %v6652_v12  ;;  %v9761_v14 = vld [vmem:[#allocation5 + $0x9f4] sm:$0xf0] }
 0x1cd   :  { %v8022_v44 = vld [vmem:[#allocation5 + $0xd70] sm:$0xf0]  ;;  %v9689_v29 = vld [vmem:[#allocation5 + $0x7b4] sm:$0xf0] }
 0x1ce   :  { %v8025_v51 = vor.u32 %v9868_v39, %v8022_v44  ;;  %v9796_v53 = vld [vmem:[#allocation5 + $0xb14] sm:$0xf]  ;;  %3420 = vmatpush.bf16.msra.mxu0 %v7769_v50  ;;  %v6397_v39 = vor.u32 %v9465_v28, %v6396_v27  ;;  %v10702_v46 = vadd.f32 %v3206_v30, %v3194_v32  ;;  %v3182_v47 = vpop.f32.mrf.mxu1  ;;  %v7292_v27 = vld [vmem:[#allocation5 + $0x798] sm:$0xf] }
 0x1cf   :  { %v7734_v54 = vld [vmem:[#allocation5 + $0xb30] sm:$0xf0]  ;;  %3446 = vmatpush.bf16.msra.mxu2 %v6493_v52  ;;  %v9457_v52 = vld [vmem:[#allocation5 + $0x74] sm:$0xf0] }
 0x1d0   :  { %v9860_v55 = vld [vmem:[#allocation5 + $0xd14] sm:$0xf]  ;;  %v7737_v2 = vor.u32 %v9796_v53, %v7734_v54  ;;  %3433 = vmatpush.bf16.msra.mxu1 %v8025_v51  ;;  %3459 = vmatpush.bf16.msra.mxu3 %v6749_v56  ;;  %v6364_v51 = vld [vmem:[#allocation5 + $0x58] sm:$0xf] }
 0x1d1   :  { %v7990_v57 = vld [vmem:[#allocation5 + $0xd30] sm:$0xf0]  ;;  %v6620_v53 = vld [vmem:[#allocation5 + $0x258] sm:$0xf]  ;;  %v6365_v59 = vor.u32 %v9457_v52, %v6364_v51 }
 0x1d2   :  { %v7993_v3 = vor.u32 %v9860_v55, %v7990_v57  ;;  %v9788_v5 = vld [vmem:[#allocation5 + $0xad4] sm:$0xf]  ;;  %3421 = vmatpush.bf16.msra.mxu0 %v7737_v2  ;;  %v9521_v54 = vld [vmem:[#allocation5 + $0x274] sm:$0xf0] }
 0x1d3   :  { %v7702_v6 = vld [vmem:[#allocation5 + $0xaf0] sm:$0xf0]  ;;  %3447 = vmatpush.bf16.msra.mxu2 %v6461_v4  ;;  %v6621_v0 = vor.u32 %v9521_v54, %v6620_v53  ;;  %v9449_v2 = vld [vmem:[#allocation5 + $0x34] sm:$0xf0] }
 0x1d4   :  { %v9852_v38 = vld [vmem:[#allocation5 + $0xcd4] sm:$0xf]  ;;  %v7705_v35 = vor.u32 %v9788_v5, %v7702_v6  ;;  %3434 = vmatpush.bf16.msra.mxu1 %v7993_v3  ;;  %3460 = vmatpush.bf16.msra.mxu3 %v6717_v8  ;;  %v6588_v3 = vld [vmem:[#allocation5 + $0x218] sm:$0xf]  ;;  %v3195_v5 = vpop.f32.mrf.mxu2  ;;  %v3208_v6 = vpop.f32.mrf.mxu3  ;;  %v6333_v42 = vor.u32 %v9449_v2, %v6332_v62 }
 0x1d5   :  { %v7958_v10 = vld [vmem:[#allocation5 + $0xcf0] sm:$0xf0]  ;;  %v9513_v4 = vld [vmem:[#allocation5 + $0x234] sm:$0xf0] }
 0x1d6   :  { %v7961_v17 = vor.u32 %v9852_v38, %v7958_v10  ;;  %v9780_v23 = vld [vmem:[#allocation5 + $0xa94] sm:$0xf]  ;;  %3422 = vmatpush.bf16.msra.mxu0 %v7705_v35  ;;  %v7068_v38 = vld [vmem:[#allocation5 + $0x5d8] sm:$0xf] }
 0x1d7   :  { %v7670_v24 = vld [vmem:[#allocation5 + $0xab0] sm:$0xf0]  ;;  %3448 = vmatpush.bf16.msra.mxu2 %v6429_v21  ;;  %v7324_v8 = vld [vmem:[#allocation5 + $0x7d8] sm:$0xf]  ;;  %v6589_v21 = vor.u32 %v9513_v4, %v6588_v3  ;;  %v3219_v4 = vpop.f32.mrf.mxu0 }
 0x1d8   :  { %v9844_v25 = vld [vmem:[#allocation5 + $0xc94] sm:$0xf]  ;;  %v7673_v15 = vor.u32 %v9780_v23, %v7670_v24  ;;  %3435 = vmatpush.bf16.msra.mxu1 %v7961_v17  ;;  %3461 = vmatpush.bf16.msra.mxu3 %v6685_v26  ;;  %v7836_v35 = vld [vmem:[#allocation5 + $0xbd8] sm:$0xf]  ;;  %v7069_v23 = vor.u32 %v9633_v7, %v7068_v38  ;;  %v7325_v24 = vor.u32 %v9697_v11, %v7324_v8  ;;  %v3232_v11 = vpop.f32.mrf.mxu1 }
 0x1d9   :  { %v7926_v48 = vld [vmem:[#allocation5 + $0xcb0] sm:$0xf0]  ;;  %v9825_v17 = vld [vmem:[#allocation5 + $0xbf4] sm:$0xf0] }
 0x1da   :  { %v7929_v36 = vor.u32 %v9844_v25, %v7926_v48  ;;  %v9772_v43 = vld [vmem:[#allocation5 + $0xa54] sm:$0xf]  ;;  %3423 = vmatpush.bf16.msra.mxu0 %v7673_v15  ;;  %v7581_v25 = vor.u32 %v9761_v14, %v7580_v13  ;;  %v7036_v26 = vld [vmem:[#allocation5 + $0x598] sm:$0xf]  ;;  %v7837_v28 = vor.u32 %v9825_v17, %v7836_v35  ;;  %v7293_v15 = vor.u32 %v9689_v29, %v7292_v27 }
 0x1db   :  { %v7638_v44 = vld [vmem:[#allocation5 + $0xa70] sm:$0xf0]  ;;  %3449 = vmatpush.bf16.msra.mxu2 %v6397_v39  ;;  %v9625_v48 = vld [vmem:[#allocation5 + $0x5b4] sm:$0xf0] }
 0x1dc   :  { %v9836_v45 = vld [vmem:[#allocation5 + $0xc54] sm:$0xf]  ;;  %v7641_v55 = vor.u32 %v9772_v43, %v7638_v44  ;;  %3436 = vmatpush.bf16.msra.mxu1 %v7929_v36  ;;  %3462 = vmatpush.bf16.msra.mxu3 %v6653_v49  ;;  %v7548_v30 = vld [vmem:[#allocation5 + $0x998] sm:$0xf]  ;;  %v7037_v33 = vor.u32 %v9625_v48, %v7036_v26 }
 0x1dd   :  { %v7894_v50 = vld [vmem:[#allocation5 + $0xc70] sm:$0xf0]  ;;  %v9753_v12 = vld [vmem:[#allocation5 + $0x9b4] sm:$0xf0] }
 0x1de   :  { %v9764_v56 = vld [vmem:[#allocation5 + $0xa14] sm:$0xf]  ;;  %v7897_v58 = vor.u32 %v9836_v45, %v7894_v50  ;;  %3424 = vmatpush.bf16.msra.mxu0 %v7641_v55  ;;  %v7804_v31 = vld [vmem:[#allocation5 + $0xb98] sm:$0xf]  ;;  %v7549_v36 = vor.u32 %v9753_v12, %v7548_v30 }
 0x1df   :  { %v7606_v57 = vld [vmem:[#allocation5 + $0xa30] sm:$0xf0]  ;;  %3450 = vmatpush.bf16.msra.mxu2 %v6365_v59  ;;  %v9817_v32 = vld [vmem:[#allocation5 + $0xbb4] sm:$0xf0] }
 0x1e0   :  { %v9828_v60 = vld [vmem:[#allocation5 + $0xc14] sm:$0xf]  ;;  %v7609_v10 = vor.u32 %v9764_v56, %v7606_v57  ;;  %3437 = vmatpush.bf16.msra.mxu1 %v7897_v58  ;;  %3463 = vmatpush.bf16.msra.mxu3 %v6621_v0  ;;  %v7004_v39 = vld [vmem:[#allocation5 + $0x558] sm:$0xf]  ;;  %v7805_v45 = vor.u32 %v9817_v32, %v7804_v31  ;;  %v3258_v32 = vpop.f32.mrf.mxu3 }
 0x1e1   :  { %v7862_v61 = vld [vmem:[#allocation5 + $0xc30] sm:$0xf0]  ;;  %v9617_v43 = vld [vmem:[#allocation5 + $0x574] sm:$0xf0] }
 0x1e2   :  { %v7865_v16 = vor.u32 %v9828_v60, %v7862_v61  ;;  %3425 = vmatpush.bf16.msra.mxu0 %v7609_v10  ;;  %v7260_v44 = vld [vmem:[#allocation5 + $0x758] sm:$0xf]  ;;  %v7005_v53 = vor.u32 %v9617_v43, %v7004_v39  ;;  %v3220_v10 = vadd.f32 %v3219_v4, %v10702_v46  ;;  %v3221_v43 = vpop.f32.mrf.mxu0 }
 0x1e3   :  { %3451 = vmatpush.bf16.msra.mxu2 %v6333_v42  ;;  %v9681_v47 = vld [vmem:[#allocation5 + $0x774] sm:$0xf0] }
 0x1e4   :  { %3438 = vmatpush.bf16.msra.mxu1 %v7865_v16  ;;  %3464 = vmatpush.bf16.msra.mxu3 %v6589_v21  ;;  %v7516_v49 = vld [vmem:[#allocation5 + $0x958] sm:$0xf]  ;;  %v7261_v54 = vor.u32 %v9681_v47, %v7260_v44  ;;  %v3233_v21 = vadd.f32 %v3232_v11, %v3220_v10 }
 0x1e5   :  { %3426 = vmatmul.bf16.vlgmr.msra.gmra.mxu0 %v10635_v41  ;;  %v9745_v50 = vld [vmem:[#allocation5 + $0x974] sm:$0xf0] }
 0x1e6   :  { %3470 = vmatpush.bf16.msrb.mxu0 %v7069_v23  ;;  %v7772_v51 = vld [vmem:[#allocation5 + $0xb58] sm:$0xf]  ;;  %3452 = vmatmul.bf16.vlgmr.msra.gmra.mxu2 %v10621_v19  ;;  %v7517_v55 = vor.u32 %v9745_v50, %v7516_v49 }
 0x1e7   :  { %3496 = vmatpush.bf16.msrb.mxu2 %v7581_v25  ;;  %3439 = vmatmul.bf16.vlgmr.msra.gmra.mxu1 %v10631_v37  ;;  %v9809_v52 = vld [vmem:[#allocation5 + $0xb74] sm:$0xf0] }
 0x1e8   :  { %3483 = vmatpush.bf16.msrb.mxu1 %v7325_v24  ;;  %3509 = vmatpush.bf16.msrb.mxu3 %v7837_v28  ;;  %v6972_v56 = vld [vmem:[#allocation5 + $0x518] sm:$0xf]  ;;  %v7773_v59 = vor.u32 %v9809_v52, %v7772_v51  ;;  %v3245_v28 = vpop.f32.mrf.mxu2  ;;  %v3234_v51 = vpop.f32.mrf.mxu1 }
 0x1e9   :  { %3465 = vmatmul.bf16.vlgmr.msra.gmra.mxu3 %v10625_v22  ;;  %v9609_v57 = vld [vmem:[#allocation5 + $0x534] sm:$0xf0]  ;;  %v3246_v31 = vadd.f32 %v3245_v28, %v3233_v21  ;;  %v6494_v51 = vld [vmem:[#allocation5 + $0x178] sm:$0xf0] }
 0x1ea   :  { %3471 = vmatpush.bf16.msrb.mxu0 %v7037_v33  ;;  %v7228_v58 = vld [vmem:[#allocation5 + $0x718] sm:$0xf]  ;;  %v6973_v3 = vor.u32 %v9609_v57, %v6972_v56 }
 0x1eb   :  { %3497 = vmatpush.bf16.msrb.mxu2 %v7549_v36  ;;  %v9673_v60 = vld [vmem:[#allocation5 + $0x734] sm:$0xf0]  ;;  %v10709_v39 = vadd.f32 %v3258_v32, %v3246_v31  ;;  %v9557_v31 = vld [vmem:[#allocation5 + $0x39c] sm:$0xf] }
 0x1ec   :  { %3484 = vmatpush.bf16.msrb.mxu1 %v7293_v15  ;;  %3510 = vmatpush.bf16.msrb.mxu3 %v7805_v45  ;;  %v7484_v61 = vld [vmem:[#allocation5 + $0x918] sm:$0xf]  ;;  %v7229_v5 = vor.u32 %v9673_v60, %v7228_v58  ;;  %v6782_v32 = vld [vmem:[#allocation5 + $0x3b8] sm:$0xf0] }
 0x1ed   :  { %v9737_v62 = vld [vmem:[#allocation5 + $0x934] sm:$0xf0]  ;;  %10251 = vtanh.f32 %v10709_v39 }
 0x1ee   :  { %v7740_v0 = vld [vmem:[#allocation5 + $0xb18] sm:$0xf]  ;;  %3472 = vmatpush.bf16.msrb.mxu0 %v7005_v53  ;;  %v7485_v6 = vor.u32 %v9737_v62, %v7484_v61 }
 0x1ef   :  { %v9801_v2 = vld [vmem:[#allocation5 + $0xb34] sm:$0xf0]  ;;  %3498 = vmatpush.bf16.msrb.mxu2 %v7517_v55 }
 0x1f0   :  { %3485 = vmatpush.bf16.msrb.mxu1 %v7261_v54  ;;  %v6940_v38 = vld [vmem:[#allocation5 + $0x4d8] sm:$0xf]  ;;  %3511 = vmatpush.bf16.msrb.mxu3 %v7773_v59  ;;  %v7741_v13 = vor.u32 %v9801_v2, %v7740_v0  ;;  %v3247_v4 = vpop.f32.mrf.mxu2 }
 0x1f1   :  { %v9601_v7 = vld [vmem:[#allocation5 + $0x4f4] sm:$0xf0]  ;;  %v6718_v4 = vld [vmem:[#allocation5 + $0x338] sm:$0xf0] }
 0x1f2   :  { %v7196_v8 = vld [vmem:[#allocation5 + $0x6d8] sm:$0xf]  ;;  %3473 = vmatpush.bf16.msrb.mxu0 %v6973_v3  ;;  %v6941_v23 = vor.u32 %v9601_v7, %v6940_v38 }
 0x1f3   :  { %v9665_v14 = vld [vmem:[#allocation5 + $0x6f4] sm:$0xf0]  ;;  %3499 = vmatpush.bf16.msrb.mxu2 %v7485_v6 }
 0x1f4   :  { %v7452_v16 = vld [vmem:[#allocation5 + $0x8d8] sm:$0xf]  ;;  %3486 = vmatpush.bf16.msrb.mxu1 %v7229_v5  ;;  %v7197_v24 = vor.u32 %v9665_v14, %v7196_v8  ;;  %3512 = vmatpush.bf16.msrb.mxu3 %v7741_v13  ;;  %v3260_v8 = vpop.f32.mrf.mxu3  ;;  %v9501_v13 = vld [vmem:[#allocation5 + $0x1dc] sm:$0xf] }
 0x1f5   :  { %v9729_v42 = vld [vmem:[#allocation5 + $0x8f4] sm:$0xf0] }
 0x1f6   :  { %v7708_v35 = vld [vmem:[#allocation5 + $0xad8] sm:$0xf]  ;;  %v7453_v25 = vor.u32 %v9729_v42, %v7452_v16  ;;  %3474 = vmatpush.bf16.msrb.mxu0 %v6941_v23  ;;  %v6558_v16 = vld [vmem:[#allocation5 + $0x1f8] sm:$0xf0] }
 0x1f7   :  { %v9793_v17 = vld [vmem:[#allocation5 + $0xaf4] sm:$0xf0]  ;;  %v9565_v42 = vld [vmem:[#allocation5 + $0x3dc] sm:$0xf] }
 0x1f8   :  { %v6908_v26 = vld [vmem:[#allocation5 + $0x498] sm:$0xf]  ;;  %v7709_v46 = vor.u32 %v9793_v17, %v7708_v35  ;;  %3487 = vmatpush.bf16.msrb.mxu1 %v7197_v24  ;;  %3500 = vmatpush.bf16.msrb.mxu2 %v7453_v25  ;;  %v6814_v35 = vld [vmem:[#allocation5 + $0x3f8] sm:$0xf0] }
 0x1f9   :  { %v9593_v48 = vld [vmem:[#allocation5 + $0x4b4] sm:$0xf0]  ;;  %v9629_v23 = vld [vmem:[#allocation5 + $0x5dc] sm:$0xf] }
 0x1fa   :  { %v7164_v27 = vld [vmem:[#allocation5 + $0x698] sm:$0xf]  ;;  %v6909_v36 = vor.u32 %v9593_v48, %v6908_v26  ;;  %3513 = vmatpush.bf16.msrb.mxu3 %v7709_v46  ;;  %v7070_v24 = vld [vmem:[#allocation5 + $0x5f8] sm:$0xf0]  ;;  %v6561_v48 = vor.u32 %v9501_v13, %v6558_v16 }
 0x1fb   :  { %v9657_v29 = vld [vmem:[#allocation5 + $0x6b4] sm:$0xf0] }
 0x1fc   :  { %v7420_v30 = vld [vmem:[#allocation5 + $0x898] sm:$0xf]  ;;  %v7165_v44 = vor.u32 %v9657_v29, %v7164_v27  ;;  %3475 = vmatpush.bf16.msrb.mxu0 %v6909_v36  ;;  %v6817_v27 = vor.u32 %v9565_v42, %v6814_v35  ;;  %v9493_v29 = vld [vmem:[#allocation5 + $0x19c] sm:$0xf]  ;;  %v3284_v42 = vpop.f32.mrf.mxu1 }
 0x1fd   :  { %v9721_v12 = vld [vmem:[#allocation5 + $0x8b4] sm:$0xf0]  ;;  %v6430_v35 = vld [vmem:[#allocation5 + $0xf8] sm:$0xf0] }
 0x1fe   :  { %v7676_v33 = vld [vmem:[#allocation5 + $0xa98] sm:$0xf]  ;;  %v7421_v45 = vor.u32 %v9721_v12, %v7420_v30  ;;  %3488 = vmatpush.bf16.msrb.mxu1 %v7165_v44  ;;  %v7073_v30 = vor.u32 %v9629_v23, %v7070_v24  ;;  %v6526_v12 = vld [vmem:[#allocation5 + $0x1b8] sm:$0xf0]  ;;  %v6785_v44 = vor.u32 %v9557_v31, %v6782_v32 }
 0x1ff   :  { %v9785_v15 = vld [vmem:[#allocation5 + $0xab4] sm:$0xf0]  ;;  %v6529_v43 = vor.u32 %v9493_v29, %v6526_v12  ;;  %v9597_v23 = vld [vmem:[#allocation5 + $0x4dc] sm:$0xf] }
 0x200   :  { %v6876_v47 = vld [vmem:[#allocation5 + $0x458] sm:$0xf]  ;;  %v7677_v52 = vor.u32 %v9785_v15, %v7676_v33  ;;  %3501 = vmatpush.bf16.msrb.mxu2 %v7421_v45  ;;  %v9621_v33 = vld [vmem:[#allocation5 + $0x59c] sm:$0xf] }
 0x201   :  { %v9585_v49 = vld [vmem:[#allocation5 + $0x474] sm:$0xf0]  ;;  %v7038_v15 = vld [vmem:[#allocation5 + $0x5b8] sm:$0xf0] }
 0x202   :  { %v7132_v50 = vld [vmem:[#allocation5 + $0x658] sm:$0xf]  ;;  %v6877_v58 = vor.u32 %v9585_v49, %v6876_v47  ;;  %3514 = vmatpush.bf16.msrb.mxu3 %v7677_v52  ;;  %v9485_v49 = vld [vmem:[#allocation5 + $0x15c] sm:$0xf] }
 0x203   :  { %v9649_v53 = vld [vmem:[#allocation5 + $0x674] sm:$0xf0]  ;;  %v9549_v52 = vld [vmem:[#allocation5 + $0x35c] sm:$0xf] }
 0x204   :  { %v7388_v54 = vld [vmem:[#allocation5 + $0x858] sm:$0xf]  ;;  %v7133_v61 = vor.u32 %v9649_v53, %v7132_v50  ;;  %3476 = vmatpush.bf16.msrb.mxu0 %v6877_v58  ;;  %v7041_v50 = vor.u32 %v9621_v33, %v7038_v15  ;;  %v6750_v53 = vld [vmem:[#allocation5 + $0x378] sm:$0xf0]  ;;  %v6497_v58 = vor.u32 %v9485_v49, %v6494_v51 }
 0x205   :  { %v9713_v55 = vld [vmem:[#allocation5 + $0x874] sm:$0xf0]  ;;  %v6942_v24 = vld [vmem:[#allocation5 + $0x4f8] sm:$0xf0] }
 0x206   :  { %v7644_v56 = vld [vmem:[#allocation5 + $0xa58] sm:$0xf]  ;;  %v7389_v62 = vor.u32 %v9713_v55, %v7388_v54  ;;  %3489 = vmatpush.bf16.msrb.mxu1 %v7133_v61  ;;  %v9613_v54 = vld [vmem:[#allocation5 + $0x55c] sm:$0xf]  ;;  %v6945_v12 = vor.u32 %v9597_v23, %v6942_v24 }
 0x207   :  { %v9777_v57 = vld [vmem:[#allocation5 + $0xa74] sm:$0xf0]  ;;  %v7006_v55 = vld [vmem:[#allocation5 + $0x578] sm:$0xf0] }
 0x208   :  { %v6844_v59 = vld [vmem:[#allocation5 + $0x418] sm:$0xf]  ;;  %v7645_v5 = vor.u32 %v9777_v57, %v7644_v56  ;;  %3502 = vmatpush.bf16.msrb.mxu2 %v7389_v62  ;;  %v9477_v61 = vld [vmem:[#allocation5 + $0x11c] sm:$0xf]  ;;  %v621_v62 = vperm.slane %v10696_v63, 4 }
 0x209   :  { %v9577_v60 = vld [vmem:[#allocation5 + $0x434] sm:$0xf0]  ;;  %v9461_v29 = vld [vmem:[#allocation5 + $0x9c] sm:$0xf] }
 0x20a   :  { %v7100_v0 = vld [vmem:[#allocation5 + $0x618] sm:$0xf]  ;;  %v6845_v14 = vor.u32 %v9577_v60, %v6844_v59  ;;  %3515 = vmatpush.bf16.msrb.mxu3 %v7645_v5  ;;  %v6753_v59 = vor.u32 %v9549_v52, %v6750_v53  ;;  %v9605_v5 = vld [vmem:[#allocation5 + $0x51c] sm:$0xf] }
 0x20b   :  { %v9641_v2 = vld [vmem:[#allocation5 + $0x634] sm:$0xf0]  ;;  %v6398_v31 = vld [vmem:[#allocation5 + $0xb8] sm:$0xf0] }
 0x20c   :  { %v7356_v3 = vld [vmem:[#allocation5 + $0x818] sm:$0xf]  ;;  %v7101_v17 = vor.u32 %v9641_v2, %v7100_v0  ;;  %3477 = vmatpush.bf16.msrb.mxu0 %v6845_v14  ;;  %v7009_v0 = vor.u32 %v9613_v54, %v7006_v55  ;;  %v6462_v2 = vld [vmem:[#allocation5 + $0x138] sm:$0xf0]  ;;  %v3286_v55 = vpop.f32.mrf.mxu1 }
 0x20d   :  { %v9705_v6 = vld [vmem:[#allocation5 + $0x834] sm:$0xf0]  ;;  %v6465_v8 = vor.u32 %v9477_v61, %v6462_v2  ;;  %v9469_v14 = vld [vmem:[#allocation5 + $0xdc] sm:$0xf] }
 0x20e   :  { %v7612_v38 = vld [vmem:[#allocation5 + $0xa18] sm:$0xf]  ;;  %v7357_v21 = vor.u32 %v9705_v6, %v7356_v3  ;;  %3490 = vmatpush.bf16.msrb.mxu1 %v7101_v17  ;;  %v9541_v3 = vld [vmem:[#allocation5 + $0x31c] sm:$0xf] }
 0x20f   :  { %v9769_v7 = vld [vmem:[#allocation5 + $0xa34] sm:$0xf0]  ;;  %3478 = vmatmul.bf16.vlgmr.msrb.gmra.mxu0 %v10619_v18  ;;  %v6974_v6 = vld [vmem:[#allocation5 + $0x538] sm:$0xf0] }
 0x210   :  { %v8092_v10 = vld [vmem:[#allocation5 + $0xdd8] sm:$0xf]  ;;  %v7613_v25 = vor.u32 %v9769_v7, %v7612_v38  ;;  %3503 = vmatpush.bf16.msrb.mxu2 %v7357_v21  ;;  %v3271_v7 = vpop.f32.mrf.mxu0  ;;  %v6977_v63 = vor.u32 %v9605_v5, %v6974_v6  ;;  %v9533_v17 = vld [vmem:[#allocation5 + $0x2dc] sm:$0xf] }
 0x211   :  { %v9889_v11 = vld [vmem:[#allocation5 + $0xdf4] sm:$0xf0]  ;;  %3491 = vmatmul.bf16.vlgmr.msrb.gmra.mxu1 %v10623_v20  ;;  %v3272_v16 = vadd.f32 %v3271_v7, %v621_v62  ;;  %v6686_v21 = vld [vmem:[#allocation5 + $0x2f8] sm:$0xf0] }
 0x212   :  { %v8093_v26 = vor.u32 %v9889_v11, %v8092_v10  ;;  %v8060_v28 = vld [vmem:[#allocation5 + $0xd98] sm:$0xf]  ;;  %3516 = vmatpush.bf16.msrb.mxu3 %v7613_v25  ;;  %3535 = vmatpush.bf16.msra.mxu1 %v6561_v48  ;;  %v6721_v10 = vor.u32 %v9541_v3, %v6718_v4  ;;  %v6433_v48 = vor.u32 %v9469_v14, %v6430_v35  ;;  %v9525_v32 = vld [vmem:[#allocation5 + $0x29c] sm:$0xf] }
 0x213   :  { %v9881_v46 = vld [vmem:[#allocation5 + $0xdb4] sm:$0xf0]  ;;  %3504 = vmatmul.bf16.vlgmr.msrb.gmra.mxu2 %v10633_v40  ;;  %v3285_v25 = vadd.f32 %v3284_v42, %v3272_v16  ;;  %v6654_v33 = vld [vmem:[#allocation5 + $0x2b8] sm:$0xf0] }
 0x214   :  { %3522 = vmatpush.bf16.msra.mxu0 %v8093_v26  ;;  %v8061_v36 = vor.u32 %v9881_v46, %v8060_v28  ;;  %3548 = vmatpush.bf16.msra.mxu2 %v6817_v27  ;;  %v8028_v45 = vld [vmem:[#allocation5 + $0xd58] sm:$0xf]  ;;  %v6689_v27 = vor.u32 %v9533_v17, %v6686_v21  ;;  %v6657_v51 = vor.u32 %v9525_v32, %v6654_v33  ;;  %v9453_v54 = vld [vmem:[#allocation5 + $0x5c] sm:$0xf] }
 0x215   :  { %v9873_v47 = vld [vmem:[#allocation5 + $0xd74] sm:$0xf0]  ;;  %3517 = vmatmul.bf16.vlgmr.msrb.gmra.mxu3 %v10635_v41  ;;  %v6878_v61 = vld [vmem:[#allocation5 + $0x478] sm:$0xf0] }
 0x216   :  { %3561 = vmatpush.bf16.msra.mxu3 %v7073_v30  ;;  %v8029_v56 = vor.u32 %v9873_v47, %v8028_v45  ;;  %v7996_v57 = vld [vmem:[#allocation5 + $0xd18] sm:$0xf]  ;;  %3536 = vmatpush.bf16.msra.mxu1 %v6529_v43  ;;  %v3297_v30 = vpop.f32.mrf.mxu2  ;;  %v9589_v43 = vld [vmem:[#allocation5 + $0x49c] sm:$0xf] }
 0x217   :  { %v9865_v60 = vld [vmem:[#allocation5 + $0xd34] sm:$0xf0]  ;;  %v3298_v15 = vadd.f32 %v3297_v30, %v3285_v25  ;;  %v9445_v5 = vld [vmem:[#allocation5 + $0x1c] sm:$0xf] }
 0x218   :  { %3523 = vmatpush.bf16.msra.mxu0 %v8061_v36  ;;  %3549 = vmatpush.bf16.msra.mxu2 %v6785_v44  ;;  %v7997_v38 = vor.u32 %v9865_v60, %v7996_v57  ;;  %v7964_v11 = vld [vmem:[#allocation5 + $0xcd8] sm:$0xf]  ;;  %v3310_v36 = vpop.f32.mrf.mxu3  ;;  %v6910_v44 = vld [vmem:[#allocation5 + $0x4b8] sm:$0xf0]  ;;  %v3273_v49 = vpop.f32.mrf.mxu0 }
 0x219   :  { %v9857_v13 = vld [vmem:[#allocation5 + $0xcf4] sm:$0xf0]  ;;  %v10716_v47 = vadd.f32 %v3310_v36, %v3298_v15  ;;  %v6366_v57 = vld [vmem:[#allocation5 + $0x78] sm:$0xf0] }
 0x21a   :  { %3562 = vmatpush.bf16.msra.mxu3 %v7041_v50  ;;  %3537 = vmatpush.bf16.msra.mxu1 %v6497_v58  ;;  %v7965_v26 = vor.u32 %v9857_v13, %v7964_v11  ;;  %v7932_v28 = vld [vmem:[#allocation5 + $0xc98] sm:$0xf]  ;;  %v6401_v50 = vor.u32 %v9461_v29, %v6398_v31  ;;  %v9517_v58 = vld [vmem:[#allocation5 + $0x25c] sm:$0xf]  ;;  %v6369_v3 = vor.u32 %v9453_v54, %v6366_v57 }
 0x21b   :  { %v9849_v46 = vld [vmem:[#allocation5 + $0xcb4] sm:$0xf0]  ;;  %v9581_v60 = vld [vmem:[#allocation5 + $0x45c] sm:$0xf] }
 0x21c   :  { %3524 = vmatpush.bf16.msra.mxu0 %v8029_v56  ;;  %3550 = vmatpush.bf16.msra.mxu2 %v6753_v59  ;;  %v7933_v45 = vor.u32 %v9849_v46, %v7932_v28  ;;  %v7900_v52 = vld [vmem:[#allocation5 + $0xc58] sm:$0xf]  ;;  %v6913_v56 = vor.u32 %v9589_v43, %v6910_v44  ;;  %v6622_v59 = vld [vmem:[#allocation5 + $0x278] sm:$0xf0] }
 0x21d   :  { %v9841_v53 = vld [vmem:[#allocation5 + $0xc74] sm:$0xf0]  ;;  %v6625_v4 = vor.u32 %v9517_v58, %v6622_v59  ;;  %v6334_v6 = vld [vmem:[#allocation5 + $0x38] sm:$0xf0] }
 0x21e   :  { %3563 = vmatpush.bf16.msra.mxu3 %v7009_v0  ;;  %3538 = vmatpush.bf16.msra.mxu1 %v6465_v8  ;;  %v7901_v62 = vor.u32 %v9841_v53, %v7900_v52  ;;  %v7868_v0 = vld [vmem:[#allocation5 + $0xc18] sm:$0xf]  ;;  %v3299_v7 = vpop.f32.mrf.mxu2  ;;  %v6881_v8 = vor.u32 %v9581_v60, %v6878_v61  ;;  %v9573_v11 = vld [vmem:[#allocation5 + $0x41c] sm:$0xf]  ;;  %v6337_v24 = vor.u32 %v9445_v5, %v6334_v6 }
 0x21f   :  { %v9833_v2 = vld [vmem:[#allocation5 + $0xc34] sm:$0xf0]  ;;  %v6846_v13 = vld [vmem:[#allocation5 + $0x438] sm:$0xf0] }
 0x220   :  { %3525 = vmatpush.bf16.msra.mxu0 %v7997_v38  ;;  %3551 = vmatpush.bf16.msra.mxu2 %v6721_v10  ;;  %v9509_v38 = vld [vmem:[#allocation5 + $0x21c] sm:$0xf]  ;;  %v3312_v14 = vpop.f32.mrf.mxu3  ;;  %v7869_v35 = vor.u32 %v9833_v2, %v7868_v0 }
 0x221   :  { %v6590_v10 = vld [vmem:[#allocation5 + $0x238] sm:$0xf0] }
 0x222   :  { %3564 = vmatpush.bf16.msra.mxu3 %v6977_v63  ;;  %3539 = vmatpush.bf16.msra.mxu1 %v6433_v48  ;;  %v9693_v16 = vld [vmem:[#allocation5 + $0x7dc] sm:$0xf]  ;;  %v6593_v25 = vor.u32 %v9509_v38, %v6590_v10  ;;  %v3336_v10 = vpop.f32.mrf.mxu1 }
 0x223   :  { %v7326_v42 = vld [vmem:[#allocation5 + $0x7f8] sm:$0xf0] }
 0x224   :  { %3526 = vmatpush.bf16.msra.mxu0 %v7965_v26  ;;  %3552 = vmatpush.bf16.msra.mxu2 %v6689_v27  ;;  %v9757_v63 = vld [vmem:[#allocation5 + $0x9dc] sm:$0xf]  ;;  %v6849_v27 = vor.u32 %v9573_v11, %v6846_v13  ;;  %v7329_v28 = vor.u32 %v9693_v16, %v7326_v42 }
 0x225   :  { %v7582_v17 = vld [vmem:[#allocation5 + $0x9f8] sm:$0xf0] }
 0x226   :  { %3565 = vmatpush.bf16.msra.mxu3 %v6945_v12  ;;  %3540 = vmatpush.bf16.msra.mxu1 %v6401_v50  ;;  %v9821_v21 = vld [vmem:[#allocation5 + $0xbdc] sm:$0xf]  ;;  %v7585_v46 = vor.u32 %v9757_v63, %v7582_v17 }
 0x227   :  { %v7838_v23 = vld [vmem:[#allocation5 + $0xbf8] sm:$0xf0] }
 0x228   :  { %3527 = vmatpush.bf16.msra.mxu0 %v7933_v45  ;;  %3553 = vmatpush.bf16.msra.mxu2 %v6657_v51  ;;  %v9885_v26 = vld [vmem:[#allocation5 + $0xddc] sm:$0xf]  ;;  %v7841_v29 = vor.u32 %v9821_v21, %v7838_v23 }
 0x229   :  { %v8094_v48 = vld [vmem:[#allocation5 + $0xdf8] sm:$0xf0] }
 0x22a   :  { %3566 = vmatpush.bf16.msra.mxu3 %v6913_v56  ;;  %3541 = vmatpush.bf16.msra.mxu1 %v6369_v3  ;;  %v9685_v30 = vld [vmem:[#allocation5 + $0x79c] sm:$0xf]  ;;  %v8097_v32 = vor.u32 %v9885_v26, %v8094_v48 }
 0x22b   :  { %v7294_v12 = vld [vmem:[#allocation5 + $0x7b8] sm:$0xf0] }
 0x22c   :  { %3528 = vmatpush.bf16.msra.mxu0 %v7901_v62  ;;  %3554 = vmatpush.bf16.msra.mxu2 %v6625_v4  ;;  %v9749_v31 = vld [vmem:[#allocation5 + $0x99c] sm:$0xf]  ;;  %v7297_v45 = vor.u32 %v9685_v30, %v7294_v12  ;;  %v3349_v30 = vpop.f32.mrf.mxu2 }
 0x22d   :  { %v7550_v33 = vld [vmem:[#allocation5 + $0x9b8] sm:$0xf0] }
 0x22e   :  { %3567 = vmatpush.bf16.msra.mxu3 %v6881_v8  ;;  %v9813_v15 = vld [vmem:[#allocation5 + $0xb9c] sm:$0xf]  ;;  %3542 = vmatpush.bf16.msra.mxu1 %v6337_v24  ;;  %v7553_v49 = vor.u32 %v9749_v31, %v7550_v33  ;;  %v3323_v8 = vpop.f32.mrf.mxu0 }
 0x22f   :  { %v7806_v36 = vld [vmem:[#allocation5 + $0xbb8] sm:$0xf0]  ;;  %v3324_v42 = vadd.f32 %v3323_v8, %v10716_v47 }
 0x230   :  { %3529 = vmatpush.bf16.msra.mxu0 %v7869_v35  ;;  %3555 = vmatpush.bf16.msra.mxu2 %v6593_v25  ;;  %v9877_v43 = vld [vmem:[#allocation5 + $0xd9c] sm:$0xf]  ;;  %v7809_v50 = vor.u32 %v9813_v15, %v7806_v36 }
 0x231   :  { %v8062_v44 = vld [vmem:[#allocation5 + $0xdb8] sm:$0xf0]  ;;  %3543 = vmatmul.bf16.vlgmr.msra.gmra.mxu1 %v10621_v19  ;;  %v3337_v25 = vadd.f32 %v3336_v10, %v3324_v42  ;;  %v8212_v10 = vld [vmem:[#allocation8 + $0xe0] sm:$0xf] }
 0x232   :  { %3568 = vmatpush.bf16.msra.mxu3 %v6849_v27  ;;  %3587 = vmatpush.bf16.msrb.mxu1 %v7585_v46  ;;  %v9677_v51 = vld [vmem:[#allocation5 + $0x75c] sm:$0xf]  ;;  %v8065_v54 = vor.u32 %v9877_v43, %v8062_v44  ;;  %v10725_v43 = vpop.f32.mrf.mxu3  ;;  %v8468_v42 = vld [vmem:[#allocation8 + $0x2e0] sm:$0xf] }
 0x233   :  { %v7262_v52 = vld [vmem:[#allocation5 + $0x778] sm:$0xf0]  ;;  %3530 = vmatmul.bf16.vlgmr.msra.gmra.mxu0 %v10631_v37  ;;  %3556 = vmatmul.bf16.vlgmr.msra.gmra.mxu2 %v10625_v22  ;;  %v10723_v33 = vadd.f32 %v3349_v30, %v3337_v25  ;;  %v9948_v30 = vld [vmem:[#allocation8 + $0x1cc] sm:$0xf0] }
 0x234   :  { %3574 = vmatpush.bf16.msrb.mxu0 %v7329_v28  ;;  %3600 = vmatpush.bf16.msrb.mxu2 %v7841_v29  ;;  %v9741_v53 = vld [vmem:[#allocation5 + $0x95c] sm:$0xf]  ;;  %v7265_v60 = vor.u32 %v9677_v51, %v7262_v52 }
 0x235   :  { %v7518_v55 = vld [vmem:[#allocation5 + $0x978] sm:$0xf0]  ;;  %3569 = vmatmul.bf16.vlgmr.msra.gmra.mxu3 %v10619_v18  ;;  %10253 = vtanh.f32 %v10723_v33 }
 0x236   :  { %3613 = vmatpush.bf16.msrb.mxu3 %v8097_v32  ;;  %v9805_v56 = vld [vmem:[#allocation5 + $0xb5c] sm:$0xf]  ;;  %3588 = vmatpush.bf16.msrb.mxu1 %v7553_v49  ;;  %v7521_v61 = vor.u32 %v9741_v53, %v7518_v55  ;;  %v3338_v49 = vpop.f32.mrf.mxu1 }
 0x237   :  { %v7774_v57 = vld [vmem:[#allocation5 + $0xb78] sm:$0xf0]  ;;  %v9912_v49 = vld [vmem:[#allocation8 + $0xac] sm:$0xf0] }
 0x238   :  { %v9869_v58 = vld [vmem:[#allocation5 + $0xd5c] sm:$0xf]  ;;  %3575 = vmatpush.bf16.msrb.mxu0 %v7297_v45  ;;  %3601 = vmatpush.bf16.msrb.mxu2 %v7809_v50  ;;  %v7777_v62 = vor.u32 %v9805_v56, %v7774_v57  ;;  %v3325_v45 = vpop.f32.mrf.mxu0 }
 0x239   :  { %v8030_v59 = vld [vmem:[#allocation5 + $0xd78] sm:$0xf0]  ;;  %v8180_v45 = vld [vmem:[#allocation8 + $0xa0] sm:$0xf] }
 0x23a   :  { %v9669_v0 = vld [vmem:[#allocation5 + $0x71c] sm:$0xf]  ;;  %3614 = vmatpush.bf16.msrb.mxu3 %v8065_v54  ;;  %v8033_v4 = vor.u32 %v9869_v58, %v8030_v59  ;;  %3589 = vmatpush.bf16.msrb.mxu1 %v7521_v61 }
 0x23b   :  { %v7230_v2 = vld [vmem:[#allocation5 + $0x738] sm:$0xf0] }
 0x23c   :  { %v9733_v3 = vld [vmem:[#allocation5 + $0x91c] sm:$0xf]  ;;  %3576 = vmatpush.bf16.msrb.mxu0 %v7265_v60  ;;  %v7233_v18 = vor.u32 %v9669_v0, %v7230_v2  ;;  %3602 = vmatpush.bf16.msrb.mxu2 %v7777_v62 }
 0x23d   :  { %v7486_v5 = vld [vmem:[#allocation5 + $0x938] sm:$0xf0] }
 0x23e   :  { %v9797_v6 = vld [vmem:[#allocation5 + $0xb1c] sm:$0xf]  ;;  %v7489_v19 = vor.u32 %v9733_v3, %v7486_v5  ;;  %3615 = vmatpush.bf16.msrb.mxu3 %v8033_v4 }
 0x23f   :  { %v7742_v22 = vld [vmem:[#allocation5 + $0xb38] sm:$0xf0] }
 0x240   :  { %v9861_v38 = vld [vmem:[#allocation5 + $0xd1c] sm:$0xf]  ;;  %v7745_v11 = vor.u32 %v9797_v6, %v7742_v22  ;;  %3577 = vmatpush.bf16.msrb.mxu0 %v7233_v18  ;;  %3590 = vmatpush.bf16.msrb.mxu1 %v7489_v19  ;;  %v3351_v22 = vpop.f32.mrf.mxu2  ;;  %v9920_v19 = vld [vmem:[#allocation8 + $0xec] sm:$0xf0] }
 0x241   :  { %v7998_v7 = vld [vmem:[#allocation5 + $0xd38] sm:$0xf0]  ;;  %v8213_v25 = vor.u32 %v9920_v19, %v8212_v10  ;;  %v8148_v22 = vld [vmem:[#allocation8 + $0x60] sm:$0xf]  ;;  %v9936_v10 = vld [vmem:[#allocation8 + $0x16c] sm:$0xf0] }
 0x242   :  { %v9661_v13 = vld [vmem:[#allocation5 + $0x6dc] sm:$0xf]  ;;  %v8001_v63 = vor.u32 %v9861_v38, %v7998_v7  ;;  %3603 = vmatpush.bf16.msrb.mxu2 %v7745_v11  ;;  %v8340_v11 = vld [vmem:[#allocation8 + $0x1e0] sm:$0xf] }
 0x243   :  { %v7198_v14 = vld [vmem:[#allocation5 + $0x6f8] sm:$0xf0]  ;;  %v8404_v19 = vld [vmem:[#allocation8 + $0x260] sm:$0xf] }
 0x244   :  { %v9725_v16 = vld [vmem:[#allocation5 + $0x8dc] sm:$0xf]  ;;  %v7201_v26 = vor.u32 %v9661_v13, %v7198_v14  ;;  %3616 = vmatpush.bf16.msrb.mxu3 %v8001_v63  ;;  %v3364_v13 = vpop.f32.mrf.mxu3  ;;  %v9984_v63 = vld [vmem:[#allocation8 + $0x2ec] sm:$0xf0] }
 0x245   :  { %v7454_v35 = vld [vmem:[#allocation5 + $0x8f8] sm:$0xf0]  ;;  %v8532_v13 = vld [vmem:[#allocation8 + $0x360] sm:$0xf] }
 0x246   :  { %v9789_v17 = vld [vmem:[#allocation5 + $0xadc] sm:$0xf]  ;;  %v7457_v48 = vor.u32 %v9725_v16, %v7454_v35  ;;  %3578 = vmatpush.bf16.msrb.mxu0 %v7201_v26  ;;  %v9952_v16 = vld [vmem:[#allocation8 + $0x1ec] sm:$0xf0] }
 0x247   :  { %v7710_v21 = vld [vmem:[#allocation5 + $0xaf8] sm:$0xf0]  ;;  %v8341_v26 = vor.u32 %v9952_v16, %v8340_v11  ;;  %v9968_v11 = vld [vmem:[#allocation8 + $0x26c] sm:$0xf0] }
 0x248   :  { %v9853_v23 = vld [vmem:[#allocation5 + $0xcdc] sm:$0xf]  ;;  %v7713_v27 = vor.u32 %v9789_v17, %v7710_v21  ;;  %3591 = vmatpush.bf16.msrb.mxu1 %v7457_v48  ;;  %v8596_v21 = vld [vmem:[#allocation8 + $0x3e0] sm:$0xf]  ;;  %v8469_v48 = vor.u32 %v9984_v63, %v8468_v42  ;;  %v8405_v63 = vor.u32 %v9968_v11, %v8404_v19  ;;  %v10112_v11 = vld [vmem:[#allocation8 + $0x6ec] sm:$0xf0] }
 0x249   :  { %v7966_v24 = vld [vmem:[#allocation5 + $0xcf8] sm:$0xf0]  ;;  %v8980_v19 = vld [vmem:[#allocation8 + $0x6e0] sm:$0xf] }
 0x24a   :  { %v9653_v28 = vld [vmem:[#allocation5 + $0x69c] sm:$0xf]  ;;  %v7969_v47 = vor.u32 %v9853_v23, %v7966_v24  ;;  %3604 = vmatpush.bf16.msrb.mxu2 %v7713_v27  ;;  %v10016_v23 = vld [vmem:[#allocation8 + $0x3ec] sm:$0xf0]  ;;  %v8196_v27 = vld [vmem:[#allocation8 + $0xc0] sm:$0xf] }
 0x24b   :  { %v7166_v46 = vld [vmem:[#allocation5 + $0x6b8] sm:$0xf0] }
 0x24c   :  { %v9717_v29 = vld [vmem:[#allocation5 + $0x89c] sm:$0xf]  ;;  %v7169_v44 = vor.u32 %v9653_v28, %v7166_v46  ;;  %3617 = vmatpush.bf16.msrb.mxu3 %v7969_v47  ;;  %v9916_v28 = vld [vmem:[#allocation8 + $0xcc] sm:$0xf0]  ;;  %v8324_v46 = vld [vmem:[#allocation8 + $0x1c0] sm:$0xf] }
 0x24d   :  { %v7422_v12 = vld [vmem:[#allocation5 + $0x8b8] sm:$0xf0]  ;;  %v8452_v47 = vld [vmem:[#allocation8 + $0x2c0] sm:$0xf] }
 0x24e   :  { %v9781_v31 = vld [vmem:[#allocation5 + $0xa9c] sm:$0xf]  ;;  %v7425_v50 = vor.u32 %v9717_v29, %v7422_v12  ;;  %3579 = vmatpush.bf16.msrb.mxu0 %v7169_v44  ;;  %v8597_v29 = vor.u32 %v10016_v23, %v8596_v21  ;;  %v9980_v12 = vld [vmem:[#allocation8 + $0x2cc] sm:$0xf0]  ;;  %v8260_v21 = vld [vmem:[#allocation8 + $0x140] sm:$0xf]  ;;  %v10735_v23 = vpop.f32.mrf.mxu2 }
 0x24f   :  { %v7678_v32 = vld [vmem:[#allocation5 + $0xab8] sm:$0xf0]  ;;  %v8453_v44 = vor.u32 %v9980_v12, %v8452_v47 }
 0x250   :  { %v9845_v15 = vld [vmem:[#allocation5 + $0xc9c] sm:$0xf]  ;;  %v7681_v51 = vor.u32 %v9781_v31, %v7678_v32  ;;  %3592 = vmatpush.bf16.msrb.mxu1 %v7425_v50  ;;  %v8580_v31 = vld [vmem:[#allocation8 + $0x3c0] sm:$0xf]  ;;  %v10012_v32 = vld [vmem:[#allocation8 + $0x3cc] sm:$0xf0] }
 0x251   :  { %v7934_v36 = vld [vmem:[#allocation5 + $0xcb8] sm:$0xf0]  ;;  %v8308_v50 = vld [vmem:[#allocation8 + $0x1a0] sm:$0xf] }
 0x252   :  { %v9645_v52 = vld [vmem:[#allocation5 + $0x65c] sm:$0xf]  ;;  %v7937_v55 = vor.u32 %v9845_v15, %v7934_v36  ;;  %3605 = vmatpush.bf16.msrb.mxu2 %v7681_v51  ;;  %v8197_v15 = vor.u32 %v9916_v28, %v8196_v27  ;;  %v8325_v36 = vor.u32 %v9948_v30, %v8324_v46  ;;  %v8581_v51 = vor.u32 %v10012_v32, %v8580_v31  ;;  %v10737_v27 = vpop.f32.mrf.mxu3  ;;  %v8516_v28 = vld [vmem:[#allocation8 + $0x340] sm:$0xf]  ;;  %v9996_v46 = vld [vmem:[#allocation8 + $0x34c] sm:$0xf0] }
 0x253   :  { %v7134_v53 = vld [vmem:[#allocation5 + $0x678] sm:$0xf0]  ;;  %v8116_v31 = vld [vmem:[#allocation8 + $0x20] sm:$0xf]  ;;  %v9896_v32 = vld [vmem:[#allocation8 + $0x2c] sm:$0xf0] }
 0x254   :  { %v9709_v54 = vld [vmem:[#allocation5 + $0x85c] sm:$0xf]  ;;  %v7137_v61 = vor.u32 %v9645_v52, %v7134_v53  ;;  %3618 = vmatpush.bf16.msrb.mxu3 %v7937_v55  ;;  %v9944_v52 = vld [vmem:[#allocation8 + $0x1ac] sm:$0xf0]  ;;  %v8436_v53 = vld [vmem:[#allocation8 + $0x2a0] sm:$0xf] }
 0x255   :  { %v7390_v56 = vld [vmem:[#allocation5 + $0x878] sm:$0xf0]  ;;  %v8564_v55 = vld [vmem:[#allocation8 + $0x3a0] sm:$0xf] }
 0x256   :  { %v9773_v57 = vld [vmem:[#allocation5 + $0xa5c] sm:$0xf]  ;;  %v7393_v2 = vor.u32 %v9709_v54, %v7390_v56  ;;  %3580 = vmatpush.bf16.msrb.mxu0 %v7137_v61  ;;  %v9976_v54 = vld [vmem:[#allocation8 + $0x2ac] sm:$0xf0]  ;;  %v8292_v61 = vld [vmem:[#allocation8 + $0x180] sm:$0xf] }
 0x257   :  { %v7646_v58 = vld [vmem:[#allocation5 + $0xa78] sm:$0xf0]  ;;  %v10008_v56 = vld [vmem:[#allocation8 + $0x3ac] sm:$0xf0] }
 0x258   :  { %v9837_v59 = vld [vmem:[#allocation5 + $0xc5c] sm:$0xf]  ;;  %v7649_v3 = vor.u32 %v9773_v57, %v7646_v58  ;;  %3593 = vmatpush.bf16.msrb.mxu1 %v7393_v2  ;;  %v8181_v57 = vor.u32 %v9912_v49, %v8180_v45  ;;  %v8309_v58 = vor.u32 %v9944_v52, %v8308_v50  ;;  %v8420_v2 = vld [vmem:[#allocation8 + $0x280] sm:$0xf]  ;;  %v9928_v45 = vld [vmem:[#allocation8 + $0x12c] sm:$0xf0] }
 0x259   :  { %v7902_v60 = vld [vmem:[#allocation5 + $0xc78] sm:$0xf0]  ;;  %v8372_v49 = vld [vmem:[#allocation8 + $0x220] sm:$0xf]  ;;  %v9960_v50 = vld [vmem:[#allocation8 + $0x22c] sm:$0xf0] }
 0x25a   :  { %v9637_v62 = vld [vmem:[#allocation5 + $0x61c] sm:$0xf]  ;;  %v7905_v38 = vor.u32 %v9837_v59, %v7902_v60  ;;  %3606 = vmatpush.bf16.msrb.mxu2 %v7649_v3  ;;  %v8437_v59 = vor.u32 %v9976_v54, %v8436_v53  ;;  %v8164_v60 = vld [vmem:[#allocation8 + $0x80] sm:$0xf]  ;;  %v9992_v52 = vld [vmem:[#allocation8 + $0x32c] sm:$0xf0] }
 0x25b   :  { %v7102_v0 = vld [vmem:[#allocation5 + $0x638] sm:$0xf0]  ;;  %v8548_v3 = vld [vmem:[#allocation8 + $0x380] sm:$0xf]  ;;  %v10741_v53 = vld [vmem:[#allocation7] sm:$0xff] }
 0x25c   :  { %v9701_v4 = vld [vmem:[#allocation5 + $0x81c] sm:$0xf]  ;;  %v7105_v14 = vor.u32 %v9637_v62, %v7102_v0  ;;  %3619 = vmatpush.bf16.msrb.mxu3 %v7905_v38  ;;  %v8565_v62 = vor.u32 %v10008_v56, %v8564_v55  ;;  %v9940_v0 = vld [vmem:[#allocation8 + $0x18c] sm:$0xf0]  ;;  %v622_v54 = vperm.slane %v10741_v53, 5  ;;  %v8117_v55 = vor.u32 %v9896_v32, %v8116_v31 }
 0x25d   :  { %v7358_v5 = vld [vmem:[#allocation5 + $0x838] sm:$0xf0]  ;;  %v9904_v38 = vld [vmem:[#allocation8 + $0x6c] sm:$0xf0]  ;;  %v8100_v56 = vld [vmem:[#allocation8] sm:$0xf] }
 0x25e   :  { %v9765_v6 = vld [vmem:[#allocation5 + $0xa1c] sm:$0xf]  ;;  %v7361_v35 = vor.u32 %v9701_v4, %v7358_v5  ;;  %3581 = vmatpush.bf16.msrb.mxu0 %v7105_v14  ;;  %v10731_v5 = vpop.f32.mrf.mxu0  ;;  %v10000_v14 = vld [vmem:[#allocation8 + $0x36c] sm:$0xf0]  ;;  %v8149_v16 = vor.u32 %v9904_v38, %v8148_v22  ;;  %v3363_v22 = vadd.f32 %v10725_v43, %v622_v54 }
 0x25f   :  { %v7614_v7 = vld [vmem:[#allocation5 + $0xa38] sm:$0xf0]  ;;  %v10072_v31 = vld [vmem:[#allocation8 + $0x5ac] sm:$0xf0] }
 0x260   :  { %v9829_v18 = vld [vmem:[#allocation5 + $0xc1c] sm:$0xf]  ;;  %v7617_v17 = vor.u32 %v9765_v6, %v7614_v7  ;;  %3594 = vmatpush.bf16.msrb.mxu1 %v7361_v35  ;;  %v8276_v7 = vld [vmem:[#allocation8 + $0x160] sm:$0xf]  ;;  %v3376_v43 = vadd.f32 %v10731_v5, %v3363_v22  ;;  %v10040_v5 = vld [vmem:[#allocation8 + $0x4ac] sm:$0xf0] }
 0x261   :  { %v7870_v8 = vld [vmem:[#allocation5 + $0xc38] sm:$0xf0]  ;;  %3582 = vmatmul.bf16.vlgmr.msrb.gmra.mxu0 %v10623_v20  ;;  %v9908_v20 = vld [vmem:[#allocation8 + $0x8c] sm:$0xf0]  ;;  %v8277_v42 = vor.u32 %v9936_v10, %v8276_v7  ;;  %v8132_v35 = vld [vmem:[#allocation8 + $0x40] sm:$0xf] }
 0x262   :  { %v7873_v24 = vor.u32 %v9829_v18, %v7870_v8  ;;  %3607 = vmatpush.bf16.msrb.mxu2 %v7617_v17  ;;  %5188 = vmatpush.bf16.msra.mxu0 %v8213_v25  ;;  %v8165_v4 = vor.u32 %v9908_v20, %v8164_v60  ;;  %v10733_v18 = vpop.f32.mrf.mxu1  ;;  %v9900_v17 = vld [vmem:[#allocation8 + $0x4c] sm:$0xf0]  ;;  %v8228_v60 = vld [vmem:[#allocation8 + $0x100] sm:$0xf]  ;;  %v3403_v20 = vpop.f32.mrf.mxu2 }
 0x263   :  { %3595 = vmatmul.bf16.vlgmr.msrb.gmra.mxu1 %v10633_v40  ;;  %v9972_v40 = vld [vmem:[#allocation8 + $0x28c] sm:$0xf0]  ;;  %v8229_v38 = vor.u32 %v9924_v34, %v8228_v60  ;;  %v3389_v32 = vadd.f32 %v10733_v18, %v3376_v43  ;;  %v8660_v20 = vld [vmem:[#allocation8 + $0x460] sm:$0xf] }
 0x264   :  { %3620 = vmatpush.bf16.msrb.mxu3 %v7873_v24  ;;  %5201 = vmatpush.bf16.msra.mxu1 %v8341_v26  ;;  %v8421_v6 = vor.u32 %v9972_v40, %v8420_v2  ;;  %v8533_v24 = vor.u32 %v10000_v14, %v8532_v13  ;;  %v9932_v25 = vld [vmem:[#allocation8 + $0x14c] sm:$0xf0]  ;;  %v8388_v26 = vld [vmem:[#allocation8 + $0x240] sm:$0xf]  ;;  %v3416_v2 = vpop.f32.mrf.mxu3 }
 0x265   :  { %3608 = vmatmul.bf16.vlgmr.msrb.gmra.mxu2 %v10635_v41  ;;  %v10004_v41 = vld [vmem:[#allocation8 + $0x38c] sm:$0xf0]  ;;  %v8261_v47 = vor.u32 %v9932_v25, %v8260_v21 }
 0x266   :  { %5214 = vmatpush.bf16.msra.mxu2 %v8469_v48  ;;  %5189 = vmatpush.bf16.msra.mxu0 %v8197_v15  ;;  %v8549_v8 = vor.u32 %v10004_v41, %v8548_v3  ;;  %v9964_v48 = vld [vmem:[#allocation8 + $0x24c] sm:$0xf0]  ;;  %v3377_v30 = vpop.f32.mrf.mxu0  ;;  %v8244_v15 = vld [vmem:[#allocation8 + $0x120] sm:$0xf] }
 0x267   :  { %3621 = vmatmul.bf16.vlgmr.msrb.gmra.mxu3 %v10631_v37  ;;  %v8293_v37 = vor.u32 %v9940_v0, %v8292_v61  ;;  %v8389_v12 = vor.u32 %v9964_v48, %v8388_v26  ;;  %v8356_v61 = vld [vmem:[#allocation8 + $0x200] sm:$0xf]  ;;  %v9988_v40 = vld [vmem:[#allocation8 + $0x30c] sm:$0xf0] }
 0x268   :  { %5227 = vmatpush.bf16.msra.mxu3 %v8597_v29  ;;  %5202 = vmatpush.bf16.msra.mxu1 %v8325_v36  ;;  %v8133_v29 = vor.u32 %v9900_v17, %v8132_v35  ;;  %v8484_v0 = vld [vmem:[#allocation8 + $0x300] sm:$0xf]  ;;  %v10048_v41 = vld [vmem:[#allocation8 + $0x4ec] sm:$0xf0] }
 0x269   :  { %v8724_v3 = vld [vmem:[#allocation8 + $0x4e0] sm:$0xf]  ;;  %v10076_v17 = vld [vmem:[#allocation8 + $0x5cc] sm:$0xf0] }
 0x26a   :  { %5215 = vmatpush.bf16.msra.mxu2 %v8453_v44  ;;  %5190 = vmatpush.bf16.msra.mxu0 %v8181_v57  ;;  %v3390_v36 = vpop.f32.mrf.mxu1  ;;  %v8517_v44 = vor.u32 %v9996_v46, %v8516_v28  ;;  %v8245_v57 = vor.u32 %v9928_v45, %v8244_v15  ;;  %v8725_v10 = vor.u32 %v10048_v41, %v8724_v3  ;;  %v8836_v35 = vld [vmem:[#allocation8 + $0x5c0] sm:$0xf]  ;;  %v10108_v46 = vld [vmem:[#allocation8 + $0x6cc] sm:$0xf0] }
 0x26b   :  { %v8964_v28 = vld [vmem:[#allocation8 + $0x6c0] sm:$0xf]  ;;  %v8837_v30 = vor.u32 %v10076_v17, %v8836_v35  ;;  %v10104_v45 = vld [vmem:[#allocation8 + $0x6ac] sm:$0xf0] }
 0x26c   :  { %5228 = vmatpush.bf16.msra.mxu3 %v8581_v51  ;;  %5203 = vmatpush.bf16.msra.mxu1 %v8309_v58  ;;  %v8500_v51 = vld [vmem:[#allocation8 + $0x320] sm:$0xf]  ;;  %v8373_v58 = vor.u32 %v9960_v50, %v8372_v49  ;;  %v8965_v15 = vor.u32 %v10108_v46, %v8964_v28  ;;  %v10068_v54 = vld [vmem:[#allocation8 + $0x58c] sm:$0xf0] }
 0x26d   :  { %v8501_v9 = vor.u32 %v9992_v52, %v8500_v51  ;;  %v8676_v50 = vld [vmem:[#allocation8 + $0x480] sm:$0xf]  ;;  %v10036_v51 = vld [vmem:[#allocation8 + $0x48c] sm:$0xf0] }
 0x26e   :  { %5216 = vmatpush.bf16.msra.mxu2 %v8437_v59  ;;  %5191 = vmatpush.bf16.msra.mxu0 %v8165_v4  ;;  %v9892_v59 = vld [vmem:[#allocation8 + $0xc] sm:$0xf0]  ;;  %v8852_v4 = vld [vmem:[#allocation8 + $0x5e0] sm:$0xf]  ;;  %v8677_v18 = vor.u32 %v10036_v51, %v8676_v50 }
 0x26f   :  { %v8101_v1 = vor.u32 %v9892_v59, %v8100_v56  ;;  %v8804_v52 = vld [vmem:[#allocation8 + $0x580] sm:$0xf]  ;;  %v3427_v56 = vpop.f32.mrf.mxu0  ;;  %v10100_v60 = vld [vmem:[#allocation8 + $0x68c] sm:$0xf0] }
 0x270   :  { %5229 = vmatpush.bf16.msra.mxu3 %v8565_v62  ;;  %5204 = vmatpush.bf16.msra.mxu1 %v8293_v37  ;;  %v9956_v62 = vld [vmem:[#allocation8 + $0x20c] sm:$0xf0]  ;;  %v8932_v59 = vld [vmem:[#allocation8 + $0x680] sm:$0xf]  ;;  %v8805_v34 = vor.u32 %v10068_v54, %v8804_v52  ;;  %v9914_v54 = vld [vmem:[#allocation8 + $0xc4] sm:$0xf] }
 0x271   :  { %v10080_v37 = vld [vmem:[#allocation8 + $0x5ec] sm:$0xf0]  ;;  %v8357_v39 = vor.u32 %v9956_v62, %v8356_v61  ;;  %v8788_v61 = vld [vmem:[#allocation8 + $0x560] sm:$0xf]  ;;  %v8933_v2 = vor.u32 %v10100_v60, %v8932_v59 }
 0x272   :  { %5217 = vmatpush.bf16.msra.mxu2 %v8421_v6  ;;  %5192 = vmatpush.bf16.msra.mxu0 %v8149_v16  ;;  %v10246_v6 = vpop.eup %10245  ;;  %v8853_v14 = vor.u32 %v10080_v37, %v8852_v4  ;;  %v8708_v16 = vld [vmem:[#allocation8 + $0x4c0] sm:$0xf]  ;;  %v10064_v62 = vld [vmem:[#allocation8 + $0x56c] sm:$0xf0] }
 0x273   :  { %v10248_v7 = vpop.eup %10247  ;;  %v10747_v21 = vpack.c.bf16 %v10246_v6, %v10246_v6  ;;  %v10096_v3 = vld [vmem:[#allocation8 + $0x66c] sm:$0xf0]  ;;  %v8644_v4 = vld [vmem:[#allocation8 + $0x440] sm:$0xf] }
 0x274   :  { %5230 = vmatpush.bf16.msra.mxu3 %v8549_v8  ;;  %5205 = vmatpush.bf16.msra.mxu1 %v8277_v42  ;;  %v8485_v8 = vor.u32 %v9988_v40, %v8484_v0  ;;  %v10250_v13 = vpop.eup %10249  ;;  %v10044_v42 = vld [vmem:[#allocation8 + $0x4cc] sm:$0xf0]  ;;  %v10750_v25 = vpack.c.bf16 %v10248_v7, %v10248_v7  ;;  %v8916_v40 = vld [vmem:[#allocation8 + $0x660] sm:$0xf] }
 0x275   :  { %v10752_v26 = vpack.c.bf16 %v10250_v13, %v10250_v13  ;;  %v8709_v48 = vor.u32 %v10044_v42, %v8708_v16  ;;  %v10028_v37 = vld [vmem:[#allocation8 + $0x44c] sm:$0xf0]  ;;  %v8772_v6 = vld [vmem:[#allocation8 + $0x540] sm:$0xf]  ;;  %v8917_v7 = vor.u32 %v10096_v3, %v8916_v40  ;;  %v9910_v40 = vld [vmem:[#allocation8 + $0xa4] sm:$0xf] }
 0x276   :  { %5218 = vmatpush.bf16.msra.mxu2 %v8405_v63  ;;  %5193 = vmatpush.bf16.msra.mxu0 %v8133_v29  ;;  %v10252_v63 = vpop.eup %10251  ;;  %v10060_v22 = vld [vmem:[#allocation8 + $0x54c] sm:$0xf0]  ;;  %v8628_v16 = vld [vmem:[#allocation8 + $0x420] sm:$0xf]  ;;  %v9978_v3 = vld [vmem:[#allocation8 + $0x2c4] sm:$0xf] }
 0x277   :  { %v10754_v29 = vpack.c.bf16 %v10252_v63, %v10252_v63  ;;  %v10024_v42 = vld [vmem:[#allocation8 + $0x42c] sm:$0xf0]  ;;  %v8756_v63 = vld [vmem:[#allocation8 + $0x520] sm:$0xf] }
 0x278   :  { %5231 = vmatpush.bf16.msra.mxu3 %v8533_v24  ;;  %5206 = vmatpush.bf16.msra.mxu1 %v8261_v47  ;;  %v8981_v24 = vor.u32 %v10112_v11, %v8980_v19  ;;  %v8692_v47 = vld [vmem:[#allocation8 + $0x4a0] sm:$0xf]  ;;  %v10092_v11 = vld [vmem:[#allocation8 + $0x64c] sm:$0xf0]  ;;  %v8629_v43 = vor.u32 %v10024_v42, %v8628_v16  ;;  %v8166_v42 = vld [vmem:[#allocation8 + $0x90] sm:$0xf0] }
 0x279   :  { %v8693_v36 = vor.u32 %v10040_v5, %v8692_v47  ;;  %v8900_v19 = vld [vmem:[#allocation8 + $0x640] sm:$0xf]  ;;  %v10056_v35 = vld [vmem:[#allocation8 + $0x52c] sm:$0xf0] }
 0x27a   :  { %5219 = vmatpush.bf16.msra.mxu2 %v8389_v12  ;;  %5194 = vmatpush.bf16.msra.mxu0 %v8117_v55  ;;  %v8820_v12 = vld [vmem:[#allocation8 + $0x5a0] sm:$0xf]  ;;  %v3402_v55 = vadd.f32 %v10735_v23, %v3389_v32  ;;  %v8901_v17 = vor.u32 %v10092_v11, %v8900_v19  ;;  %v8757_v28 = vor.u32 %v10056_v35, %v8756_v63  ;;  %v10052_v5 = vld [vmem:[#allocation8 + $0x50c] sm:$0xf0]  ;;  %v9906_v11 = vld [vmem:[#allocation8 + $0x84] sm:$0xf] }
 0x27b   :  { %v8821_v49 = vor.u32 %v10072_v31, %v8820_v12  ;;  %v8612_v46 = vld [vmem:[#allocation8 + $0x400] sm:$0xf]  ;;  %v9918_v12 = vld [vmem:[#allocation8 + $0xe4] sm:$0xf]  ;;  %v8214_v31 = vld [vmem:[#allocation8 + $0xf0] sm:$0xf0] }
 0x27c   :  { %5232 = vmatpush.bf16.msra.mxu3 %v8517_v44  ;;  %5207 = vmatpush.bf16.msra.mxu1 %v8245_v57  ;;  %v8948_v44 = vld [vmem:[#allocation8 + $0x6a0] sm:$0xf]  ;;  %v3415_v0 = vadd.f32 %v10737_v27, %v3402_v55  ;;  %v3429_v27 = vpop.f32.mrf.mxu0  ;;  %v10084_v50 = vld [vmem:[#allocation8 + $0x60c] sm:$0xf0]  ;;  %v8217_v52 = vor.u32 %v9918_v12, %v8214_v31  ;;  %v9982_v55 = vld [vmem:[#allocation8 + $0x2e4] sm:$0xf] }
 0x27d   :  { %v8949_v57 = vor.u32 %v10104_v45, %v8948_v44  ;;  %v8740_v47 = vld [vmem:[#allocation8 + $0x500] sm:$0xf]  ;;  %v10144_v60 = vld [vmem:[#allocation8 + $0x7ec] sm:$0xf0]  ;;  %v8310_v27 = vld [vmem:[#allocation8 + $0x1b0] sm:$0xf0] }
 0x27e   :  { %5220 = vmatpush.bf16.msra.mxu2 %v8373_v58  ;;  %5195 = vmatpush.bf16.msra.mxu0 %v8101_v1  ;;  %v3440_v58 = vpop.f32.mrf.mxu1  ;;  %v3428_v41 = vadd.f32 %v3427_v56, %v3415_v0  ;;  %v8789_v1 = vor.u32 %v10064_v62, %v8788_v61  ;;  %v8741_v51 = vor.u32 %v10052_v5, %v8740_v47  ;;  %v8470_v56 = vld [vmem:[#allocation8 + $0x2f0] sm:$0xf0]  ;;  %v9108_v59 = vld [vmem:[#allocation8 + $0x7e0] sm:$0xf]  ;;  %v10136_v35 = vld [vmem:[#allocation8 + $0x7ac] sm:$0xf0] }
 0x27f   :  { %v9109_v62 = vor.u32 %v10144_v60, %v9108_v59  ;;  %v8473_v0 = vor.u32 %v9982_v55, %v8470_v56  ;;  %v9076_v63 = vld [vmem:[#allocation8 + $0x7a0] sm:$0xf]  ;;  %v8422_v47 = vld [vmem:[#allocation8 + $0x290] sm:$0xf0]  ;;  %v9930_v59 = vld [vmem:[#allocation8 + $0x144] sm:$0xf] }
 0x280   :  { %5233 = vmatpush.bf16.msra.mxu3 %v8501_v9  ;;  %5208 = vmatpush.bf16.msra.mxu1 %v8229_v38  ;;  %v10032_v9 = vld [vmem:[#allocation8 + $0x46c] sm:$0xf0]  ;;  %v10763_v38 = vpop.f32.mrf.mxu2  ;;  %v3441_v13 = vadd.f32 %v3440_v58, %v3428_v41  ;;  %v8198_v58 = vld [vmem:[#allocation8 + $0xd0] sm:$0xf0] }
 0x281   :  { %5196 = vmatmul.bf16.vlgmr.msra.gmra.mxu0 %v10747_v21  ;;  %v8661_v23 = vor.u32 %v10032_v9, %v8660_v20  ;;  %v9946_v20 = vld [vmem:[#allocation8 + $0x1c4] sm:$0xf]  ;;  %v8326_v9 = vld [vmem:[#allocation8 + $0x1d0] sm:$0xf0] }
 0x282   :  { %5221 = vmatpush.bf16.msra.mxu2 %v8357_v39  ;;  %5240 = vmatpush.bf16.msrb.mxu0 %v8725_v10  ;;  %v10765_v39 = vpop.f32.mrf.mxu3  ;;  %10255 = vtanh.f32 %v3441_v13  ;;  %v8454_v41 = vld [vmem:[#allocation8 + $0x2d0] sm:$0xf0]  ;;  %v9974_v13 = vld [vmem:[#allocation8 + $0x2a4] sm:$0xf] }
 0x283   :  { %5209 = vmatmul.bf16.vlgmr.msra.gmra.mxu1 %v10750_v25  ;;  %v8150_v12 = vld [vmem:[#allocation8 + $0x70] sm:$0xf0] }
 0x284   :  { %5234 = vmatpush.bf16.msra.mxu3 %v8485_v8  ;;  %5253 = vmatpush.bf16.msrb.mxu1 %v8853_v14  ;;  %v8645_v8 = vor.u32 %v10028_v37, %v8644_v4  ;;  %v8773_v14 = vor.u32 %v10060_v22, %v8772_v6  ;;  %v8329_v4 = vor.u32 %v9946_v20, %v8326_v9  ;;  %v8182_v37 = vld [vmem:[#allocation8 + $0xb0] sm:$0xf0]  ;;  %v9092_v6 = vld [vmem:[#allocation8 + $0x7c0] sm:$0xf]  ;;  %v10140_v22 = vld [vmem:[#allocation8 + $0x7cc] sm:$0xf0] }
 0x285   :  { %5222 = vmatmul.bf16.vlgmr.msra.gmra.mxu2 %v10752_v26  ;;  %v8185_v19 = vor.u32 %v9910_v40, %v8182_v37  ;;  %v8406_v55 = vld [vmem:[#allocation8 + $0x270] sm:$0xf0] }
 0x286   :  { %5266 = vmatpush.bf16.msrb.mxu2 %v8981_v24  ;;  %5241 = vmatpush.bf16.msrb.mxu0 %v8709_v48  ;;  %v3442_v10 = vpop.f32.mrf.mxu1  ;;  %v8884_v24 = vld [vmem:[#allocation8 + $0x620] sm:$0xf]  ;;  %v10088_v48 = vld [vmem:[#allocation8 + $0x62c] sm:$0xf0]  ;;  %v8262_v60 = vld [vmem:[#allocation8 + $0x150] sm:$0xf0] }
 0x287   :  { %5235 = vmatmul.bf16.vlgmr.msra.gmra.mxu3 %v10754_v29  ;;  %v8885_v45 = vor.u32 %v10088_v48, %v8884_v24  ;;  %v8457_v10 = vor.u32 %v9978_v3, %v8454_v41  ;;  %v9077_v24 = vor.u32 %v10136_v35, %v9076_v63  ;;  %v8390_v40 = vld [vmem:[#allocation8 + $0x250] sm:$0xf0]  ;;  %v8265_v41 = vor.u32 %v9930_v59, %v8262_v60  ;;  %v9922_v35 = vld [vmem:[#allocation8 + $0x104] sm:$0xf] }
 0x288   :  { %5254 = vmatpush.bf16.msrb.mxu1 %v8837_v30  ;;  %v10020_v30 = vld [vmem:[#allocation8 + $0x40c] sm:$0xf0]  ;;  %v3455_v32 = vpop.f32.mrf.mxu2  ;;  %5279 = vmatpush.bf16.msrb.mxu3 %v9109_v62 }
 0x289   :  { %v8613_v33 = vor.u32 %v10020_v30, %v8612_v46  ;;  %v9902_v46 = vld [vmem:[#allocation8 + $0x64] sm:$0xf]  ;;  %v9060_v32 = vld [vmem:[#allocation8 + $0x780] sm:$0xf] }
 0x28a   :  { %5267 = vmatpush.bf16.msrb.mxu2 %v8965_v15  ;;  %5242 = vmatpush.bf16.msrb.mxu0 %v8693_v36  ;;  %v9950_v15 = vld [vmem:[#allocation8 + $0x1e4] sm:$0xf]  ;;  %v8342_v36 = vld [vmem:[#allocation8 + $0x1f0] sm:$0xf0]  ;;  %v3468_v44 = vpop.f32.mrf.mxu3 }
 0x28b   :  { %v9970_v30 = vld [vmem:[#allocation8 + $0x284] sm:$0xf]  ;;  %v8278_v44 = vld [vmem:[#allocation8 + $0x170] sm:$0xf0] }
 0x28c   :  { %5255 = vmatpush.bf16.msrb.mxu1 %v8821_v49  ;;  %v8868_v49 = vld [vmem:[#allocation8 + $0x600] sm:$0xf]  ;;  %v10774_v31 = vpop.f32.mrf.mxu0 }
 0x28d   :  { %v8869_v61 = vor.u32 %v10084_v50, %v8868_v49  ;;  %v623_v49 = vperm.slane %v10741_v53, 6  ;;  %v8425_v50 = vor.u32 %v9970_v30, %v8422_v47  ;;  %v10078_v47 = vld [vmem:[#allocation8 + $0x5e4] sm:$0xf] }
 0x28e   :  { %5268 = vmatpush.bf16.msrb.mxu2 %v8949_v57  ;;  %5243 = vmatpush.bf16.msrb.mxu0 %v8677_v18  ;;  %v10254_v57 = vpop.eup %10253  ;;  %v8345_v18 = vor.u32 %v9950_v15, %v8342_v36  ;;  %v10132_v15 = vld [vmem:[#allocation8 + $0x78c] sm:$0xf0]  ;;  %v9934_v36 = vld [vmem:[#allocation8 + $0x164] sm:$0xf] }
 0x28f   :  { %v8281_v56 = vor.u32 %v9934_v36, %v8278_v44  ;;  %v3454_v3 = vadd.f32 %v10763_v38, %v623_v49  ;;  %v9954_v36 = vld [vmem:[#allocation8 + $0x204] sm:$0xf] }
 0x290   :  { %5256 = vmatpush.bf16.msrb.mxu1 %v8805_v34  ;;  %v10256_v34 = vpop.eup %10255 }
 0x291   :  { %v3467_v38 = vadd.f32 %v10765_v39, %v3454_v3  ;;  %v8358_v39 = vld [vmem:[#allocation8 + $0x210] sm:$0xf0] }
 0x292   :  { %5269 = vmatpush.bf16.msrb.mxu2 %v8933_v2  ;;  %5244 = vmatpush.bf16.msrb.mxu0 %v8661_v23  ;;  %v10768_v2 = vpack.c.bf16 %v10254_v57, %v10254_v57  ;;  %v8201_v23 = vor.u32 %v9914_v54, %v8198_v58  ;;  %v9966_v54 = vld [vmem:[#allocation8 + $0x264] sm:$0xf]  ;;  %v8134_v57 = vld [vmem:[#allocation8 + $0x50] sm:$0xf0]  ;;  %v10128_v58 = vld [vmem:[#allocation8 + $0x76c] sm:$0xf0]  ;;  %v8361_v59 = vor.u32 %v9954_v36, %v8358_v39 }
 0x293   :  { %v3480_v44 = vadd.f32 %v10774_v31, %v3467_v38  ;;  %v8582_v3 = vld [vmem:[#allocation8 + $0x3d0] sm:$0xf0]  ;;  %v10110_v39 = vld [vmem:[#allocation8 + $0x6e4] sm:$0xf] }
 0x294   :  { %5257 = vmatpush.bf16.msrb.mxu1 %v8789_v1  ;;  %v10770_v1 = vpack.c.bf16 %v10256_v34, %v10256_v34  ;;  %v3481_v37 = vpop.f32.mrf.mxu0  ;;  %v8774_v36 = vld [vmem:[#allocation8 + $0x550] sm:$0xf0] }
 0x296   :  { %5270 = vmatpush.bf16.msrb.mxu2 %v8917_v7  ;;  %5245 = vmatpush.bf16.msrb.mxu0 %v8645_v8  ;;  %v9942_v7 = vld [vmem:[#allocation8 + $0x1a4] sm:$0xf]  ;;  %v9093_v8 = vor.u32 %v10140_v22, %v9092_v6  ;;  %v10779_v34 = vpop.f32.mrf.mxu2  ;;  %v9028_v6 = vld [vmem:[#allocation8 + $0x740] sm:$0xf]  ;;  %v10124_v22 = vld [vmem:[#allocation8 + $0x74c] sm:$0xf0] }
 0x297   :  { %v8313_v16 = vor.u32 %v9942_v7, %v8310_v27  ;;  %v9926_v7 = vld [vmem:[#allocation8 + $0x124] sm:$0xf]  ;;  %v8246_v27 = vld [vmem:[#allocation8 + $0x130] sm:$0xf0] }
 0x298   :  { %5258 = vmatpush.bf16.msrb.mxu1 %v8773_v14  ;;  %v8438_v14 = vld [vmem:[#allocation8 + $0x2b0] sm:$0xf0]  ;;  %5280 = vmatpush.bf16.msrb.mxu3 %v9093_v8  ;;  %v10781_v9 = vpop.f32.mrf.mxu3  ;;  %v8249_v63 = vor.u32 %v9926_v7, %v8246_v27 }
 0x299   :  { %v8441_v48 = vor.u32 %v9974_v13, %v8438_v14  ;;  %v8102_v14 = vld [vmem:[#allocation8 + $0x10] sm:$0xf0] }
 0x29a   :  { %5271 = vmatpush.bf16.msrb.mxu2 %v8901_v17  ;;  %5246 = vmatpush.bf16.msrb.mxu0 %v8629_v43  ;;  %v9938_v17 = vld [vmem:[#allocation8 + $0x184] sm:$0xf]  ;;  %v8294_v43 = vld [vmem:[#allocation8 + $0x190] sm:$0xf0] }
 0x29b   :  { %v8297_v5 = vor.u32 %v9938_v17, %v8294_v43  ;;  %v9012_v17 = vld [vmem:[#allocation8 + $0x720] sm:$0xf]  ;;  %v10120_v43 = vld [vmem:[#allocation8 + $0x72c] sm:$0xf0]  ;;  %v8678_v27 = vld [vmem:[#allocation8 + $0x490] sm:$0xf0] }
 0x29c   :  { %5259 = vmatpush.bf16.msrb.mxu1 %v8757_v28  ;;  %v8169_v28 = vor.u32 %v9906_v11, %v8166_v42  ;;  %5281 = vmatpush.bf16.msrb.mxu3 %v9077_v24  ;;  %v8374_v42 = vld [vmem:[#allocation8 + $0x230] sm:$0xf0]  ;;  %v9013_v30 = vor.u32 %v10120_v43, %v9012_v17 }
 0x29d   :  { %v8230_v24 = vld [vmem:[#allocation8 + $0x110] sm:$0xf0] }
 0x29e   :  { %5272 = vmatpush.bf16.msrb.mxu2 %v8885_v45  ;;  %5247 = vmatpush.bf16.msrb.mxu0 %v8613_v33  ;;  %v10776_v45 = vpop.f32.mrf.mxu1  ;;  %v9061_v33 = vor.u32 %v10132_v15, %v9060_v32  ;;  %v8550_v17 = vld [vmem:[#allocation8 + $0x390] sm:$0xf0] }
 0x29f   :  { %v3493_v31 = vadd.f32 %v10776_v45, %v3480_v44  ;;  %v8982_v44 = vld [vmem:[#allocation8 + $0x6f0] sm:$0xf0] }
 0x2a0   :  { %5260 = vmatpush.bf16.msrb.mxu1 %v8741_v51  ;;  %v8153_v51 = vor.u32 %v9902_v46, %v8150_v12  ;;  %5282 = vmatpush.bf16.msrb.mxu3 %v9061_v33  ;;  %v3507_v46 = vpop.f32.mrf.mxu2  ;;  %v3520_v12 = vpop.f32.mrf.mxu3  ;;  %v8233_v33 = vor.u32 %v9922_v35, %v8230_v24  ;;  %v10002_v35 = vld [vmem:[#allocation8 + $0x384] sm:$0xf] }
 0x2a1   :  { %5248 = vmatmul.bf16.vlgmr.msrb.gmra.mxu0 %v10768_v2  ;;  %v3506_v45 = vadd.f32 %v10779_v34, %v3493_v31  ;;  %v10062_v24 = vld [vmem:[#allocation8 + $0x564] sm:$0xf]  ;;  %v8553_v46 = vor.u32 %v10002_v35, %v8550_v17  ;;  %v8204_v17 = vld [vmem:[#allocation8 + $0xc8] sm:$0xf] }
 0x2a2   :  { %5292 = vmatpush.bf16.msra.mxu0 %v8217_v52  ;;  %5273 = vmatpush.bf16.msrb.mxu2 %v8869_v61  ;;  %v9898_v52 = vld [vmem:[#allocation8 + $0x44] sm:$0xf]  ;;  %v8409_v61 = vor.u32 %v9966_v54, %v8406_v55  ;;  %v10116_v55 = vld [vmem:[#allocation8 + $0x70c] sm:$0xf0] }
 0x2a3   :  { %5261 = vmatmul.bf16.vlgmr.msrb.gmra.mxu1 %v10770_v1  ;;  %v8137_v62 = vor.u32 %v9898_v52, %v8134_v57  ;;  %v8996_v52 = vld [vmem:[#allocation8 + $0x700] sm:$0xf]  ;;  %v8598_v57 = vld [vmem:[#allocation8 + $0x3f0] sm:$0xf0]  ;;  %v9998_v12 = vld [vmem:[#allocation8 + $0x364] sm:$0xf] }
 0x2a4   :  { %5305 = vmatpush.bf16.msra.mxu1 %v8345_v18  ;;  %v9044_v18 = vld [vmem:[#allocation8 + $0x760] sm:$0xf]  ;;  %v8997_v60 = vor.u32 %v10116_v55, %v8996_v52  ;;  %v10022_v52 = vld [vmem:[#allocation8 + $0x424] sm:$0xf]  ;;  %v8630_v55 = vld [vmem:[#allocation8 + $0x430] sm:$0xf0] }
 0x2a5   :  { %v9045_v20 = vor.u32 %v10128_v58, %v9044_v18  ;;  %v10074_v18 = vld [vmem:[#allocation8 + $0x5c4] sm:$0xf]  ;;  %v8838_v58 = vld [vmem:[#allocation8 + $0x5d0] sm:$0xf0] }
 0x2a6   :  { %5318 = vmatpush.bf16.msra.mxu2 %v8473_v0  ;;  %5293 = vmatpush.bf16.msra.mxu0 %v8201_v23  ;;  %v9894_v0 = vld [vmem:[#allocation8 + $0x24] sm:$0xf]  ;;  %v3494_v8 = vpop.f32.mrf.mxu1 }
 0x2a7   :  { %v9962_v23 = vld [vmem:[#allocation8 + $0x244] sm:$0xf]  ;;  %5283 = vmatpush.bf16.msrb.mxu3 %v9045_v20 }
 0x2a8   :  { %5306 = vmatpush.bf16.msra.mxu1 %v8329_v4  ;;  %v8118_v4 = vld [vmem:[#allocation8 + $0x30] sm:$0xf0]  ;;  %v8393_v11 = vor.u32 %v9962_v23, %v8390_v40  ;;  %v10010_v40 = vld [vmem:[#allocation8 + $0x3c4] sm:$0xf] }
 0x2a9   :  { %v8121_v13 = vor.u32 %v9894_v0, %v8118_v4  ;;  %v8841_v0 = vor.u32 %v10074_v18, %v8838_v58  ;;  %v8694_v23 = vld [vmem:[#allocation8 + $0x4b0] sm:$0xf0]  ;;  %v8585_v37 = vor.u32 %v10010_v40, %v8582_v3  ;;  %v10006_v8 = vld [vmem:[#allocation8 + $0x3a4] sm:$0xf]  ;;  %v8633_v40 = vor.u32 %v10022_v52, %v8630_v55  ;;  %v9945_v52 = vld [vmem:[#allocation8 + $0x1b4] sm:$0xf0] }
 0x2aa   :  { %5319 = vmatpush.bf16.msra.mxu2 %v8457_v10  ;;  %5294 = vmatpush.bf16.msra.mxu0 %v8185_v19  ;;  %v9029_v10 = vor.u32 %v10124_v22, %v9028_v6  ;;  %v9890_v19 = vld [vmem:[#allocation8 + $0x4] sm:$0xf]  ;;  %v8822_v4 = vld [vmem:[#allocation8 + $0x5b0] sm:$0xf0] }
 0x2ab   :  { %v8105_v15 = vor.u32 %v9890_v19, %v8102_v14  ;;  %v10034_v22 = vld [vmem:[#allocation8 + $0x484] sm:$0xf]  ;;  %v3519_v14 = vadd.f32 %v10781_v9, %v3506_v45  ;;  %v8518_v18 = vld [vmem:[#allocation8 + $0x350] sm:$0xf0] }
 0x2ac   :  { %5307 = vmatpush.bf16.msra.mxu1 %v8313_v16  ;;  %v9958_v16 = vld [vmem:[#allocation8 + $0x224] sm:$0xf]  ;;  %5284 = vmatpush.bf16.msrb.mxu3 %v9029_v10  ;;  %v8566_v10 = vld [vmem:[#allocation8 + $0x3b0] sm:$0xf0] }
 0x2ad   :  { %v8377_v32 = vor.u32 %v9958_v16, %v8374_v42  ;;  %v10066_v19 = vld [vmem:[#allocation8 + $0x584] sm:$0xf]  ;;  %v8681_v16 = vor.u32 %v10034_v22, %v8678_v27  ;;  %v8742_v45 = vld [vmem:[#allocation8 + $0x510] sm:$0xf0]  ;;  %v8220_v27 = vld [vmem:[#allocation8 + $0xe8] sm:$0xf] }
 0x2ae   :  { %5320 = vmatpush.bf16.msra.mxu2 %v8441_v48  ;;  %5295 = vmatpush.bf16.msra.mxu0 %v8169_v28  ;;  %v10046_v48 = vld [vmem:[#allocation8 + $0x4e4] sm:$0xf]  ;;  %v8726_v28 = vld [vmem:[#allocation8 + $0x4f0] sm:$0xf0] }
 0x2af   :  { %v8729_v49 = vor.u32 %v10046_v48, %v8726_v28  ;;  %v10030_v42 = vld [vmem:[#allocation8 + $0x464] sm:$0xf]  ;;  %v8790_v48 = vld [vmem:[#allocation8 + $0x570] sm:$0xf0]  ;;  %v10791_v28 = vpop.f32.mrf.mxu1 }
 0x2b0   :  { %5308 = vmatpush.bf16.msra.mxu1 %v8297_v5  ;;  %v8854_v5 = vld [vmem:[#allocation8 + $0x5f0] sm:$0xf0]  ;;  %5285 = vmatpush.bf16.msrb.mxu3 %v9013_v30  ;;  %v3531_v38 = vpop.f32.mrf.mxu0  ;;  %v10026_v9 = vld [vmem:[#allocation8 + $0x444] sm:$0xf] }
 0x2b1   :  { %v8857_v54 = vor.u32 %v10078_v47, %v8854_v5  ;;  %v3532_v43 = vadd.f32 %v3531_v38, %v3519_v14  ;;  %v8793_v47 = vor.u32 %v10062_v24, %v8790_v48  ;;  %v8646_v5 = vld [vmem:[#allocation8 + $0x450] sm:$0xf0]  ;;  %v10018_v3 = vld [vmem:[#allocation8 + $0x404] sm:$0xf] }
 0x2b2   :  { %5321 = vmatpush.bf16.msra.mxu2 %v8425_v50  ;;  %5296 = vmatpush.bf16.msra.mxu0 %v8153_v51  ;;  %v10042_v50 = vld [vmem:[#allocation8 + $0x4c4] sm:$0xf]  ;;  %v8710_v51 = vld [vmem:[#allocation8 + $0x4d0] sm:$0xf0] }
 0x2b3   :  { %10257 = vtanh.f32 %v3532_v43  ;;  %v8502_v22 = vld [vmem:[#allocation8 + $0x330] sm:$0xf0]  ;;  %v9986_v43 = vld [vmem:[#allocation8 + $0x304] sm:$0xf] }
 0x2b4   :  { %5309 = vmatpush.bf16.msra.mxu1 %v8281_v56  ;;  %v10014_v56 = vld [vmem:[#allocation8 + $0x3e4] sm:$0xf]  ;;  %5286 = vmatpush.bf16.msrb.mxu3 %v8997_v60  ;;  %v8918_v55 = vld [vmem:[#allocation8 + $0x670] sm:$0xf0] }
 0x2b5   :  { %v8601_v20 = vor.u32 %v10014_v56, %v8598_v57  ;;  %v9994_v57 = vld [vmem:[#allocation8 + $0x344] sm:$0xf] }
 0x2b6   :  { %5322 = vmatpush.bf16.msra.mxu2 %v8409_v61  ;;  %5297 = vmatpush.bf16.msra.mxu0 %v8137_v62  ;;  %v8713_v61 = vor.u32 %v10042_v50, %v8710_v51  ;;  %v10038_v62 = vld [vmem:[#allocation8 + $0x4a4] sm:$0xf]  ;;  %v10793_v50 = vpop.f32.mrf.mxu2 }
 0x2b7   :  { %v8697_v6 = vor.u32 %v10038_v62, %v8694_v23  ;;  %v10054_v60 = vld [vmem:[#allocation8 + $0x524] sm:$0xf]  ;;  %v8966_v62 = vld [vmem:[#allocation8 + $0x6d0] sm:$0xf0]  ;;  %v8521_v23 = vor.u32 %v9994_v57, %v8518_v18 }
 0x2b8   :  { %5310 = vmatpush.bf16.msra.mxu1 %v8265_v41  ;;  %v10070_v41 = vld [vmem:[#allocation8 + $0x5a4] sm:$0xf]  ;;  %5331 = vmatpush.bf16.msra.mxu3 %v8601_v20  ;;  %v10795_v51 = vpop.f32.mrf.mxu3  ;;  %v3533_v56 = vpop.f32.mrf.mxu0  ;;  %v8758_v20 = vld [vmem:[#allocation8 + $0x530] sm:$0xf0] }
 0x2b9   :  { %v8825_v7 = vor.u32 %v10070_v41, %v8822_v4  ;;  %v10258_v58 = vpop.eup %10257  ;;  %v8614_v41 = vld [vmem:[#allocation8 + $0x410] sm:$0xf0]  ;;  %v10050_v4 = vld [vmem:[#allocation8 + $0x504] sm:$0xf] }
 0x2ba   :  { %5323 = vmatpush.bf16.msra.mxu2 %v8393_v11  ;;  %5298 = vmatpush.bf16.msra.mxu0 %v8121_v13  ;;  %v8806_v11 = vld [vmem:[#allocation8 + $0x590] sm:$0xf0]  ;;  %v8569_v13 = vor.u32 %v10006_v8, %v8566_v10  ;;  %v10797_v31 = vpack.c.bf16 %v10258_v58, %v10258_v58  ;;  %v9921_v8 = vld [vmem:[#allocation8 + $0xf4] sm:$0xf0]  ;;  %v8348_v10 = vld [vmem:[#allocation8 + $0x1e8] sm:$0xf] }
 0x2bb   :  { %v8809_v34 = vor.u32 %v10066_v19, %v8806_v11  ;;  %v9953_v19 = vld [vmem:[#allocation8 + $0x1f4] sm:$0xf0]  ;;  %v10102_v11 = vld [vmem:[#allocation8 + $0x6a4] sm:$0xf]  ;;  %v8221_v35 = vor.u32 %v9921_v8, %v8220_v27  ;;  %v8172_v58 = vld [vmem:[#allocation8 + $0x88] sm:$0xf] }
 0x2bc   :  { %5311 = vmatpush.bf16.msra.mxu1 %v8249_v63  ;;  %5332 = vmatpush.bf16.msra.mxu3 %v8585_v37  ;;  %v8662_v63 = vld [vmem:[#allocation8 + $0x470] sm:$0xf0]  ;;  %v8761_v37 = vor.u32 %v10054_v60, %v8758_v20  ;;  %v8349_v24 = vor.u32 %v9953_v19, %v8348_v10  ;;  %v8300_v60 = vld [vmem:[#allocation8 + $0x188] sm:$0xf] }
 0x2bd   :  { %v8665_v30 = vor.u32 %v10030_v42, %v8662_v63  ;;  %5274 = vmatmul.bf16.vlgmr.msrb.gmra.mxu2 %v10797_v31  ;;  %v8745_v63 = vor.u32 %v10050_v4, %v8742_v45  ;;  %v8284_v4 = vld [vmem:[#allocation8 + $0x168] sm:$0xf] }
 0x2be   :  { %5324 = vmatpush.bf16.msra.mxu2 %v8377_v32  ;;  %5299 = vmatpush.bf16.msra.mxu0 %v8105_v15  ;;  %v8534_v32 = vld [vmem:[#allocation8 + $0x370] sm:$0xf0]  ;;  %v10058_v15 = vld [vmem:[#allocation8 + $0x544] sm:$0xf]  ;;  %v3559_v42 = vpop.f32.mrf.mxu2 }
 0x2bf   :  { %v10082_v42 = vld [vmem:[#allocation8 + $0x604] sm:$0xf] }
 0x2c0   :  { %5312 = vmatpush.bf16.msra.mxu1 %v8233_v33  ;;  %5333 = vmatpush.bf16.msra.mxu3 %v8569_v13  ;;  %v8537_v33 = vor.u32 %v9998_v12, %v8534_v32  ;;  %v8950_v13 = vld [vmem:[#allocation8 + $0x6b0] sm:$0xf0]  ;;  %v3572_v38 = vpop.f32.mrf.mxu3 }
 0x2c1   :  { %5300 = vmatmul.bf16.vlgmr.msra.gmra.mxu0 %v10747_v21  ;;  %v8953_v48 = vor.u32 %v10102_v11, %v8950_v13  ;;  %v8934_v12 = vld [vmem:[#allocation8 + $0x690] sm:$0xf0]  ;;  %v8140_v11 = vld [vmem:[#allocation8 + $0x48] sm:$0xf]  ;;  %v9901_v13 = vld [vmem:[#allocation8 + $0x54] sm:$0xf0] }
 0x2c2   :  { %5344 = vmatpush.bf16.msrb.mxu0 %v8729_v49  ;;  %5325 = vmatpush.bf16.msra.mxu2 %v8361_v59  ;;  %v8649_v49 = vor.u32 %v10026_v9, %v8646_v5  ;;  %v8985_v59 = vor.u32 %v10110_v39, %v8982_v44  ;;  %v8486_v9 = vld [vmem:[#allocation8 + $0x310] sm:$0xf0]  ;;  %v10098_v5 = vld [vmem:[#allocation8 + $0x684] sm:$0xf]  ;;  %v8188_v39 = vld [vmem:[#allocation8 + $0xa8] sm:$0xf] }
 0x2c3   :  { %5313 = vmatmul.bf16.vlgmr.msra.gmra.mxu1 %v10750_v25  ;;  %v8489_v32 = vor.u32 %v9986_v43, %v8486_v9  ;;  %v9913_v44 = vld [vmem:[#allocation8 + $0xb4] sm:$0xf0]  ;;  %v8870_v38 = vld [vmem:[#allocation8 + $0x610] sm:$0xf0] }
 0x2c4   :  { %5357 = vmatpush.bf16.msrb.mxu1 %v8857_v54  ;;  %5334 = vmatpush.bf16.msra.mxu3 %v8553_v46  ;;  %v8777_v54 = vor.u32 %v10058_v15, %v8774_v36  ;;  %v9917_v46 = vld [vmem:[#allocation8 + $0xd4] sm:$0xf0]  ;;  %v8937_v36 = vor.u32 %v10098_v5, %v8934_v12  ;;  %v8189_v56 = vor.u32 %v9913_v44, %v8188_v39  ;;  %v8252_v12 = vld [vmem:[#allocation8 + $0x128] sm:$0xf] }
 0x2c6   :  { %5345 = vmatpush.bf16.msrb.mxu0 %v8713_v61  ;;  %v10106_v61 = vld [vmem:[#allocation8 + $0x6c4] sm:$0xf]  ;;  %5370 = vmatpush.bf16.msrb.mxu2 %v8985_v59  ;;  %v9909_v59 = vld [vmem:[#allocation8 + $0x94] sm:$0xf0] }
 0x2c8   :  { %5358 = vmatpush.bf16.msrb.mxu1 %v8841_v0  ;;  %v3546_v0 = vpop.f32.mrf.mxu1  ;;  %5335 = vmatpush.bf16.msra.mxu3 %v8537_v33  ;;  %v8316_v33 = vld [vmem:[#allocation8 + $0x1a8] sm:$0xf] }
 0x2c9   :  { %v8317_v57 = vor.u32 %v9945_v52, %v8316_v33  ;;  %v8173_v0 = vor.u32 %v9909_v59, %v8172_v58  ;;  %v8108_v33 = vld [vmem:[#allocation8 + $0x8] sm:$0xf]  ;;  %v9893_v52 = vld [vmem:[#allocation8 + $0x14] sm:$0xf0] }
 0x2ca   :  { %5346 = vmatpush.bf16.msrb.mxu0 %v8697_v6  ;;  %v9990_v6 = vld [vmem:[#allocation8 + $0x324] sm:$0xf]  ;;  %v8860_v58 = vld [vmem:[#allocation8 + $0x5e8] sm:$0xf]  ;;  %v10081_v59 = vld [vmem:[#allocation8 + $0x5f4] sm:$0xf0] }
 0x2cb   :  { %v8505_v14 = vor.u32 %v9990_v6, %v8502_v22  ;;  %v9937_v6 = vld [vmem:[#allocation8 + $0x174] sm:$0xf0]  ;;  %v10086_v22 = vld [vmem:[#allocation8 + $0x624] sm:$0xf] }
 0x2cc   :  { %5359 = vmatpush.bf16.msrb.mxu1 %v8825_v7  ;;  %v8969_v7 = vor.u32 %v10106_v61, %v8966_v62  ;;  %5336 = vmatpush.bf16.msra.mxu3 %v8521_v23  ;;  %v10090_v61 = vld [vmem:[#allocation8 + $0x644] sm:$0xf]  ;;  %v8902_v62 = vld [vmem:[#allocation8 + $0x650] sm:$0xf0]  ;;  %v8285_v10 = vor.u32 %v9937_v6, %v8284_v4  ;;  %v8844_v6 = vld [vmem:[#allocation8 + $0x5c8] sm:$0xf] }
 0x2cd   :  { %5326 = vmatmul.bf16.vlgmr.msra.gmra.mxu2 %v10752_v26 }
 0x2ce   :  { %5347 = vmatpush.bf16.msrb.mxu0 %v8681_v16  ;;  %v8617_v16 = vor.u32 %v10018_v3, %v8614_v41  ;;  %5371 = vmatpush.bf16.msrb.mxu2 %v8969_v7  ;;  %v8156_v3 = vld [vmem:[#allocation8 + $0x68] sm:$0xf]  ;;  %v9905_v41 = vld [vmem:[#allocation8 + $0x74] sm:$0xf0] }
 0x2cf   :  { %v8157_v8 = vor.u32 %v9905_v41, %v8156_v3  ;;  %v8861_v41 = vor.u32 %v10081_v59, %v8860_v58  ;;  %v10065_v58 = vld [vmem:[#allocation8 + $0x574] sm:$0xf0]  ;;  %v8380_v59 = vld [vmem:[#allocation8 + $0x228] sm:$0xf] }
 0x2d0   :  { %5360 = vmatpush.bf16.msrb.mxu1 %v8809_v34  ;;  %v624_v34 = vperm.slane %v10741_v53, 7  ;;  %5337 = vmatpush.bf16.msra.mxu3 %v8505_v14  ;;  %v8205_v53 = vor.u32 %v9917_v46, %v8204_v17  ;;  %v8268_v14 = vld [vmem:[#allocation8 + $0x148] sm:$0xf]  ;;  %v9897_v46 = vld [vmem:[#allocation8 + $0x34] sm:$0xf0] }
 0x2d2   :  { %5348 = vmatpush.bf16.msrb.mxu0 %v8665_v30  ;;  %v8332_v30 = vld [vmem:[#allocation8 + $0x1c8] sm:$0xf]  ;;  %5372 = vmatpush.bf16.msrb.mxu2 %v8953_v48 }
 0x2d3   :  { %v8124_v48 = vld [vmem:[#allocation8 + $0x28] sm:$0xf] }
 0x2d4   :  { %5361 = vmatpush.bf16.msrb.mxu1 %v8793_v47  ;;  %v9949_v47 = vld [vmem:[#allocation8 + $0x1d4] sm:$0xf0]  ;;  %5338 = vmatpush.bf16.msra.mxu3 %v8489_v32  ;;  %v8125_v44 = vor.u32 %v9897_v46, %v8124_v48  ;;  %v9078_v48 = vld [vmem:[#allocation8 + $0x7b0] sm:$0xf0]  ;;  %v10813_v46 = vld [vmem:[#allocation10] sm:$0xf] }
 0x2d5   :  { %v8333_v15 = vor.u32 %v9949_v47, %v8332_v30  ;;  %v9929_v32 = vld [vmem:[#allocation8 + $0x134] sm:$0xf0] }
 0x2d6   :  { %5349 = vmatpush.bf16.msrb.mxu0 %v8649_v49  ;;  %v3545_v49 = vadd.f32 %v10791_v28, %v624_v34  ;;  %5373 = vmatpush.bf16.msrb.mxu2 %v8937_v36  ;;  %v9941_v28 = vld [vmem:[#allocation8 + $0x194] sm:$0xf0]  ;;  %v8476_v34 = vld [vmem:[#allocation8 + $0x2e8] sm:$0xf] }
 0x2d7   :  { %v8301_v23 = vor.u32 %v9941_v28, %v8300_v60  ;;  %v9981_v36 = vld [vmem:[#allocation8 + $0x2d4] sm:$0xf0]  ;;  %v8444_v60 = vld [vmem:[#allocation8 + $0x2a8] sm:$0xf]  ;;  %v8109_v28 = vor.u32 %v9893_v52, %v8108_v33  ;;  %v10130_v33 = vld [vmem:[#allocation8 + $0x784] sm:$0xf] }
 0x2d8   :  { %5362 = vmatpush.bf16.msrb.mxu1 %v8777_v54  ;;  %v10094_v54 = vld [vmem:[#allocation8 + $0x664] sm:$0xf]  ;;  %v3558_v20 = vadd.f32 %v10793_v50, %v3545_v49  ;;  %v8886_v50 = vld [vmem:[#allocation8 + $0x630] sm:$0xf0]  ;;  %v8253_v49 = vor.u32 %v9929_v32, %v8252_v12  ;;  %v8812_v12 = vld [vmem:[#allocation8 + $0x588] sm:$0xf] }
 0x2d9   :  { %v8921_v18 = vor.u32 %v10094_v54, %v8918_v55  ;;  %v8889_v19 = vor.u32 %v10086_v22, %v8886_v50  ;;  %v8236_v54 = vld [vmem:[#allocation8 + $0x108] sm:$0xf]  ;;  %v9925_v55 = vld [vmem:[#allocation8 + $0x114] sm:$0xf0] }
 0x2da   :  { %5350 = vmatpush.bf16.msrb.mxu0 %v8633_v40  ;;  %v8905_v40 = vor.u32 %v10090_v61, %v8902_v62  ;;  %v8237_v62 = vor.u32 %v9925_v55, %v8236_v54  ;;  %v10077_v22 = vld [vmem:[#allocation8 + $0x5d4] sm:$0xf0]  ;;  %v8428_v50 = vld [vmem:[#allocation8 + $0x288] sm:$0xf] }
 0x2db   :  { %5374 = vmatpush.bf16.msrb.mxu2 %v8921_v18  ;;  %v10049_v18 = vld [vmem:[#allocation8 + $0x4f4] sm:$0xf0]  ;;  %v8668_v55 = vld [vmem:[#allocation8 + $0x468] sm:$0xf] }
 0x2dc   :  { %5363 = vmatpush.bf16.msrb.mxu1 %v8761_v37  ;;  %v3571_v37 = vadd.f32 %v10795_v51, %v3558_v20  ;;  %v9985_v51 = vld [vmem:[#allocation8 + $0x2f4] sm:$0xf0] }
 0x2dd   :  { %v8477_v5 = vor.u32 %v9985_v51, %v8476_v34  ;;  %v9977_v20 = vld [vmem:[#allocation8 + $0x2b4] sm:$0xf0]  ;;  %v8828_v34 = vld [vmem:[#allocation8 + $0x5a8] sm:$0xf] }
 0x2de   :  { %5351 = vmatpush.bf16.msrb.mxu0 %v8617_v16  ;;  %v3583_v45 = vpop.f32.mrf.mxu0  ;;  %v9933_v16 = vld [vmem:[#allocation8 + $0x154] sm:$0xf0]  ;;  %v8445_v4 = vor.u32 %v9977_v20, %v8444_v60 }
 0x2df   :  { %v3584_v27 = vadd.f32 %v3583_v45, %v3571_v37  ;;  %5375 = vmatpush.bf16.msrb.mxu2 %v8905_v40  ;;  %v8269_v43 = vor.u32 %v9933_v16, %v8268_v14  ;;  %v9110_v40 = vld [vmem:[#allocation8 + $0x7f0] sm:$0xf0]  ;;  %v8716_v37 = vld [vmem:[#allocation8 + $0x4c8] sm:$0xf]  ;;  %v10045_v45 = vld [vmem:[#allocation8 + $0x4d4] sm:$0xf0]  ;;  %v8845_v14 = vor.u32 %v10077_v22, %v8844_v6 }
 0x2e0   :  { %5364 = vmatpush.bf16.msrb.mxu1 %v8745_v63  ;;  %v3596_v7 = vpop.f32.mrf.mxu1  ;;  %v10073_v51 = vld [vmem:[#allocation8 + $0x5b4] sm:$0xf0]  ;;  %v8364_v22 = vld [vmem:[#allocation8 + $0x208] sm:$0xf] }
 0x2e1   :  { %5352 = vmatmul.bf16.vlgmr.msrb.gmra.mxu0 %v10768_v2  ;;  %v3597_v63 = vadd.f32 %v3596_v7, %v3584_v27  ;;  %v9973_v7 = vld [vmem:[#allocation8 + $0x294] sm:$0xf0] }
 0x2e2   :  { %5396 = vmatpush.bf16.msra.mxu0 %v8221_v35  ;;  %v8141_v35 = vor.u32 %v9901_v13, %v8140_v11  ;;  %v10138_v11 = vld [vmem:[#allocation8 + $0x7c4] sm:$0xf]  ;;  %v9094_v13 = vld [vmem:[#allocation8 + $0x7d0] sm:$0xf0]  ;;  %v8429_v16 = vor.u32 %v9973_v7, %v8428_v50  ;;  %v10069_v32 = vld [vmem:[#allocation8 + $0x594] sm:$0xf0] }
 0x2e3   :  { %5365 = vmatmul.bf16.vlgmr.msrb.gmra.mxu1 %v10770_v1  ;;  %5376 = vmatpush.bf16.msrb.mxu2 %v8889_v19  ;;  %v8717_v19 = vor.u32 %v10045_v45, %v8716_v37  ;;  %v8813_v52 = vor.u32 %v10069_v32, %v8812_v12  ;;  %v9961_v60 = vld [vmem:[#allocation8 + $0x234] sm:$0xf0]  ;;  %v8780_v45 = vld [vmem:[#allocation8 + $0x548] sm:$0xf]  ;;  %v10118_v32 = vld [vmem:[#allocation8 + $0x724] sm:$0xf] }
 0x2e4   :  { %5409 = vmatpush.bf16.msra.mxu1 %v8349_v24  ;;  %v8873_v24 = vor.u32 %v10082_v42, %v8870_v38  ;;  %v8700_v42 = vld [vmem:[#allocation8 + $0x4a8] sm:$0xf]  ;;  %v10041_v38 = vld [vmem:[#allocation8 + $0x4b4] sm:$0xf0] }
 0x2e5   :  { %v10029_v37 = vld [vmem:[#allocation8 + $0x454] sm:$0xf0] }
 0x2e6   :  { %5397 = vmatpush.bf16.msra.mxu0 %v8205_v53  ;;  %v3585_v47 = vpop.f32.mrf.mxu0  ;;  %v10061_v6 = vld [vmem:[#allocation8 + $0x554] sm:$0xf0] }
 0x2e7   :  { %5377 = vmatpush.bf16.msrb.mxu2 %v8873_v24  ;;  %v10134_v24 = vld [vmem:[#allocation8 + $0x7a4] sm:$0xf]  ;;  %v8684_v47 = vld [vmem:[#allocation8 + $0x488] sm:$0xf]  ;;  %v9957_v50 = vld [vmem:[#allocation8 + $0x214] sm:$0xf0] }
 0x2e8   :  { %5410 = vmatpush.bf16.msra.mxu1 %v8333_v15  ;;  %v3609_v17 = vpop.f32.mrf.mxu2  ;;  %v3598_v53 = vpop.f32.mrf.mxu1  ;;  %v8460_v15 = vld [vmem:[#allocation8 + $0x2c8] sm:$0xf] }
 0x2e9   :  { %v3610_v30 = vadd.f32 %v3609_v17, %v3597_v63  ;;  %v8412_v63 = vld [vmem:[#allocation8 + $0x268] sm:$0xf]  ;;  %v9097_v17 = vor.u32 %v10138_v11, %v9094_v13  ;;  %v10122_v11 = vld [vmem:[#allocation8 + $0x744] sm:$0xf]  ;;  %v9030_v13 = vld [vmem:[#allocation8 + $0x750] sm:$0xf0] }
 0x2ea   :  { %5398 = vmatpush.bf16.msra.mxu0 %v8189_v56  ;;  %v3622_v9 = vpop.f32.mrf.mxu3  ;;  %v8461_v56 = vor.u32 %v9981_v36, %v8460_v15  ;;  %5378 = vmatmul.bf16.vlgmr.msrb.gmra.mxu2 %v10797_v31  ;;  %v8396_v53 = vld [vmem:[#allocation8 + $0x248] sm:$0xf]  ;;  %v9965_v15 = vld [vmem:[#allocation8 + $0x254] sm:$0xf0]  ;;  %v9081_v36 = vor.u32 %v10134_v24, %v9078_v48 }
 0x2eb   :  { %v3623_v39 = vadd.f32 %v3622_v9, %v3610_v30  ;;  %5422 = vmatpush.bf16.msra.mxu2 %v8477_v5  ;;  %v8829_v30 = vor.u32 %v10073_v51, %v8828_v34  ;;  %v10037_v5 = vld [vmem:[#allocation8 + $0x494] sm:$0xf0]  ;;  %v8397_v54 = vor.u32 %v9965_v15, %v8396_v53  ;;  %v9014_v53 = vld [vmem:[#allocation8 + $0x730] sm:$0xf0]  ;;  %v8620_v15 = vld [vmem:[#allocation8 + $0x408] sm:$0xf] }
 0x2ec   :  { %5411 = vmatpush.bf16.msra.mxu1 %v8317_v57  ;;  %v8732_v57 = vld [vmem:[#allocation8 + $0x4e8] sm:$0xf]  ;;  %v10025_v34 = vld [vmem:[#allocation8 + $0x434] sm:$0xf0] }
 0x2ed   :  { %10259 = vtanh.f32 %v3623_v39  ;;  %v3900_v39 = vperm.slane %v10813_v46, 0  ;;  %v10057_v24 = vld [vmem:[#allocation8 + $0x534] sm:$0xf0] }
 0x2ee   :  { %5399 = vmatpush.bf16.msra.mxu0 %v8173_v0  ;;  %v8733_v0 = vor.u32 %v10049_v18, %v8732_v57  ;;  %v8796_v57 = vld [vmem:[#allocation8 + $0x568] sm:$0xf] }
 0x2ef   :  { %5423 = vmatpush.bf16.msra.mxu2 %v8461_v56  ;;  %v10033_v56 = vld [vmem:[#allocation8 + $0x474] sm:$0xf0] }
 0x2f0   :  { %5412 = vmatpush.bf16.msra.mxu1 %v8301_v23  ;;  %v3611_v61 = vpop.f32.mrf.mxu2  ;;  %v10142_v23 = vld [vmem:[#allocation8 + $0x7e4] sm:$0xf] }
 0x2f2   :  { %5400 = vmatpush.bf16.msra.mxu0 %v8157_v8  ;;  %v3624_v3 = vpop.f32.mrf.mxu3  ;;  %v9113_v8 = vor.u32 %v10142_v23, %v9110_v40  ;;  %v9046_v23 = vld [vmem:[#allocation8 + $0x770] sm:$0xf0] }
 0x2f3   :  { %v10260_v27 = vpop.eup %10259  ;;  %5424 = vmatpush.bf16.msra.mxu2 %v8445_v4  ;;  %v8797_v3 = vor.u32 %v10065_v58, %v8796_v57  ;;  %v8652_v4 = vld [vmem:[#allocation8 + $0x448] sm:$0xf]  ;;  %v8350_v57 = vld [vmem:[#allocation8 + $0x1f8] sm:$0xf0]  ;;  %v10105_v58 = vld [vmem:[#allocation8 + $0x6b4] sm:$0xf0] }
 0x2f4   :  { %5413 = vmatpush.bf16.msra.mxu1 %v8285_v10  ;;  %v10808_v10 = vpack.c.bf16 %v10260_v27, %v10260_v27  ;;  %v8988_v27 = vld [vmem:[#allocation8 + $0x6e8] sm:$0xf] }
 0x2f6   :  { %5401 = vmatpush.bf16.msra.mxu0 %v8141_v35  ;;  %5287 = vmatmul.bf16.vlgmr.msrb.gmra.mxu3 %v10808_v10  ;;  %v9969_v35 = vld [vmem:[#allocation8 + $0x274] sm:$0xf0] }
 0x2f7   :  { %5383 = vmatpush.bf16.msrb.mxu3 %v9113_v8  ;;  %5425 = vmatpush.bf16.msra.mxu2 %v8429_v16  ;;  %v8413_v9 = vor.u32 %v9969_v35, %v8412_v63  ;;  %v10113_v8 = vld [vmem:[#allocation8 + $0x6f4] sm:$0xf0]  ;;  %v8781_v16 = vor.u32 %v10061_v6, %v8780_v45  ;;  %v9947_v6 = vld [vmem:[#allocation8 + $0x1cc] sm:$0xf] }
 0x2f8   :  { %5414 = vmatpush.bf16.msra.mxu1 %v8269_v43  ;;  %v8701_v43 = vor.u32 %v10041_v38, %v8700_v42  ;;  %v8365_v42 = vor.u32 %v9957_v50, %v8364_v22  ;;  %v8636_v38 = vld [vmem:[#allocation8 + $0x428] sm:$0xf]  ;;  %v8334_v22 = vld [vmem:[#allocation8 + $0x1d8] sm:$0xf0] }
 0x2f9   :  { %v8637_v12 = vor.u32 %v10025_v34, %v8636_v38  ;;  %v9943_v38 = vld [vmem:[#allocation8 + $0x1ac] sm:$0xf]  ;;  %v8318_v34 = vld [vmem:[#allocation8 + $0x1b8] sm:$0xf0] }
 0x2fa   :  { %5402 = vmatpush.bf16.msra.mxu0 %v8125_v44  ;;  %v8685_v44 = vor.u32 %v10037_v5, %v8684_v47  ;;  %v10109_v47 = vld [vmem:[#allocation8 + $0x6d4] sm:$0xf0] }
 0x2fb   :  { %5384 = vmatpush.bf16.msrb.mxu3 %v9097_v17  ;;  %5426 = vmatpush.bf16.msra.mxu2 %v8413_v9  ;;  %v8989_v17 = vor.u32 %v10113_v8, %v8988_v27  ;;  %v8972_v9 = vld [vmem:[#allocation8 + $0x6c8] sm:$0xf]  ;;  %v10101_v27 = vld [vmem:[#allocation8 + $0x694] sm:$0xf0] }
 0x2fc   :  { %5415 = vmatpush.bf16.msra.mxu1 %v8253_v49  ;;  %v9062_v49 = vld [vmem:[#allocation8 + $0x790] sm:$0xf0] }
 0x2fd   :  { %v9065_v61 = vor.u32 %v10130_v33, %v9062_v49  ;;  %v10053_v33 = vld [vmem:[#allocation8 + $0x514] sm:$0xf0]  ;;  %v8973_v49 = vor.u32 %v10109_v47, %v8972_v9  ;;  %v8174_v9 = vld [vmem:[#allocation8 + $0x98] sm:$0xf0] }
 0x2fe   :  { %5403 = vmatpush.bf16.msra.mxu0 %v8109_v28  ;;  %v5197_v18 = vpop.f32.mrf.mxu0 }
 0x2ff   :  { %5385 = vmatpush.bf16.msrb.mxu3 %v9081_v36  ;;  %v5198_v20 = vadd.f32 %v5197_v18, %v3900_v39  ;;  %5427 = vmatpush.bf16.msra.mxu2 %v8397_v54  ;;  %v10021_v39 = vld [vmem:[#allocation8 + $0x414] sm:$0xf0]  ;;  %v8222_v54 = vld [vmem:[#allocation8 + $0xf8] sm:$0xf0]  ;;  %v8956_v18 = vld [vmem:[#allocation8 + $0x6a8] sm:$0xf] }
 0x300   :  { %5416 = vmatpush.bf16.msra.mxu1 %v8237_v62  ;;  %v5210_v28 = vpop.f32.mrf.mxu1  ;;  %v8669_v62 = vor.u32 %v10033_v56, %v8668_v55  ;;  %v9951_v55 = vld [vmem:[#allocation8 + $0x1ec] sm:$0xf]  ;;  %v9017_v56 = vor.u32 %v10118_v32, %v9014_v53  ;;  %v8302_v32 = vld [vmem:[#allocation8 + $0x198] sm:$0xf0] }
 0x301   :  { %5404 = vmatmul.bf16.vlgmr.msra.gmra.mxu0 %v10747_v21  ;;  %v5211_v40 = vadd.f32 %v5210_v28, %v5198_v20  ;;  %v8998_v20 = vld [vmem:[#allocation8 + $0x710] sm:$0xf0] }
 0x302   :  { %5448 = vmatpush.bf16.msrb.mxu0 %v8733_v0  ;;  %v10126_v0 = vld [vmem:[#allocation8 + $0x764] sm:$0xf] }
 0x303   :  { %5417 = vmatmul.bf16.vlgmr.msra.gmra.mxu1 %v10750_v25  ;;  %5386 = vmatpush.bf16.msrb.mxu3 %v9065_v61  ;;  %v9049_v7 = vor.u32 %v10126_v0, %v9046_v23  ;;  %v8604_v0 = vld [vmem:[#allocation8 + $0x3e8] sm:$0xf]  ;;  %v10017_v23 = vld [vmem:[#allocation8 + $0x3f4] sm:$0xf0] }
 0x304   :  { %5461 = vmatpush.bf16.msrb.mxu1 %v8861_v41  ;;  %v8381_v41 = vor.u32 %v9961_v60, %v8380_v59  ;;  %v8621_v59 = vor.u32 %v10021_v39, %v8620_v15  ;;  %v10114_v60 = vld [vmem:[#allocation8 + $0x704] sm:$0xf]  ;;  %v8605_v50 = vor.u32 %v10017_v23, %v8604_v0  ;;  %v8908_v15 = vld [vmem:[#allocation8 + $0x648] sm:$0xf]  ;;  %v10001_v0 = vld [vmem:[#allocation8 + $0x374] sm:$0xf0] }
 0x305   :  { %v9001_v45 = vor.u32 %v10114_v60, %v8998_v20  ;;  %v10089_v60 = vld [vmem:[#allocation8 + $0x634] sm:$0xf0] }
 0x306   :  { %5449 = vmatpush.bf16.msrb.mxu0 %v8717_v19  ;;  %v8653_v19 = vor.u32 %v10029_v37, %v8652_v4  ;;  %5428 = vmatpush.bf16.msra.mxu2 %v8381_v41  ;;  %v5199_v35 = vpop.f32.mrf.mxu0  ;;  %v8957_v41 = vor.u32 %v10105_v58, %v8956_v18  ;;  %v9915_v4 = vld [vmem:[#allocation8 + $0xcc] sm:$0xf]  ;;  %v8206_v37 = vld [vmem:[#allocation8 + $0xd8] sm:$0xf0] }
 0x307   :  { %5339 = vmatmul.bf16.vlgmr.msra.gmra.mxu3 %v10754_v29  ;;  %v8209_v8 = vor.u32 %v9915_v4, %v8206_v37  ;;  %v10097_v35 = vld [vmem:[#allocation8 + $0x674] sm:$0xf0]  ;;  %v9931_v37 = vld [vmem:[#allocation8 + $0x14c] sm:$0xf] }
 0x308   :  { %5462 = vmatpush.bf16.msrb.mxu1 %v8845_v14  ;;  %v5223_v14 = vpop.f32.mrf.mxu2  ;;  %5387 = vmatpush.bf16.msrb.mxu3 %v9049_v7  ;;  %v5212_v48 = vpop.f32.mrf.mxu1  ;;  %v8940_v7 = vld [vmem:[#allocation8 + $0x688] sm:$0xf] }
 0x309   :  { %v5224_v51 = vadd.f32 %v5223_v14, %v5211_v40  ;;  %v9911_v14 = vld [vmem:[#allocation8 + $0xac] sm:$0xf]  ;;  %v8321_v48 = vor.u32 %v9943_v38, %v8318_v34  ;;  %v8254_v38 = vld [vmem:[#allocation8 + $0x138] sm:$0xf0] }
 0x30a   :  { %5450 = vmatpush.bf16.msrb.mxu0 %v8701_v43  ;;  %v5236_v63 = vpop.f32.mrf.mxu3  ;;  %v8764_v43 = vld [vmem:[#allocation8 + $0x528] sm:$0xf]  ;;  %5429 = vmatpush.bf16.msra.mxu2 %v8365_v42  ;;  %v8941_v42 = vor.u32 %v10101_v27, %v8940_v7  ;;  %v9997_v27 = vld [vmem:[#allocation8 + $0x354] sm:$0xf0] }
 0x30b   :  { %v10817_v5 = vadd.f32 %v5236_v63, %v5224_v51  ;;  %v8765_v36 = vor.u32 %v10057_v24, %v8764_v43  ;;  %v8924_v63 = vld [vmem:[#allocation8 + $0x668] sm:$0xf]  ;;  %v10009_v24 = vld [vmem:[#allocation8 + $0x3b4] sm:$0xf0] }
 0x30c   :  { %5463 = vmatpush.bf16.msrb.mxu1 %v8829_v30  ;;  %v9033_v30 = vor.u32 %v10122_v11, %v9030_v13  ;;  %v10013_v11 = vld [vmem:[#allocation8 + $0x3d4] sm:$0xf0]  ;;  %v8337_v13 = vor.u32 %v9947_v6, %v8334_v22  ;;  %v8572_v43 = vld [vmem:[#allocation8 + $0x3a8] sm:$0xf]  ;;  %v8925_v47 = vor.u32 %v10097_v35, %v8924_v63 }
 0x30d   :  { %5430 = vmatmul.bf16.vlgmr.msra.gmra.mxu2 %v10752_v26  ;;  %v8573_v53 = vor.u32 %v10009_v24, %v8572_v43  ;;  %v8524_v22 = vld [vmem:[#allocation8 + $0x348] sm:$0xf]  ;;  %v9993_v24 = vld [vmem:[#allocation8 + $0x334] sm:$0xf0] }
 0x30e   :  { %5451 = vmatpush.bf16.msrb.mxu0 %v8685_v44  ;;  %v8748_v44 = vld [vmem:[#allocation8 + $0x508] sm:$0xf]  ;;  %5474 = vmatpush.bf16.msrb.mxu2 %v8989_v17 }
 0x30f   :  { %5388 = vmatpush.bf16.msrb.mxu3 %v9033_v30  ;;  %v8749_v61 = vor.u32 %v10053_v33, %v8748_v44  ;;  %v9907_v30 = vld [vmem:[#allocation8 + $0x8c] sm:$0xf]  ;;  %v8556_v44 = vld [vmem:[#allocation8 + $0x388] sm:$0xf]  ;;  %v10005_v33 = vld [vmem:[#allocation8 + $0x394] sm:$0xf0] }
 0x310   :  { %5464 = vmatpush.bf16.msrb.mxu1 %v8813_v52  ;;  %v9919_v52 = vld [vmem:[#allocation8 + $0xec] sm:$0xf]  ;;  %v5225_v28 = vpop.f32.mrf.mxu2  ;;  %v8177_v39 = vor.u32 %v9907_v30, %v8174_v9  ;;  %v8557_v58 = vor.u32 %v10005_v33, %v8556_v44  ;;  %v8508_v35 = vld [vmem:[#allocation8 + $0x328] sm:$0xf]  ;;  %v8462_v30 = vld [vmem:[#allocation8 + $0x2d8] sm:$0xf0] }
 0x311   :  { %v10079_v33 = vld [vmem:[#allocation8 + $0x5ec] sm:$0xf] }
 0x312   :  { %5452 = vmatpush.bf16.msrb.mxu0 %v8669_v62  ;;  %v8225_v62 = vor.u32 %v9919_v52, %v8222_v54  ;;  %v5238_v40 = vpop.f32.mrf.mxu3  ;;  %5475 = vmatpush.bf16.msrb.mxu2 %v8973_v49  ;;  %v9903_v52 = vld [vmem:[#allocation8 + $0x6c] sm:$0xf]  ;;  %v8158_v54 = vld [vmem:[#allocation8 + $0x78] sm:$0xf0] }
 0x313   :  { %5389 = vmatpush.bf16.msrb.mxu3 %v9017_v56  ;;  %v9935_v56 = vld [vmem:[#allocation8 + $0x16c] sm:$0xf] }
 0x314   :  { %5465 = vmatpush.bf16.msrb.mxu1 %v8797_v3  ;;  %v8353_v3 = vor.u32 %v9951_v55, %v8350_v57  ;;  %v8286_v57 = vld [vmem:[#allocation8 + $0x178] sm:$0xf0]  ;;  %v9899_v40 = vld [vmem:[#allocation8 + $0x4c] sm:$0xf] }
 0x315   :  { %v8289_v23 = vor.u32 %v9935_v56, %v8286_v57 }
 0x316   :  { %5453 = vmatpush.bf16.msrb.mxu0 %v8653_v19  ;;  %v8588_v19 = vld [vmem:[#allocation8 + $0x3c8] sm:$0xf]  ;;  %5476 = vmatpush.bf16.msrb.mxu2 %v8957_v41 }
 0x317   :  { %5390 = vmatpush.bf16.msrb.mxu3 %v9001_v45  ;;  %v8589_v51 = vor.u32 %v10013_v11, %v8588_v19  ;;  %v8270_v45 = vld [vmem:[#allocation8 + $0x158] sm:$0xf0] }
 0x318   :  { %5466 = vmatpush.bf16.msrb.mxu1 %v8781_v16  ;;  %v8190_v16 = vld [vmem:[#allocation8 + $0xb8] sm:$0xf0]  ;;  %v8273_v11 = vor.u32 %v9931_v37, %v8270_v45  ;;  %v9100_v37 = vld [vmem:[#allocation8 + $0x7c8] sm:$0xf]  ;;  %v10141_v45 = vld [vmem:[#allocation8 + $0x7d4] sm:$0xf0] }
 0x319   :  { %v8193_v17 = vor.u32 %v9911_v14, %v8190_v16  ;;  %v8478_v19 = vld [vmem:[#allocation8 + $0x2f8] sm:$0xf0] }
 0x31a   :  { %5454 = vmatpush.bf16.msrb.mxu0 %v8637_v12  ;;  %5391 = vmatmul.bf16.vlgmr.msrb.gmra.mxu3 %v10808_v10  ;;  %v9939_v12 = vld [vmem:[#allocation8 + $0x18c] sm:$0xf]  ;;  %v8126_v14 = vld [vmem:[#allocation8 + $0x38] sm:$0xf0] }
 0x31b   :  { %5435 = vmatpush.bf16.msra.mxu3 %v8605_v50  ;;  %5477 = vmatpush.bf16.msrb.mxu2 %v8941_v42  ;;  %v8305_v49 = vor.u32 %v9939_v12, %v8302_v32  ;;  %v8876_v50 = vld [vmem:[#allocation8 + $0x608] sm:$0xf]  ;;  %v9927_v42 = vld [vmem:[#allocation8 + $0x12c] sm:$0xf]  ;;  %v8110_v12 = vld [vmem:[#allocation8 + $0x18] sm:$0xf0] }
 0x31c   :  { %5467 = vmatpush.bf16.msrb.mxu1 %v8765_v36  ;;  %v10093_v36 = vld [vmem:[#allocation8 + $0x654] sm:$0xf0]  ;;  %v8257_v9 = vor.u32 %v9927_v42, %v8254_v38  ;;  %v9923_v32 = vld [vmem:[#allocation8 + $0x10c] sm:$0xf] }
 0x31d   :  { %v8909_v55 = vor.u32 %v10093_v36, %v8908_v15  ;;  %v10047_v15 = vld [vmem:[#allocation8 + $0x4ec] sm:$0xf]  ;;  %v8734_v36 = vld [vmem:[#allocation8 + $0x4f8] sm:$0xf0] }
 0x31e   :  { %5455 = vmatpush.bf16.msrb.mxu0 %v8621_v59  ;;  %v5249_v18 = vpop.f32.mrf.mxu0  ;;  %v8892_v59 = vld [vmem:[#allocation8 + $0x628] sm:$0xf]  ;;  %v8737_v57 = vor.u32 %v10047_v15, %v8734_v36  ;;  %v9967_v42 = vld [vmem:[#allocation8 + $0x26c] sm:$0xf]  ;;  %v8798_v36 = vld [vmem:[#allocation8 + $0x578] sm:$0xf0] }
 0x31f   :  { %5436 = vmatpush.bf16.msra.mxu3 %v8589_v51  ;;  %5478 = vmatpush.bf16.msrb.mxu2 %v8925_v47  ;;  %v5250_v20 = vadd.f32 %v5249_v18, %v10817_v5  ;;  %v8893_v4 = vor.u32 %v10089_v60, %v8892_v59  ;;  %v10085_v5 = vld [vmem:[#allocation8 + $0x614] sm:$0xf0]  ;;  %v8525_v51 = vor.u32 %v9997_v27, %v8524_v22  ;;  %v9891_v47 = vld [vmem:[#allocation8 + $0xc] sm:$0xf]  ;;  %v9116_v18 = vld [vmem:[#allocation8 + $0x7e8] sm:$0xf] }
 0x320   :  { %5468 = vmatpush.bf16.msrb.mxu1 %v8749_v61  ;;  %v5262_v28 = vpop.f32.mrf.mxu1  ;;  %v8161_v61 = vor.u32 %v9903_v52, %v8158_v54  ;;  %v8877_v16 = vor.u32 %v10085_v5, %v8876_v50  ;;  %v8113_v52 = vor.u32 %v9891_v47, %v8110_v12  ;;  %v8492_v54 = vld [vmem:[#allocation8 + $0x308] sm:$0xf]  ;;  %v9975_v59 = vld [vmem:[#allocation8 + $0x2ac] sm:$0xf]  ;;  %v8430_v50 = vld [vmem:[#allocation8 + $0x298] sm:$0xf0] }
 0x321   :  { %5456 = vmatmul.bf16.vlgmr.msrb.gmra.mxu0 %v10768_v2  ;;  %v10824_v41 = vadd.f32 %v5262_v28, %v5250_v20  ;;  %v8446_v20 = vld [vmem:[#allocation8 + $0x2b8] sm:$0xf0]  ;;  %v10043_v28 = vld [vmem:[#allocation8 + $0x4cc] sm:$0xf] }
 0x322   :  { %5500 = vmatpush.bf16.msra.mxu0 %v8225_v62  ;;  %v8540_v62 = vld [vmem:[#allocation8 + $0x368] sm:$0xf]  ;;  %v10039_v5 = vld [vmem:[#allocation8 + $0x4ac] sm:$0xf]  ;;  %v8398_v12 = vld [vmem:[#allocation8 + $0x258] sm:$0xf0] }
 0x323   :  { %5469 = vmatmul.bf16.vlgmr.msrb.gmra.mxu1 %v10770_v1  ;;  %5437 = vmatpush.bf16.msra.mxu3 %v8573_v53  ;;  %v8541_v6 = vor.u32 %v10001_v0, %v8540_v62  ;;  %v8238_v53 = vld [vmem:[#allocation8 + $0x118] sm:$0xf0]  ;;  %v10075_v0 = vld [vmem:[#allocation8 + $0x5cc] sm:$0xf] }
 0x324   :  { %5513 = vmatpush.bf16.msra.mxu1 %v8353_v3  ;;  %v8142_v3 = vld [vmem:[#allocation8 + $0x58] sm:$0xf0]  ;;  %5479 = vmatpush.bf16.msrb.mxu2 %v8909_v55  ;;  %v9989_v55 = vld [vmem:[#allocation8 + $0x314] sm:$0xf0]  ;;  %v8241_v56 = vor.u32 %v9923_v32, %v8238_v53  ;;  %v10071_v27 = vld [vmem:[#allocation8 + $0x5ac] sm:$0xf] }
 0x325   :  { %v8145_v7 = vor.u32 %v9899_v40, %v8142_v3  ;;  %v8493_v62 = vor.u32 %v9989_v55, %v8492_v54  ;;  %v8449_v3 = vor.u32 %v9975_v59, %v8446_v20  ;;  %v10031_v32 = vld [vmem:[#allocation8 + $0x46c] sm:$0xf]  ;;  %v8670_v53 = vld [vmem:[#allocation8 + $0x478] sm:$0xf0]  ;;  %v9052_v54 = vld [vmem:[#allocation8 + $0x768] sm:$0xf] }
 0x326   :  { %5501 = vmatpush.bf16.msra.mxu0 %v8209_v8  ;;  %v9983_v8 = vld [vmem:[#allocation8 + $0x2ec] sm:$0xf]  ;;  %v5251_v34 = vpop.f32.mrf.mxu0  ;;  %v10129_v55 = vld [vmem:[#allocation8 + $0x774] sm:$0xf0]  ;;  %v8654_v59 = vld [vmem:[#allocation8 + $0x458] sm:$0xf0] }
 0x327   :  { %5438 = vmatpush.bf16.msra.mxu3 %v8557_v58  ;;  %v8481_v63 = vor.u32 %v9983_v8, %v8478_v19  ;;  %v10145_v58 = vld [vmem:[#allocation8 + $0x7f4] sm:$0xf0]  ;;  %v8830_v8 = vld [vmem:[#allocation8 + $0x5b8] sm:$0xf0]  ;;  %v9101_v19 = vor.u32 %v10141_v45, %v9100_v37  ;;  %v10063_v15 = vld [vmem:[#allocation8 + $0x56c] sm:$0xf] }
 0x328   :  { %5514 = vmatpush.bf16.msra.mxu1 %v8337_v13  ;;  %v9895_v13 = vld [vmem:[#allocation8 + $0x2c] sm:$0xf]  ;;  %5480 = vmatpush.bf16.msrb.mxu2 %v8893_v4  ;;  %v9117_v40 = vor.u32 %v10145_v58, %v9116_v18  ;;  %v8833_v38 = vor.u32 %v10071_v27, %v8830_v8  ;;  %v8414_v34 = vld [vmem:[#allocation8 + $0x278] sm:$0xf0] }
 0x329   :  { %v8129_v43 = vor.u32 %v9895_v13, %v8126_v14  ;;  %v9084_v14 = vld [vmem:[#allocation8 + $0x7a8] sm:$0xf]  ;;  %v8382_v18 = vld [vmem:[#allocation8 + $0x238] sm:$0xf0]  ;;  %v10027_v58 = vld [vmem:[#allocation8 + $0x44c] sm:$0xf] }
 0x32a   :  { %5502 = vmatpush.bf16.msra.mxu0 %v8193_v17  ;;  %v5264_v17 = vpop.f32.mrf.mxu1  ;;  %v10059_v20 = vld [vmem:[#allocation8 + $0x54c] sm:$0xf] }
 0x32b   :  { %5439 = vmatpush.bf16.msra.mxu3 %v8541_v6  ;;  %v9971_v6 = vld [vmem:[#allocation8 + $0x28c] sm:$0xf] }
 0x32c   :  { %5515 = vmatpush.bf16.msra.mxu1 %v8321_v48  ;;  %v9979_v48 = vld [vmem:[#allocation8 + $0x2cc] sm:$0xf]  ;;  %5481 = vmatpush.bf16.msrb.mxu2 %v8877_v16  ;;  %v10137_v16 = vld [vmem:[#allocation8 + $0x7b4] sm:$0xf0] }
 0x32d   :  { %v8465_v44 = vor.u32 %v9979_v48, %v8462_v30  ;;  %v9085_v17 = vor.u32 %v10137_v16, %v9084_v14  ;;  %v9068_v48 = vld [vmem:[#allocation8 + $0x788] sm:$0xf]  ;;  %v10133_v30 = vld [vmem:[#allocation8 + $0x794] sm:$0xf0]  ;;  %v10111_v45 = vld [vmem:[#allocation8 + $0x6ec] sm:$0xf] }
 0x32e   :  { %5503 = vmatpush.bf16.msra.mxu0 %v8177_v39  ;;  %v8509_v39 = vor.u32 %v9993_v24, %v8508_v35  ;;  %v8814_v35 = vld [vmem:[#allocation8 + $0x598] sm:$0xf0]  ;;  %v9020_v14 = vld [vmem:[#allocation8 + $0x728] sm:$0xf]  ;;  %v10121_v16 = vld [vmem:[#allocation8 + $0x734] sm:$0xf0] }
 0x32f   :  { %5440 = vmatpush.bf16.msra.mxu3 %v8525_v51  ;;  %5482 = vmatmul.bf16.vlgmr.msrb.gmra.mxu2 %v10797_v31  ;;  %v10035_v51 = vld [vmem:[#allocation8 + $0x48c] sm:$0xf] }
 0x330   :  { %5516 = vmatpush.bf16.msra.mxu1 %v8305_v49  ;;  %5526 = vmatpush.bf16.msra.mxu2 %v8481_v63  ;;  %v8862_v49 = vld [vmem:[#allocation8 + $0x5f8] sm:$0xf0]  ;;  %v10067_v63 = vld [vmem:[#allocation8 + $0x58c] sm:$0xf] }
 0x331   :  { %v8865_v60 = vor.u32 %v10079_v33, %v8862_v49  ;;  %v8817_v47 = vor.u32 %v10067_v63, %v8814_v35  ;;  %v8974_v63 = vld [vmem:[#allocation8 + $0x6d8] sm:$0xf0]  ;;  %v10051_v35 = vld [vmem:[#allocation8 + $0x50c] sm:$0xf] }
 0x332   :  { %5504 = vmatpush.bf16.msra.mxu0 %v8161_v61  ;;  %v8718_v61 = vld [vmem:[#allocation8 + $0x4d8] sm:$0xf0] }
 0x333   :  { %5441 = vmatpush.bf16.msra.mxu3 %v8509_v39  ;;  %v8721_v4 = vor.u32 %v10043_v28, %v8718_v61  ;;  %v8782_v28 = vld [vmem:[#allocation8 + $0x558] sm:$0xf0]  ;;  %v9053_v61 = vor.u32 %v10129_v55, %v9052_v54  ;;  %v10011_v54 = vld [vmem:[#allocation8 + $0x3cc] sm:$0xf] }
 0x334   :  { %5517 = vmatpush.bf16.msra.mxu1 %v8289_v23  ;;  %5527 = vmatpush.bf16.msra.mxu2 %v8465_v44  ;;  %v8846_v23 = vld [vmem:[#allocation8 + $0x5d8] sm:$0xf0]  ;;  %v9069_v44 = vor.u32 %v10133_v30, %v9068_v48  ;;  %v8785_v37 = vor.u32 %v10059_v20, %v8782_v28  ;;  %v9004_v30 = vld [vmem:[#allocation8 + $0x708] sm:$0xf]  ;;  %v10007_v28 = vld [vmem:[#allocation8 + $0x3ac] sm:$0xf] }
 0x335   :  { %v8849_v22 = vor.u32 %v10075_v0, %v8846_v23  ;;  %v8657_v23 = vor.u32 %v10027_v58, %v8654_v59  ;;  %v8590_v55 = vld [vmem:[#allocation8 + $0x3d8] sm:$0xf0]  ;;  %v9164_v58 = vld [vmem:[#allocation11 + $0x50] sm:$0xf] }
 0x336   :  { %5505 = vmatpush.bf16.msra.mxu0 %v8145_v7  ;;  %v8702_v7 = vld [vmem:[#allocation8 + $0x4b8] sm:$0xf0]  ;;  %v8593_v59 = vor.u32 %v10011_v54, %v8590_v55 }
 0x337   :  { %5442 = vmatpush.bf16.msra.mxu3 %v8493_v62  ;;  %v8705_v13 = vor.u32 %v10039_v5, %v8702_v7  ;;  %v9036_v62 = vld [vmem:[#allocation8 + $0x748] sm:$0xf]  ;;  %v10055_v5 = vld [vmem:[#allocation8 + $0x52c] sm:$0xf]  ;;  %v8766_v7 = vld [vmem:[#allocation8 + $0x538] sm:$0xf0] }
 0x338   :  { %5518 = vmatpush.bf16.msra.mxu1 %v8273_v11  ;;  %5528 = vmatpush.bf16.msra.mxu2 %v8449_v3  ;;  %v8433_v11 = vor.u32 %v9971_v6, %v8430_v50  ;;  %v9955_v3 = vld [vmem:[#allocation8 + $0x20c] sm:$0xf]  ;;  %v8990_v50 = vld [vmem:[#allocation8 + $0x6f8] sm:$0xf0] }
 0x339   :  { %v10023_v6 = vld [vmem:[#allocation8 + $0x42c] sm:$0xf] }
 0x33a   :  { %5506 = vmatpush.bf16.msra.mxu0 %v8129_v43  ;;  %5443 = vmatmul.bf16.vlgmr.msra.gmra.mxu3 %v10754_v29  ;;  %v8417_v43 = vor.u32 %v9967_v42, %v8414_v34  ;;  %v8993_v42 = vor.u32 %v10111_v45, %v8990_v50  ;;  %v10107_v34 = vld [vmem:[#allocation8 + $0x6cc] sm:$0xf]  ;;  %v8558_v45 = vld [vmem:[#allocation8 + $0x398] sm:$0xf0] }
 0x33b   :  { %5487 = vmatpush.bf16.msrb.mxu3 %v9117_v40  ;;  %v10125_v40 = vld [vmem:[#allocation8 + $0x754] sm:$0xf0]  ;;  %v10091_v50 = vld [vmem:[#allocation8 + $0x64c] sm:$0xf] }
 0x33c   :  { %5519 = vmatpush.bf16.msra.mxu1 %v8257_v9  ;;  %5529 = vmatpush.bf16.msra.mxu2 %v8433_v11  ;;  %v9963_v9 = vld [vmem:[#allocation8 + $0x24c] sm:$0xf]  ;;  %v9037_v8 = vor.u32 %v10125_v40, %v9036_v62  ;;  %v9156_v40 = vld [vmem:[#allocation11 + $0x40] sm:$0xf] }
 0x33d   :  { %v8401_v49 = vor.u32 %v9963_v9, %v8398_v12  ;;  %v10117_v9 = vld [vmem:[#allocation8 + $0x714] sm:$0xf0]  ;;  %v10095_v62 = vld [vmem:[#allocation8 + $0x66c] sm:$0xf] }
 0x33e   :  { %5507 = vmatpush.bf16.msra.mxu0 %v8113_v52  ;;  %v5301_v39 = vpop.f32.mrf.mxu0  ;;  %v8673_v52 = vor.u32 %v10031_v32, %v8670_v53  ;;  %v10015_v32 = vld [vmem:[#allocation8 + $0x3ec] sm:$0xf]  ;;  %v8606_v53 = vld [vmem:[#allocation8 + $0x3f8] sm:$0xf0] }
 0x33f   :  { %5488 = vmatpush.bf16.msrb.mxu3 %v9101_v19 }
 0x340   :  { %5520 = vmatpush.bf16.msra.mxu1 %v8241_v56  ;;  %5530 = vmatpush.bf16.msra.mxu2 %v8417_v43  ;;  %v9959_v56 = vld [vmem:[#allocation8 + $0x22c] sm:$0xf]  ;;  %v9180_v43 = vld [vmem:[#allocation11 + $0x70] sm:$0xf] }
 0x341   :  { %5508 = vmatmul.bf16.vlgmr.msra.gmra.mxu0 %v10747_v21  ;;  %v8686_v21 = vld [vmem:[#allocation8 + $0x498] sm:$0xf0]  ;;  %v8385_v0 = vor.u32 %v9959_v56, %v8382_v18  ;;  %v10099_v56 = vld [vmem:[#allocation8 + $0x68c] sm:$0xf] }
 0x342   :  { %5552 = vmatpush.bf16.msrb.mxu0 %v8737_v57  ;;  %v8689_v24 = vor.u32 %v10035_v51, %v8686_v21  ;;  %v8801_v57 = vor.u32 %v10063_v15, %v8798_v36  ;;  %v10019_v51 = vld [vmem:[#allocation8 + $0x40c] sm:$0xf]  ;;  %v8622_v21 = vld [vmem:[#allocation8 + $0x418] sm:$0xf0] }
 0x343   :  { %5521 = vmatmul.bf16.vlgmr.msra.gmra.mxu1 %v10750_v25  ;;  %v3901_v25 = vperm.slane %v10813_v46, 1  ;;  %5489 = vmatpush.bf16.msrb.mxu3 %v9085_v17  ;;  %v5314_v46 = vpop.f32.mrf.mxu1  ;;  %v8750_v17 = vld [vmem:[#allocation8 + $0x518] sm:$0xf0]  ;;  %v8625_v48 = vor.u32 %v10019_v51, %v8622_v21  ;;  %v10103_v15 = vld [vmem:[#allocation8 + $0x6ac] sm:$0xf] }
 0x344   :  { %5565 = vmatpush.bf16.msrb.mxu1 %v8865_v60  ;;  %5531 = vmatpush.bf16.msra.mxu2 %v8401_v49  ;;  %v8753_v12 = vor.u32 %v10051_v35, %v8750_v17  ;;  %v8958_v36 = vld [vmem:[#allocation8 + $0x6b8] sm:$0xf0]  ;;  %v8609_v49 = vor.u32 %v10015_v32, %v8606_v53  ;;  %v10175_v51 = vld [vmem:[#allocation11 + $0xe4] sm:$0xf0] }
 0x345   :  { %v5302_v33 = vadd.f32 %v5301_v39, %v3901_v25  ;;  %v9021_v25 = vor.u32 %v10121_v16, %v9020_v14  ;;  %v9999_v14 = vld [vmem:[#allocation8 + $0x36c] sm:$0xf]  ;;  %v10173_v32 = vld [vmem:[#allocation11 + $0xd4] sm:$0xf0] }
 0x346   :  { %5553 = vmatpush.bf16.msrb.mxu0 %v8721_v4  ;;  %v8366_v4 = vld [vmem:[#allocation8 + $0x218] sm:$0xf0]  ;;  %v5303_v27 = vpop.f32.mrf.mxu0  ;;  %v10087_v21 = vld [vmem:[#allocation8 + $0x62c] sm:$0xf] }
 0x347   :  { %v10831_v60 = vadd.f32 %v5314_v46, %v5302_v33  ;;  %5490 = vmatpush.bf16.msrb.mxu3 %v9069_v44  ;;  %v8369_v11 = vor.u32 %v9955_v3, %v8366_v4  ;;  %v9005_v44 = vor.u32 %v10117_v9, %v9004_v30  ;;  %v9172_v33 = vld [vmem:[#allocation11 + $0x60] sm:$0xf]  ;;  %v10159_v46 = vld [vmem:[#allocation11 + $0x64] sm:$0xf0] }
 0x348   :  { %5566 = vmatpush.bf16.msrb.mxu1 %v8849_v22  ;;  %v8638_v22 = vld [vmem:[#allocation8 + $0x438] sm:$0xf0]  ;;  %5532 = vmatpush.bf16.msra.mxu2 %v8385_v0  ;;  %v9173_v18 = vor.u32 %v10159_v46, %v9172_v33  ;;  %v10155_v3 = vld [vmem:[#allocation11 + $0x44] sm:$0xf0] }
 0x349   :  { %v8926_v0 = vld [vmem:[#allocation8 + $0x678] sm:$0xf0]  ;;  %v9995_v30 = vld [vmem:[#allocation8 + $0x34c] sm:$0xf] }
 0x34a   :  { %5554 = vmatpush.bf16.msrb.mxu0 %v8705_v13  ;;  %v8641_v13 = vor.u32 %v10023_v6, %v8638_v22  ;;  %v9244_v6 = vld [vmem:[#allocation11 + $0xf0] sm:$0xf]  ;;  %v10177_v22 = vld [vmem:[#allocation11 + $0xf4] sm:$0xf0]  ;;  %v10083_v53 = vld [vmem:[#allocation8 + $0x60c] sm:$0xf] }
 0x34b   :  { %5491 = vmatpush.bf16.msrb.mxu3 %v9053_v61  ;;  %v5316_v19 = vpop.f32.mrf.mxu1  ;;  %v8574_v61 = vld [vmem:[#allocation8 + $0x3b8] sm:$0xf0]  ;;  %v9245_v27 = vor.u32 %v10177_v22, %v9244_v6 }
 0x34c   :  { %5567 = vmatpush.bf16.msrb.mxu1 %v8833_v38  ;;  %v8769_v38 = vor.u32 %v10055_v5, %v8766_v7  ;;  %5533 = vmatpush.bf16.msra.mxu2 %v8369_v11  ;;  %v8577_v4 = vor.u32 %v10007_v28, %v8574_v61  ;;  %v8910_v5 = vld [vmem:[#allocation8 + $0x658] sm:$0xf0]  ;;  %v9157_v7 = vor.u32 %v10155_v3, %v9156_v40  ;;  %v9212_v3 = vld [vmem:[#allocation11 + $0xb0] sm:$0xf] }
 0x34d   :  { %v10153_v19 = vld [vmem:[#allocation11 + $0x34] sm:$0xf0] }
 0x34e   :  { %5555 = vmatpush.bf16.msrb.mxu0 %v8689_v24  ;;  %v10161_v24 = vld [vmem:[#allocation11 + $0x74] sm:$0xf0] }
 0x34f   :  { %5492 = vmatpush.bf16.msrb.mxu3 %v9037_v8  ;;  %v9181_v39 = vor.u32 %v10161_v24, %v9180_v43  ;;  %5534 = vmatmul.bf16.vlgmr.msra.gmra.mxu2 %v10752_v26  ;;  %v10157_v26 = vld [vmem:[#allocation11 + $0x54] sm:$0xf0]  ;;  %v9148_v8 = vld [vmem:[#allocation11 + $0x30] sm:$0xf]  ;;  %v10151_v43 = vld [vmem:[#allocation11 + $0x24] sm:$0xf0] }
 0x350   :  { %5568 = vmatpush.bf16.msrb.mxu1 %v8817_v47  ;;  %5578 = vmatpush.bf16.msrb.mxu2 %v8993_v42  ;;  %v8977_v47 = vor.u32 %v10107_v34, %v8974_v63  ;;  %v8913_v42 = vor.u32 %v10091_v50, %v8910_v5  ;;  %v9236_v34 = vld [vmem:[#allocation11 + $0xe0] sm:$0xf]  ;;  %v8894_v63 = vld [vmem:[#allocation8 + $0x638] sm:$0xf0]  ;;  %v9149_v35 = vor.u32 %v10153_v19, %v9148_v8  ;;  %v10158_v5 = vld [vmem:[#allocation11 + $0x64] sm:$0xf] }
 0x351   :  { %v9237_v17 = vor.u32 %v10175_v51, %v9236_v34  ;;  %v8897_v9 = vor.u32 %v10087_v21, %v8894_v63  ;;  %v10149_v33 = vld [vmem:[#allocation11 + $0x14] sm:$0xf0]  ;;  %v9204_v8 = vld [vmem:[#allocation11 + $0xa0] sm:$0xf]  ;;  %v10167_v19 = vld [vmem:[#allocation11 + $0xa4] sm:$0xf0] }
 0x352   :  { %5556 = vmatpush.bf16.msrb.mxu0 %v8673_v52  ;;  %v8961_v52 = vor.u32 %v10103_v15, %v8958_v36  ;;  %v8878_v15 = vld [vmem:[#allocation8 + $0x618] sm:$0xf0]  ;;  %v10156_v51 = vld [vmem:[#allocation11 + $0x54] sm:$0xf]  ;;  %v9166_v21 = vld [vmem:[#allocation11 + $0x58] sm:$0xf0] }
 0x353   :  { %5493 = vmatpush.bf16.msrb.mxu3 %v9021_v25  ;;  %v9140_v25 = vld [vmem:[#allocation11 + $0x20] sm:$0xf]  ;;  %v8881_v55 = vor.u32 %v10083_v53, %v8878_v15  ;;  %v8494_v40 = vld [vmem:[#allocation8 + $0x318] sm:$0xf0]  ;;  %v9196_v63 = vld [vmem:[#allocation11 + $0x90] sm:$0xf] }
 0x354   :  { %5569 = vmatpush.bf16.msrb.mxu1 %v8801_v57  ;;  %5579 = vmatpush.bf16.msrb.mxu2 %v8977_v47  ;;  %v8942_v57 = vld [vmem:[#allocation8 + $0x698] sm:$0xf0]  ;;  %v9141_v36 = vor.u32 %v10151_v43, %v9140_v25  ;;  %v9188_v53 = vld [vmem:[#allocation11 + $0x80] sm:$0xf]  ;;  %v10163_v15 = vld [vmem:[#allocation11 + $0x84] sm:$0xf0] }
 0x355   :  { %v8945_v20 = vor.u32 %v10099_v56, %v8942_v57  ;;  %v8526_v47 = vld [vmem:[#allocation8 + $0x358] sm:$0xf0]  ;;  %v9220_v57 = vld [vmem:[#allocation11 + $0xc0] sm:$0xf] }
 0x356   :  { %5557 = vmatpush.bf16.msrb.mxu0 %v8657_v23  ;;  %v9165_v23 = vor.u32 %v10157_v26, %v9164_v58  ;;  %v8510_v56 = vld [vmem:[#allocation8 + $0x338] sm:$0xf0] }
 0x357   :  { %5494 = vmatpush.bf16.msrb.mxu3 %v9005_v44  ;;  %v9132_v44 = vld [vmem:[#allocation11 + $0x10] sm:$0xf]  ;;  %v9086_v25 = vld [vmem:[#allocation8 + $0x7b8] sm:$0xf0] }
 0x358   :  { %5570 = vmatpush.bf16.msrb.mxu1 %v8785_v37  ;;  %5580 = vmatpush.bf16.msrb.mxu2 %v8961_v52  ;;  %v10003_v37 = vld [vmem:[#allocation8 + $0x38c] sm:$0xf]  ;;  %v9133_v58 = vor.u32 %v10149_v33, %v9132_v44  ;;  %v10176_v44 = vld [vmem:[#allocation11 + $0xf4] sm:$0xf]  ;;  %v9246_v33 = vld [vmem:[#allocation11 + $0xf8] sm:$0xf0] }
 0x359   :  { %v9991_v52 = vld [vmem:[#allocation8 + $0x32c] sm:$0xf] }
 0x35a   :  { %5558 = vmatpush.bf16.msrb.mxu0 %v8641_v13  ;;  %5495 = vmatmul.bf16.vlgmr.msrb.gmra.mxu3 %v10808_v10  ;;  %v8561_v13 = vor.u32 %v10003_v37, %v8558_v45  ;;  %v8513_v61 = vor.u32 %v9991_v52, %v8510_v56  ;;  %v10143_v37 = vld [vmem:[#allocation8 + $0x7ec] sm:$0xf]  ;;  %v9238_v52 = vld [vmem:[#allocation11 + $0xe8] sm:$0xf0]  ;;  %v9150_v56 = vld [vmem:[#allocation11 + $0x38] sm:$0xf0] }
 0x35b   :  { %5539 = vmatpush.bf16.msra.mxu3 %v8609_v49  ;;  %v8529_v49 = vor.u32 %v9995_v30, %v8526_v47  ;;  %v9158_v47 = vld [vmem:[#allocation11 + $0x48] sm:$0xf0] }
 0x35c   :  { %5571 = vmatpush.bf16.msrb.mxu1 %v8769_v38  ;;  %5581 = vmatpush.bf16.msrb.mxu2 %v8945_v20  ;;  %v8542_v38 = vld [vmem:[#allocation8 + $0x378] sm:$0xf0]  ;;  %v10147_v20 = vld [vmem:[#allocation11 + $0x4] sm:$0xf0] }
 0x35e   :  { %5559 = vmatpush.bf16.msrb.mxu0 %v8625_v48  ;;  %v10839_v11 = vpop.f32.mrf.mxu0  ;;  %v8545_v48 = vor.u32 %v9999_v14, %v8542_v38  ;;  %v9102_v14 = vld [vmem:[#allocation8 + $0x7d8] sm:$0xf0] }
 0x35f   :  { %5540 = vmatpush.bf16.msra.mxu3 %v8593_v59  ;;  %v9124_v59 = vld [vmem:[#allocation11] sm:$0xf] }
 0x360   :  { %5572 = vmatpush.bf16.msrb.mxu1 %v8753_v12  ;;  %v10841_v16 = vpop.f32.mrf.mxu1  ;;  %v9228_v12 = vld [vmem:[#allocation11 + $0xd0] sm:$0xf]  ;;  %v9125_v45 = vor.u32 %v10147_v20, %v9124_v59  ;;  %v10127_v59 = vld [vmem:[#allocation8 + $0x76c] sm:$0xf]  ;;  %v9054_v20 = vld [vmem:[#allocation8 + $0x778] sm:$0xf0] }
 0x361   :  { %5560 = vmatmul.bf16.vlgmr.msrb.gmra.mxu0 %v10768_v2  ;;  %v10837_v2 = vpop.f32.mrf.mxu2 }
 0x362   :  { %6002 = vmatpush.bf16.msra.mxu0 %v9181_v39  ;;  %v9229_v39 = vor.u32 %v10173_v32, %v9228_v12  ;;  %v10131_v32 = vld [vmem:[#allocation8 + $0x78c] sm:$0xf] }
 0x363   :  { %5573 = vmatmul.bf16.vlgmr.msrb.gmra.mxu1 %v10770_v1  ;;  %v8929_v1 = vor.u32 %v10095_v62, %v8926_v0  ;;  %5541 = vmatpush.bf16.msra.mxu3 %v8577_v4  ;;  %v9987_v62 = vld [vmem:[#allocation8 + $0x30c] sm:$0xf]  ;;  %v10160_v0 = vld [vmem:[#allocation11 + $0x74] sm:$0xf]  ;;  %v10169_v4 = vld [vmem:[#allocation11 + $0xb4] sm:$0xf0] }
 0x364   :  { %6015 = vmatpush.bf16.msra.mxu1 %v9245_v27  ;;  %v9213_v6 = vor.u32 %v10169_v4, %v9212_v3  ;;  %v8497_v50 = vor.u32 %v9987_v62, %v8494_v40  ;;  %v9142_v40 = vld [vmem:[#allocation11 + $0x28] sm:$0xf0]  ;;  %v9057_v3 = vor.u32 %v10127_v59, %v9054_v20  ;;  %v10123_v4 = vld [vmem:[#allocation8 + $0x74c] sm:$0xf] }
 0x365   :  { %5582 = vmatpush.bf16.msrb.mxu2 %v8929_v1  ;;  %v9118_v1 = vld [vmem:[#allocation8 + $0x7f8] sm:$0xf0] }
 0x366   :  { %6003 = vmatpush.bf16.msra.mxu0 %v9173_v18  ;;  %v5355_v46 = vpop.f32.mrf.mxu0  ;;  %v10171_v18 = vld [vmem:[#allocation11 + $0xc4] sm:$0xf0]  ;;  %v9121_v27 = vor.u32 %v10143_v37, %v9118_v1  ;;  %v5276_v37 = vadd.f32 %v10837_v2, %v10824_v41  ;;  %v9038_v1 = vld [vmem:[#allocation8 + $0x758] sm:$0xf0]  ;;  %v10170_v41 = vld [vmem:[#allocation11 + $0xc4] sm:$0xf] }
 0x367   :  { %5542 = vmatpush.bf16.msra.mxu3 %v8561_v13  ;;  %v9221_v26 = vor.u32 %v10171_v18, %v9220_v57  ;;  %v10139_v13 = vld [vmem:[#allocation8 + $0x7cc] sm:$0xf]  ;;  %v9249_v46 = vor.u32 %v10176_v44, %v9246_v33  ;;  %v9222_v2 = vld [vmem:[#allocation11 + $0xc8] sm:$0xf0]  ;;  %v10164_v44 = vld [vmem:[#allocation11 + $0x94] sm:$0xf] }
 0x368   :  { %6016 = vmatpush.bf16.msra.mxu1 %v9237_v17  ;;  %v5368_v54 = vpop.f32.mrf.mxu1  ;;  %v10135_v17 = vld [vmem:[#allocation8 + $0x7ac] sm:$0xf]  ;;  %v9198_v33 = vld [vmem:[#allocation11 + $0x98] sm:$0xf0] }
 0x369   :  { %v5277_v24 = vpop.f32.mrf.mxu2  ;;  %5583 = vmatpush.bf16.msrb.mxu2 %v8913_v42  ;;  %v9205_v42 = vor.u32 %v10167_v19, %v9204_v8  ;;  %v9089_v12 = vor.u32 %v10135_v17, %v9086_v25  ;;  %v10148_v8 = vld [vmem:[#allocation11 + $0x14] sm:$0xf]  ;;  %v9134_v19 = vld [vmem:[#allocation11 + $0x18] sm:$0xf0]  ;;  %v9126_v17 = vld [vmem:[#allocation11 + $0x8] sm:$0xf0] }
 0x36a   :  { %6004 = vmatpush.bf16.msra.mxu0 %v9165_v23  ;;  %v9182_v23 = vld [vmem:[#allocation11 + $0x78] sm:$0xf0]  ;;  %v9169_v24 = vor.u32 %v10156_v51, %v9166_v21  ;;  %v9137_v21 = vor.u32 %v10148_v8, %v9134_v19  ;;  %v9276_v19 = vld [vmem:[#allocation11 + $0x130] sm:$0xf] }
 0x36b   :  { %5543 = vmatpush.bf16.msra.mxu3 %v8545_v48  ;;  %v9185_v22 = vor.u32 %v10160_v0, %v9182_v23  ;;  %v10847_v48 = vld [vmem:[#allocation10] sm:$0xf]  ;;  %v10150_v23 = vld [vmem:[#allocation11 + $0x24] sm:$0xf] }
 0x36c   :  { %6017 = vmatpush.bf16.msra.mxu1 %v9229_v39  ;;  %v3902_v30 = vperm.slane %v10847_v48, 2  ;;  %v9189_v39 = vor.u32 %v10163_v15, %v9188_v53  ;;  %v10166_v53 = vld [vmem:[#allocation11 + $0xa4] sm:$0xf]  ;;  %v9206_v15 = vld [vmem:[#allocation11 + $0xa8] sm:$0xf0] }
 0x36d   :  { %5584 = vmatpush.bf16.msrb.mxu2 %v8897_v9  ;;  %v10154_v9 = vld [vmem:[#allocation11 + $0x44] sm:$0xf] }
 0x36e   :  { %6005 = vmatpush.bf16.msra.mxu0 %v9157_v7  ;;  %v9174_v7 = vld [vmem:[#allocation11 + $0x68] sm:$0xf0] }
 0x36f   :  { %5544 = vmatpush.bf16.msra.mxu3 %v8529_v49  ;;  %v9177_v38 = vor.u32 %v10158_v5, %v9174_v7  ;;  %v10174_v49 = vld [vmem:[#allocation11 + $0xe4] sm:$0xf] }
 0x370   :  { %6018 = vmatpush.bf16.msra.mxu1 %v9221_v26 }
 0x371   :  { %v10843_v28 = vpop.f32.mrf.mxu2  ;;  %5585 = vmatpush.bf16.msrb.mxu2 %v8881_v55  ;;  %v10152_v55 = vld [vmem:[#allocation11 + $0x34] sm:$0xf] }
 0x372   :  { %6006 = vmatpush.bf16.msra.mxu0 %v9149_v35  ;;  %v10165_v35 = vld [vmem:[#allocation11 + $0x94] sm:$0xf0]  ;;  %v9153_v62 = vor.u32 %v10152_v55, %v9150_v56  ;;  %v9308_v55 = vld [vmem:[#allocation11 + $0x170] sm:$0xf] }
 0x373   :  { %5545 = vmatpush.bf16.msra.mxu3 %v8513_v61  ;;  %v9197_v43 = vor.u32 %v10165_v35, %v9196_v63  ;;  %v9241_v61 = vor.u32 %v10174_v49, %v9238_v52  ;;  %v10146_v35 = vld [vmem:[#allocation11 + $0x4] sm:$0xf]  ;;  %v5328_v49 = vadd.f32 %v10843_v28, %v10831_v60  ;;  %v10193_v56 = vld [vmem:[#allocation11 + $0x174] sm:$0xf0]  ;;  %v9300_v60 = vld [vmem:[#allocation11 + $0x160] sm:$0xf] }
 0x374   :  { %5586 = vmatmul.bf16.vlgmr.msrb.gmra.mxu2 %v10797_v31  ;;  %6019 = vmatpush.bf16.msra.mxu1 %v9213_v6  ;;  %v9105_v31 = vor.u32 %v10139_v13, %v9102_v14  ;;  %v9230_v6 = vld [vmem:[#allocation11 + $0xd8] sm:$0xf0]  ;;  %v9041_v14 = vor.u32 %v10123_v4, %v9038_v1  ;;  %v10191_v28 = vld [vmem:[#allocation11 + $0x164] sm:$0xf0]  ;;  %v10189_v4 = vld [vmem:[#allocation11 + $0x154] sm:$0xf0] }
 0x376   :  { %6007 = vmatpush.bf16.msra.mxu0 %v9141_v36  ;;  %v9070_v36 = vld [vmem:[#allocation8 + $0x798] sm:$0xf0] }
 0x377   :  { %5546 = vmatpush.bf16.msra.mxu3 %v8497_v50  ;;  %v9073_v18 = vor.u32 %v10131_v32, %v9070_v36  ;;  %v9145_v50 = vor.u32 %v10150_v23, %v9142_v40  ;;  %v9301_v23 = vor.u32 %v10191_v28, %v9300_v60  ;;  %v10180_v60 = vld [vmem:[#allocation11 + $0x114] sm:$0xf]  ;;  %v9262_v28 = vld [vmem:[#allocation11 + $0x118] sm:$0xf0] }
 0x378   :  { %6020 = vmatpush.bf16.msra.mxu1 %v9205_v42  ;;  %v10119_v42 = vld [vmem:[#allocation8 + $0x72c] sm:$0xf] }
 0x379   :  { %v5329_v34 = vpop.f32.mrf.mxu2 }
 0x37a   :  { %6008 = vmatpush.bf16.msra.mxu0 %v9133_v58  ;;  %5547 = vmatmul.bf16.vlgmr.msra.gmra.mxu3 %v10754_v29  ;;  %v9161_v29 = vor.u32 %v10154_v9, %v9158_v47  ;;  %v9214_v9 = vld [vmem:[#allocation11 + $0xb8] sm:$0xf0] }
 0x37b   :  { %5591 = vmatpush.bf16.msrb.mxu3 %v9121_v27 }
 0x37c   :  { %6021 = vmatpush.bf16.msra.mxu1 %v9197_v43  ;;  %v10115_v43 = vld [vmem:[#allocation8 + $0x70c] sm:$0xf] }
 0x37e   :  { %6009 = vmatpush.bf16.msra.mxu0 %v9125_v45  ;;  %v5405_v57 = vpop.f32.mrf.mxu0  ;;  %v10172_v45 = vld [vmem:[#allocation11 + $0xd4] sm:$0xf] }
 0x37f   :  { %5592 = vmatpush.bf16.msrb.mxu3 %v9105_v31  ;;  %v5406_v58 = vadd.f32 %v5405_v57, %v3902_v30  ;;  %v9233_v5 = vor.u32 %v10172_v45, %v9230_v6  ;;  %v9225_v31 = vor.u32 %v10170_v41, %v9222_v2  ;;  %v10168_v30 = vld [vmem:[#allocation11 + $0xb4] sm:$0xf]  ;;  %v10162_v57 = vld [vmem:[#allocation11 + $0x84] sm:$0xf]  ;;  %v9284_v6 = vld [vmem:[#allocation11 + $0x140] sm:$0xf] }
 0x380   :  { %6022 = vmatpush.bf16.msra.mxu1 %v9189_v39  ;;  %v5418_v26 = vpop.f32.mrf.mxu1  ;;  %v9217_v32 = vor.u32 %v10168_v30, %v9214_v9  ;;  %v9209_v39 = vor.u32 %v10166_v53, %v9206_v15  ;;  %v10181_v41 = vld [vmem:[#allocation11 + $0x114] sm:$0xf0]  ;;  %v10190_v9 = vld [vmem:[#allocation11 + $0x164] sm:$0xf] }
 0x381   :  { %v10850_v54 = vpop.f32.mrf.mxu2  ;;  %v10852_v0 = vadd.f32 %v5418_v26, %v5406_v58  ;;  %v9190_v58 = vld [vmem:[#allocation11 + $0x88] sm:$0xf0] }
 0x382   :  { %6054 = vmatpush.bf16.msrb.mxu0 %v9185_v22  ;;  %v5288_v22 = vpop.f32.mrf.mxu3  ;;  %v9193_v26 = vor.u32 %v10162_v57, %v9190_v58  ;;  %v9278_v57 = vld [vmem:[#allocation11 + $0x138] sm:$0xf0]  ;;  %v10182_v58 = vld [vmem:[#allocation11 + $0x124] sm:$0xf] }
 0x383   :  { %5593 = vmatpush.bf16.msrb.mxu3 %v9089_v12  ;;  %v5289_v7 = vadd.f32 %v5288_v22, %v5276_v37  ;;  %v9129_v12 = vor.u32 %v10146_v35, %v9126_v17  ;;  %v10187_v22 = vld [vmem:[#allocation11 + $0x144] sm:$0xf0]  ;;  %v10192_v35 = vld [vmem:[#allocation11 + $0x174] sm:$0xf]  ;;  %v9310_v17 = vld [vmem:[#allocation11 + $0x178] sm:$0xf0] }
 0x384   :  { %6067 = vmatpush.bf16.msrb.mxu1 %v9249_v46 }
 0x385   :  { %v5604_v34 = vmax.f32 %v5289_v7, 0.0  ;;  %v9285_v7 = vor.u32 %v10187_v22, %v9284_v6 }
 0x386   :  { %6055 = vmatpush.bf16.msrb.mxu0 %v9177_v38  ;;  %v5407_v13 = vpop.f32.mrf.mxu0  ;;  %v9022_v38 = vld [vmem:[#allocation8 + $0x738] sm:$0xf0] }
 0x387   :  { %5594 = vmatpush.bf16.msrb.mxu3 %v9073_v18  ;;  %v5608_v63 = vpack.c.bf16 %v5604_v34, %v5604_v34  ;;  %v9025_v25 = vor.u32 %v10119_v42, %v9022_v38  ;;  %v9309_v18 = vor.u32 %v10193_v56, %v9308_v55  ;;  %v10185_v13 = vld [vmem:[#allocation11 + $0x134] sm:$0xf0]  ;;  %v9268_v42 = vld [vmem:[#allocation11 + $0x120] sm:$0xf]  ;;  %v10183_v38 = vld [vmem:[#allocation11 + $0x124] sm:$0xf0] }
 0x388   :  { %6068 = vmatpush.bf16.msrb.mxu1 %v9241_v61  ;;  %v5420_v51 = vpop.f32.mrf.mxu1  ;;  %v9269_v34 = vor.u32 %v10183_v38, %v9268_v42  ;;  %v10184_v56 = vld [vmem:[#allocation11 + $0x134] sm:$0xf]  ;;  %v9348_v38 = vld [vmem:[#allocation11 + $0x1c0] sm:$0xf] }
 0x389   :  { %v5381_v27 = vpop.f32.mrf.mxu2  ;;  %6010 = vmatmul.bf16.vlgmr.msra.gmra.mxu0 %v5608_v63  ;;  %6028 = vmatpush.bf16.msra.mxu2 %v9309_v18  ;;  %v9260_v51 = vld [vmem:[#allocation11 + $0x110] sm:$0xf]  ;;  %v9281_v18 = vor.u32 %v10184_v56, %v9278_v57  ;;  %v10202_v56 = vld [vmem:[#allocation11 + $0x1c4] sm:$0xf]  ;;  %v9350_v57 = vld [vmem:[#allocation11 + $0x1c8] sm:$0xf0] }
 0x38a   :  { %6056 = vmatpush.bf16.msrb.mxu0 %v9169_v24  ;;  %v9006_v24 = vld [vmem:[#allocation8 + $0x718] sm:$0xf0]  ;;  %v5290_v47 = vpop.f32.mrf.mxu3  ;;  %v9261_v2 = vor.u32 %v10181_v41, %v9260_v51 }
 0x38b   :  { %5595 = vmatpush.bf16.msrb.mxu3 %v9057_v3  ;;  %v9009_v36 = vor.u32 %v10115_v43, %v9006_v24  ;;  %v9292_v3 = vld [vmem:[#allocation11 + $0x150] sm:$0xf]  ;;  %v9313_v43 = vor.u32 %v10192_v35, %v9310_v17  ;;  %v9302_v47 = vld [vmem:[#allocation11 + $0x168] sm:$0xf0] }
 0x38c   :  { %6069 = vmatpush.bf16.msrb.mxu1 %v9233_v5  ;;  %v9293_v37 = vor.u32 %v10189_v4, %v9292_v3  ;;  %v9305_v53 = vor.u32 %v10190_v9, %v9302_v47  ;;  %v9254_v3 = vld [vmem:[#allocation11 + $0x108] sm:$0xf0]  ;;  %v10197_v9 = vld [vmem:[#allocation11 + $0x194] sm:$0xf0]  ;;  %v9316_v47 = vld [vmem:[#allocation11 + $0x180] sm:$0xf] }
 0x38d   :  { %6029 = vmatpush.bf16.msra.mxu2 %v9301_v23  ;;  %v9265_v23 = vor.u32 %v10180_v60, %v9262_v28  ;;  %v9342_v60 = vld [vmem:[#allocation11 + $0x1b8] sm:$0xf0] }
 0x38e   :  { %6057 = vmatpush.bf16.msrb.mxu0 %v9161_v29  ;;  %v9201_v29 = vor.u32 %v10164_v44, %v9198_v33 }
 0x38f   :  { %5596 = vmatpush.bf16.msrb.mxu3 %v9041_v14  ;;  %v9277_v14 = vor.u32 %v10185_v13, %v9276_v19  ;;  %v10205_v13 = vld [vmem:[#allocation11 + $0x1d4] sm:$0xf0] }
 0x390   :  { %6070 = vmatpush.bf16.msrb.mxu1 %v9225_v31  ;;  %v10179_v31 = vld [vmem:[#allocation11 + $0x104] sm:$0xf0] }
 0x391   :  { %v10859_v59 = vpop.f32.mrf.mxu2  ;;  %6030 = vmatpush.bf16.msra.mxu2 %v9293_v37 }
 0x392   :  { %6058 = vmatpush.bf16.msrb.mxu0 %v9153_v62  ;;  %v5340_v46 = vpop.f32.mrf.mxu3  ;;  %v5432_v4 = vadd.f32 %v10859_v59, %v10852_v0  ;;  %v9356_v59 = vld [vmem:[#allocation11 + $0x1d0] sm:$0xf] }
 0x393   :  { %5597 = vmatpush.bf16.msrb.mxu3 %v9025_v25  ;;  %v5341_v52 = vadd.f32 %v5340_v46, %v5328_v49  ;;  %v3903_v25 = vperm.slane %v10847_v48, 3  ;;  %v9286_v46 = vld [vmem:[#allocation11 + $0x148] sm:$0xf0] }
 0x394   :  { %6071 = vmatpush.bf16.msrb.mxu1 %v9217_v32 }
 0x395   :  { %v5354_v20 = vadd.f32 %v10839_v11, %v5341_v52  ;;  %6031 = vmatpush.bf16.msra.mxu2 %v9285_v7  ;;  %v10207_v7 = vld [vmem:[#allocation11 + $0x1e4] sm:$0xf0] }
 0x396   :  { %6059 = vmatpush.bf16.msrb.mxu0 %v9145_v50 }
 0x397   :  { %5598 = vmatpush.bf16.msrb.mxu3 %v9009_v36  ;;  %v5367_v40 = vadd.f32 %v10841_v16, %v5354_v20  ;;  %v10188_v36 = vld [vmem:[#allocation11 + $0x154] sm:$0xf] }
 0x398   :  { %6072 = vmatpush.bf16.msrb.mxu1 %v9209_v39  ;;  %v9294_v39 = vld [vmem:[#allocation11 + $0x158] sm:$0xf0] }
 0x399   :  { %v5433_v1 = vpop.f32.mrf.mxu2  ;;  %v5380_v11 = vadd.f32 %v10850_v54, %v5367_v40  ;;  %6032 = vmatpush.bf16.msra.mxu2 %v9277_v14  ;;  %v9297_v44 = vor.u32 %v10188_v36, %v9294_v39  ;;  %v10178_v40 = vld [vmem:[#allocation11 + $0x104] sm:$0xf]  ;;  %v9357_v14 = vor.u32 %v10205_v13, %v9356_v59  ;;  %v9374_v36 = vld [vmem:[#allocation11 + $0x1f8] sm:$0xf0] }
 0x39a   :  { %6060 = vmatpush.bf16.msrb.mxu0 %v9137_v21  ;;  %5599 = vmatmul.bf16.vlgmr.msrb.gmra.mxu3 %v10808_v10  ;;  %v5342_v62 = vpop.f32.mrf.mxu3  ;;  %v9252_v21 = vld [vmem:[#allocation11 + $0x100] sm:$0xf]  ;;  %v9257_v37 = vor.u32 %v10178_v40, %v9254_v3  ;;  %v10196_v3 = vld [vmem:[#allocation11 + $0x194] sm:$0xf] }
 0x39c   :  { %6073 = vmatpush.bf16.msrb.mxu1 %v9201_v29  ;;  %v10186_v29 = vld [vmem:[#allocation11 + $0x144] sm:$0xf] }
 0x39d   :  { %6033 = vmatpush.bf16.msra.mxu2 %v9269_v34  ;;  %v9289_v55 = vor.u32 %v10186_v29, %v9286_v46 }
 0x39e   :  { %6061 = vmatpush.bf16.msrb.mxu0 %v9129_v12  ;;  %v10862_v61 = vpop.f32.mrf.mxu0 }
 0x3a0   :  { %6074 = vmatpush.bf16.msrb.mxu1 %v9193_v26  ;;  %v10864_v10 = vpop.f32.mrf.mxu1  ;;  %v9270_v26 = vld [vmem:[#allocation11 + $0x128] sm:$0xf0] }
 0x3a1   :  { %6062 = vmatmul.bf16.vlgmr.msrb.gmra.mxu0 %v5608_v63  ;;  %6034 = vmatpush.bf16.msra.mxu2 %v9261_v2  ;;  %v9253_v63 = vor.u32 %v10179_v31, %v9252_v21  ;;  %v9273_v20 = vor.u32 %v10182_v58, %v9270_v26  ;;  %v9340_v31 = vld [vmem:[#allocation11 + $0x1b0] sm:$0xf]  ;;  %v9353_v58 = vor.u32 %v10202_v56, %v9350_v57 }
 0x3a2   :  { %v5392_v5 = vpop.f32.mrf.mxu3 }
 0x3a3   :  { %v5393_v27 = vadd.f32 %v5392_v5, %v5380_v11  ;;  %v10209_v11 = vld [vmem:[#allocation11 + $0x1f4] sm:$0xf0]  ;;  %v9364_v5 = vld [vmem:[#allocation11 + $0x1e0] sm:$0xf] }
 0x3a5   :  { %v5605_v8 = vmax.f32 %v5393_v27, 0.0  ;;  %6035 = vmatpush.bf16.msra.mxu2 %v9253_v63  ;;  %v10201_v63 = vld [vmem:[#allocation11 + $0x1b4] sm:$0xf0] }
 0x3a6   :  { %v5459_v45 = vpop.f32.mrf.mxu0  ;;  %v9341_v35 = vor.u32 %v10201_v63, %v9340_v31 }
 0x3a7   :  { %v5609_v16 = vpack.c.bf16 %v5605_v8, %v5605_v8  ;;  %v9372_v45 = vld [vmem:[#allocation11 + $0x1f0] sm:$0xf]  ;;  %v9365_v8 = vor.u32 %v10207_v7, %v9364_v5 }
 0x3a8   :  { %v5472_v50 = vpop.f32.mrf.mxu1  ;;  %v9373_v6 = vor.u32 %v10209_v11, %v9372_v45 }
 0x3a9   :  { %6023 = vmatmul.bf16.vlgmr.msra.gmra.mxu1 %v5609_v16  ;;  %6080 = vmatpush.bf16.msrb.mxu2 %v9313_v43 }
 0x3aa   :  { %v5394_v54 = vpop.f32.mrf.mxu3  ;;  %6041 = vmatpush.bf16.msra.mxu3 %v9373_v6  ;;  %v10194_v6 = vld [vmem:[#allocation11 + $0x184] sm:$0xf] }
 0x3ad   :  { %6081 = vmatpush.bf16.msrb.mxu2 %v9305_v53  ;;  %v10208_v53 = vld [vmem:[#allocation11 + $0x1f4] sm:$0xf] }
 0x3ae   :  { %6042 = vmatpush.bf16.msra.mxu3 %v9365_v8 }
 0x3b1   :  { %6082 = vmatpush.bf16.msrb.mxu2 %v9297_v44  ;;  %v9377_v44 = vor.u32 %v10208_v53, %v9374_v36  ;;  %v10212_v53 = vld [vmem:[#allocation14 + $0x10] sm:$0xff] }
 0x3b2   :  { %v5483_v24 = vpop.f32.mrf.mxu2  ;;  %6043 = vmatpush.bf16.msra.mxu3 %v9357_v14  ;;  %v10224_v36 = vld [vmem:[#allocation14 + $0x70] sm:$0xff] }
 0x3b5   :  { %6083 = vmatpush.bf16.msrb.mxu2 %v9289_v55 }
 0x3b9   :  { %6075 = vmatmul.bf16.vlgmr.msrb.gmra.mxu1 %v5609_v16  ;;  %6084 = vmatpush.bf16.msrb.mxu2 %v9281_v18 }
 0x3ba   :  { %v5485_v33 = vpop.f32.mrf.mxu2 }
 0x3bb   :  { %v10206_v33 = vld [vmem:[#allocation11 + $0x1e4] sm:$0xf] }
 0x3bd   :  { %v5444_v49 = vpop.f32.mrf.mxu3  ;;  %6085 = vmatpush.bf16.msrb.mxu2 %v9273_v20  ;;  %v10200_v20 = vld [vmem:[#allocation11 + $0x1b4] sm:$0xf] }
 0x3be   :  { %v5509_v30 = vpop.f32.mrf.mxu0  ;;  %v5445_v1 = vadd.f32 %v5444_v49, %v5432_v4  ;;  %v10204_v49 = vld [vmem:[#allocation11 + $0x1d4] sm:$0xf]  ;;  %v9345_v28 = vor.u32 %v10200_v20, %v9342_v60  ;;  %v9326_v4 = vld [vmem:[#allocation11 + $0x198] sm:$0xf0] }
 0x3bf   :  { %v5510_v12 = vadd.f32 %v5509_v30, %v3903_v25  ;;  %v10199_v25 = vld [vmem:[#allocation11 + $0x1a4] sm:$0xf0]  ;;  %v9324_v30 = vld [vmem:[#allocation11 + $0x190] sm:$0xf] }
 0x3c0   :  { %v5522_v32 = vpop.f32.mrf.mxu1  ;;  %v5458_v22 = vadd.f32 %v10862_v61, %v5445_v1  ;;  %v10203_v61 = vld [vmem:[#allocation11 + $0x1c4] sm:$0xf0]  ;;  %v9329_v1 = vor.u32 %v10196_v3, %v9326_v4 }
 0x3c1   :  { %v10869_v15 = vadd.f32 %v5522_v32, %v5510_v12  ;;  %6086 = vmatpush.bf16.msrb.mxu2 %v9265_v23  ;;  %v9349_v41 = vor.u32 %v10203_v61, %v9348_v38  ;;  %v9325_v12 = vor.u32 %v10197_v9, %v9324_v30  ;;  %v10195_v32 = vld [vmem:[#allocation11 + $0x184] sm:$0xf0]  ;;  %v9334_v23 = vld [vmem:[#allocation11 + $0x1a8] sm:$0xf0]  ;;  %v10213_v9 = vld [vmem:[#allocation14 + $0x18] sm:$0xff] }
 0x3c2   :  { %v5471_v0 = vadd.f32 %v10864_v10, %v5458_v22  ;;  %v9332_v10 = vld [vmem:[#allocation11 + $0x1a0] sm:$0xf]  ;;  %v9317_v39 = vor.u32 %v10195_v32, %v9316_v47  ;;  %v9318_v22 = vld [vmem:[#allocation11 + $0x188] sm:$0xf0] }
 0x3c3   :  { %6044 = vmatpush.bf16.msra.mxu3 %v9349_v41  ;;  %v9333_v43 = vor.u32 %v10199_v25, %v9332_v10  ;;  %v9321_v5 = vor.u32 %v10194_v6, %v9318_v22  ;;  %v10225_v10 = vld [vmem:[#allocation14 + $0x78] sm:$0xff]  ;;  %v10216_v25 = vld [vmem:[#allocation14 + $0x30] sm:$0xff]  ;;  %v10214_v30 = vld [vmem:[#allocation14 + $0x20] sm:$0xff] }
 0x3c4   :  { %v5484_v16 = vadd.f32 %v5483_v24, %v5471_v0  ;;  %6255 = vmatpush.bf16.msra.mxu1 %v10225_v10 }
 0x3c5   :  { %v5446_v62 = vpop.f32.mrf.mxu3  ;;  %6087 = vmatpush.bf16.msrb.mxu2 %v9257_v37 }
 0x3c6   :  { %v5511_v48 = vpop.f32.mrf.mxu0  ;;  %v10198_v62 = vld [vmem:[#allocation11 + $0x1a4] sm:$0xf] }
 0x3c7   :  { %6045 = vmatpush.bf16.msra.mxu3 %v9341_v35  ;;  %v9366_v48 = vld [vmem:[#allocation11 + $0x1e8] sm:$0xf0]  ;;  %v9337_v40 = vor.u32 %v10198_v62, %v9334_v23 }
 0x3c8   :  { %v5524_v52 = vpop.f32.mrf.mxu1  ;;  %v9369_v29 = vor.u32 %v10206_v33, %v9366_v48  ;;  %6256 = vmatpush.bf16.msra.mxu1 %v10224_v36  ;;  %v10210_v33 = vld [vmem:[#allocation14] sm:$0xff] }
 0x3c9   :  { %v9358_v52 = vld [vmem:[#allocation11 + $0x1d8] sm:$0xf0]  ;;  %v10222_v48 = vld [vmem:[#allocation14 + $0x60] sm:$0xff] }
 0x3ca   :  { %v9361_v55 = vor.u32 %v10204_v49, %v9358_v52  ;;  %v10219_v49 = vld [vmem:[#allocation14 + $0x48] sm:$0xff]  ;;  %v10218_v52 = vld [vmem:[#allocation14 + $0x40] sm:$0xff] }
 0x3cb   :  { %6046 = vmatpush.bf16.msra.mxu3 %v9333_v43  ;;  %v10215_v43 = vld [vmem:[#allocation14 + $0x28] sm:$0xff] }
 0x3cf   :  { %6047 = vmatpush.bf16.msra.mxu3 %v9325_v12 }
 0x3d2   :  { %v10878_v19 = vpop.f32.mrf.mxu2 }
 0x3d3   :  { %6048 = vmatpush.bf16.msra.mxu3 %v9317_v39  ;;  %v5536_v11 = vadd.f32 %v10878_v19, %v10869_v15  ;;  %v10211_v39 = vld [vmem:[#allocation14 + $0x8] sm:$0xff] }
 0x3d7   :  { %6093 = vmatpush.bf16.msrb.mxu3 %v9377_v44  ;;  %v10223_v44 = vld [vmem:[#allocation14 + $0x68] sm:$0xff] }
 0x3d8   :  { %6257 = vmatpush.bf16.msra.mxu1 %v10223_v44 }
 0x3da   :  { %v5537_v2 = vpop.f32.mrf.mxu2 }
 0x3db   :  { %6094 = vmatpush.bf16.msrb.mxu3 %v9369_v29  ;;  %v10221_v29 = vld [vmem:[#allocation14 + $0x58] sm:$0xff] }
 0x3dc   :  { %6258 = vmatpush.bf16.msra.mxu1 %v10222_v48 }
 0x3dd   :  { %v5496_v34 = vpop.f32.mrf.mxu3 }
 0x3de   :  { %v10874_v50 = vpop.f32.mrf.mxu0  ;;  %v5497_v54 = vadd.f32 %v5496_v34, %v5484_v16  ;;  %v5676_v34 = vld [vmem:[#allocation13] sm:$0x3] }
 0x3df   :  { %6095 = vmatpush.bf16.msrb.mxu3 %v9361_v55 }
 0x3e0   :  { %v10876_v27 = vpop.f32.mrf.mxu1  ;;  %v5606_v21 = vmax.f32 %v5497_v54, 0.0  ;;  %6259 = vmatpush.bf16.msra.mxu1 %v10221_v29 }
 0x3e2   :  { %v5610_v17 = vpack.c.bf16 %v5606_v21, %v5606_v21 }
 0x3e3   :  { %6096 = vmatpush.bf16.msrb.mxu3 %v9353_v58 }
 0x3e4   :  { %6036 = vmatmul.bf16.vlgmr.msra.gmra.mxu2 %v5610_v17 }
 0x3e5   :  { %v5498_v24 = vpop.f32.mrf.mxu3 }
 0x3e6   :  { %v5563_v42 = vpop.f32.mrf.mxu0 }
 0x3e7   :  { %6097 = vmatpush.bf16.msrb.mxu3 %v9345_v28 }
 0x3e8   :  { %v5576_v51 = vpop.f32.mrf.mxu1 }
 0x3e9   :  { %v5678_v51 = vperm.slane %v5676_v34, 0 }
 0x3eb   :  { %6098 = vmatpush.bf16.msrb.mxu3 %v9337_v40 }
 0x3ef   :  { %6099 = vmatpush.bf16.msrb.mxu3 %v9329_v1  ;;  %v10244_v1 = vld [vmem:[#allocation16] ss:$0 sm:$0xff] }
 0x3f3   :  { %6100 = vmatpush.bf16.msrb.mxu3 %v9321_v5 }
 0x3f4   :  { %6088 = vmatmul.bf16.vlgmr.msrb.gmra.mxu2 %v5610_v17  ;;  %v10217_v17 = vld [vmem:[#allocation14 + $0x38] sm:$0xff] }
 0x3f5   :  { %6242 = vmatpush.bf16.msra.mxu0 %v10217_v17 }
 0x3f7   :  { %v5587_v46 = vpop.f32.mrf.mxu2 }
 0x3f9   :  { %6243 = vmatpush.bf16.msra.mxu0 %v10216_v25 }
 0x3fd   :  { %v5548_v18 = vpop.f32.mrf.mxu3  ;;  %6244 = vmatpush.bf16.msra.mxu0 %v10215_v43 }
 0x3fe   :  { %v5549_v7 = vadd.f32 %v5548_v18, %v5536_v11 }
 0x3ff   :  { %v5589_v26 = vpop.f32.mrf.mxu2 }
 0x400   :  { %v5562_v8 = vadd.f32 %v10874_v50, %v5549_v7  ;;  %v5679_v50 = vperm.slane %v5676_v34, 1 }
 0x401   :  { %6245 = vmatpush.bf16.msra.mxu0 %v10214_v30 }
 0x402   :  { %v5575_v59 = vadd.f32 %v10876_v27, %v5562_v8 }
 0x404   :  { %v5588_v13 = vadd.f32 %v5587_v46, %v5575_v59  ;;  %v10220_v46 = vld [vmem:[#allocation14 + $0x50] sm:$0xff] }
 0x405   :  { %v5550_v37 = vpop.f32.mrf.mxu3  ;;  %6246 = vmatpush.bf16.msra.mxu0 %v10213_v9  ;;  %6260 = vmatpush.bf16.msra.mxu1 %v10220_v46 }
 0x406   :  { %v6011_v45 = vpop.f32.mrf.mxu0  ;;  %v6269_v37 = vlaneseq }
 0x407   :  { %v6012_v41 = vadd.f32 %v6011_v45, %v5678_v51 }
 0x408   :  { %v6270_v45 = vand.u32 127, %v6269_v37 }
 0x409   :  { %6247 = vmatpush.bf16.msra.mxu0 %v10212_v53  ;;  %6261 = vmatpush.bf16.msra.mxu1 %v10219_v49 }
 0x40a   :  { %vm6271_vm0 = vcmp.lt.s32.totalorder %v6270_v45, 10 }
 0x40d   :  { %6248 = vmatpush.bf16.msra.mxu0 %v10211_v39  ;;  %6262 = vmatpush.bf16.msra.mxu1 %v10218_v52 }
 0x40e   :  { %v6013_v0 = vpop.f32.mrf.mxu0 }
 0x411   :  { %6249 = vmatpush.bf16.msra.mxu0 %v10210_v33 }
 0x41d   :  { %v5600_v14 = vpop.f32.mrf.mxu3 }
 0x41e   :  { %v6063_v16 = vpop.f32.mrf.mxu0  ;;  %v5601_v42 = vadd.f32 %v5600_v14, %v5588_v13 }
 0x41f   :  { %v6064_v31 = vadd.f32 %v6063_v16, %v5679_v50 }
 0x420   :  { %v5607_v38 = vmax.f32 %v5601_v42, 0.0 }
 0x422   :  { %v5611_v61 = vpack.c.bf16 %v5607_v38, %v5607_v38 }
 0x424   :  { %6049 = vmatmul.bf16.vlgmr.msra.gmra.mxu3 %v5611_v61 }
 0x425   :  { %v5602_v15 = vpop.f32.mrf.mxu3 }
 0x426   :  { %v6065_v19 = vpop.f32.mrf.mxu0  ;;  %v6024_v54 = vpop.f32.mrf.mxu1 }
 0x427   :  { %v6025_v2 = vadd.f32 %v6024_v54, %v6012_v41 }
 0x42e   :  { %v6026_v21 = vpop.f32.mrf.mxu1 }
 0x434   :  { %6101 = vmatmul.bf16.vlgmr.msrb.gmra.mxu3 %v5611_v61 }
 0x436   :  { %v6076_v63 = vpop.f32.mrf.mxu1 }
 0x437   :  { %v6077_v27 = vadd.f32 %v6076_v63, %v6064_v31 }
 0x43e   :  { %v6078_v35 = vpop.f32.mrf.mxu1 }
 0x467   :  { %v6037_v24 = vpop.f32.mrf.mxu2 }
 0x468   :  { %v6038_v55 = vadd.f32 %v6037_v24, %v6025_v2 }
 0x46f   :  { %v6039_v47 = vpop.f32.mrf.mxu2 }
 0x477   :  { %v6089_v12 = vpop.f32.mrf.mxu2 }
 0x478   :  { %v6090_v20 = vadd.f32 %v6089_v12, %v6077_v27 }
 0x47f   :  { %v6091_v32 = vpop.f32.mrf.mxu2 }
 0x4a7   :  { %v6050_v56 = vpop.f32.mrf.mxu3 }
 0x4a8   :  { %v6051_v57 = vadd.f32 %v6050_v56, %v6038_v55 }
 0x4aa   :  { %10261 = vtanh.f32 %v6051_v57 }
 0x4af   :  { %v6052_v18 = vpop.f32.mrf.mxu3 }
 0x4b0   :  { %v10262_v58 = vpop.eup %10261 }
 0x4b1   :  { %v6108_v26 = vpack.c.bf16 %v10262_v58, %v10262_v58 }
 0x4b3   :  { %6250 = vmatmul.bf16.vlgmr.msra.gmra.mxu0 %v6108_v26 }
 0x4b7   :  { %v6102_v60 = vpop.f32.mrf.mxu3 }
 0x4b8   :  { %v6103_v28 = vadd.f32 %v6102_v60, %v6090_v20 }
 0x4ba   :  { %10263 = vtanh.f32 %v6103_v28 }
 0x4bf   :  { %v6104_v62 = vpop.f32.mrf.mxu3 }
 0x4c0   :  { %v10264_v23 = vpop.eup %10263 }
 0x4c1   :  { %v6109_v40 = vpack.c.bf16 %v10264_v23, %v10264_v23 }
 0x4c3   :  { %6263 = vmatmul.bf16.vlgmr.msra.gmra.mxu1 %v6109_v40 }
 0x530   :  { %v6251_v3 = vpop.f32.mrf.mxu0 }
 0x531   :  { %v6252_v11 = vadd.f32 %v10244_v1, %v6251_v3 }
 0x538   :  { %v6253_v4 = vpop.f32.mrf.mxu0 }
 0x540   :  { %v6264_v6 = vpop.f32.mrf.mxu1 }
 0x541   :  { %v6265_v22 = vadd.f32 %v6264_v6, %v6252_v11 }
 0x543   :  { %v6268_v5 = vmax.f32 %v6265_v22, 0.0 }
 0x545   :  { %v6274_v7 = vsel %vm6271_vm0, %v6268_v5, -inf }
 0x546   :  { %6275 = vmax.xlane.f32.xlu0 %v6274_v7 }
 0x548   :  { %v6266_v8 = vpop.f32.mrf.mxu1 }
 0x5b9   :  { %v6276_v0 = vpop.xlane.xlu0 %6275 }
 0x5ba   :  { %v6277_v59 = vsub.f32 %v6274_v7, %v6276_v0 }
 0x5bc   :  { %v6278_v13 = vmul.f32 1.442695, %v6277_v59 }
 0x5be   :  { %10265 = vpow2.f32 %v6278_v13 }
 0x5c4   :  { %v10266_v14 = vpop.eup %10265 }
 0x5c5   :  { %6280 = vadd.xlane.f32.xlu0 %v10266_v14 }
 0x638   :  { %v6281_v16 = vpop.xlane.xlu0 %6280 }
 0x639   :  { %10267 = vrcp.f32 %v6281_v16 }
 0x63f   :  { %v10268_v42 = vpop.eup %10267 }
 0x640   :  { %v6283_v38 = vmul.f32 %v10268_v42, %v10266_v14 }
 0x642   :  { %6284 = vst [vmem:[#allocation17] sm:$0xff] %v6283_v38 }
 0x643   :  { %6295 = dma.vmem_to_hbm [thread:$0]  %s6291_s8, 128, %s6293_s13, [#allocation4]  }
 0x644   :  { %10522 = dma.done.wait [#allocation4], 128  }
 0x645   :  { %10523 = vsyncadd [#allocation4], 4294967168 }
 0x646   :  { %6300 = vsyncpa [#allocation3], 1 }
 0x647   :  { %6301 = vsyncpa [#allocation6], 1 }
 0x648   :  { %6302 = vsyncpa [#allocation9], 1 }
 0x649   :  { %6303 = vsyncpa [#allocation12], 1 }
 0x64a   :  { %6304 = vsyncpa [#allocation15], 1 }
 0x64b   :  { %6305 = vsyncpa [#allocation4], 1 }

</bundles_post_ra>
